<compile_context>
chip_gen: v6e
topology: v6e:2x2x1
jax: 0.10.0
libtpu: 0.0.40
codegen_flags: <defaults>
</compile_context>

<pallas_src>
import functools

import numpy as np
import jax
import jax.numpy as jnp
from jax.experimental import pallas as pl
from jax.experimental.pallas import tpu as pltpu


# ------------------------------ small helpers ------------------------------ #

def _rup(x, m):
    return ((x + m - 1) // m) * m


def _pick_tile(total, candidates=(512, 256, 128)):
    for c in candidates:
        if total >= c and total % c == 0:
            return c
    return total


def _choose_m_block(M, per_image, target=2048):
    """Largest lane-block that is a whole number of images, 128-aligned, <= target."""
    n_img = M // per_image
    best = None
    for k in range(n_img, 0, -1):
        blk = k * per_image
        if M % blk or blk % 128:
            continue
        if blk <= target:
            return blk
        best = blk
    return best if best is not None else M   # full-array block is always legal


def _shift_lanes(x, off):
    """y[:, m] = x[:, (m + off) % n]  (static lane rotation via two slices + concat)."""
    if off == 0:
        return x
    return jnp.concatenate([x[:, off:], x[:, :off]], axis=1)


# --------------------- tiled, pipelined GEMM (upconv) ---------------------- #

def _gemm_kernel(w_ref, x_ref, b_ref, o_ref, acc_ref, *, relu):
    k = pl.program_id(1)

    @pl.when(k == 0)
    def _():
        acc_ref[...] = jnp.zeros_like(acc_ref)

    acc_ref[...] += jnp.dot(w_ref[...], x_ref[...],
                            preferred_element_type=jnp.float32)

    @pl.when(k == pl.num_programs(1) - 1)
    def _():
        r = acc_ref[...] + b_ref[...]
        if relu:
            r = jnp.maximum(r, 0.0)
        o_ref[...] = r.astype(o_ref.dtype)


def gemm_bias(w, x, b, *, relu=False, out_dtype=jnp.bfloat16):
    """(R,K) @ (K,M) + b -> (R,M).  Lane-dense over M, bf16 MXU operands, f32 accumulate."""
    R, K = w.shape
    K2, M = x.shape
    assert K == K2, (K, K2)
    R_p, K_p, M_p = _rup(R, 8), _rup(K, 8), _rup(M, 128)
    w_p = jnp.pad(w.astype(jnp.bfloat16), ((0, R_p - R), (0, K_p - K)))
    x_p = jnp.pad(x.astype(jnp.bfloat16), ((0, K_p - K), (0, M_p - M)))
    b_p = jnp.pad(b.astype(jnp.float32), (0, R_p - R)).reshape(R_p, 1)

    tm = _pick_tile(M_p)
    tk = K_p if (K_p <= 512 or K_p % 128 != 0) else _pick_tile(K_p)
    grid = (M_p // tm, K_p // tk)

    out = pl.pallas_call(
        functools.partial(_gemm_kernel, relu=relu),
        out_shape=jax.ShapeDtypeStruct((R_p, M_p), out_dtype),
        grid=grid,
        in_specs=[
            pl.BlockSpec((R_p, tk), lambda m, k: (0, k)),
            pl.BlockSpec((tk, tm), lambda m, k: (k, m)),
            pl.BlockSpec((R_p, 1), lambda m, k: (0, 0)),
        ],
        out_specs=pl.BlockSpec((R_p, tm), lambda m, k: (0, m)),
        scratch_shapes=[pltpu.VMEM((R_p, tm), jnp.float32)],
        compiler_params=pltpu.CompilerParams(
            dimension_semantics=("parallel", "arbitrary"),
            vmem_limit_bytes=32 * 1024 * 1024),
    )(w_p, x_p, b_p)
    return out[:R, :M]


# ------------------ fused conv kernels (flat lane layout) ------------------ #

def _taps_matmul(x, masks, w_ref, shifts):
    """sum_t  W_t @ (shift_t(x) * mask_t);  x:(Cin_p, m) bf16, masks:(T, m) bf16."""
    acc = None
    for t, off in enumerate(shifts):
        xt = _shift_lanes(x, off) * masks[t:t + 1, :]
        p = jnp.dot(w_ref[t], xt, preferred_element_type=jnp.float32)
        acc = p if acc is None else acc + p
    return acc


def _stage_kernel(skip_ref, up_ref, mask_ref, w1a_ref, w1b_ref, b1_ref,
                  w2_ref, b2_ref, o_ref, *, shifts):
    masks = mask_ref[...]
    # conv1 over the (virtual) channel-concat [skip, upconv] -- concat fused via split weights
    acc = _taps_matmul(skip_ref[...], masks, w1a_ref, shifts)
    acc = acc + _taps_matmul(up_ref[...], masks, w1b_ref, shifts)
    y1 = jnp.maximum(acc + b1_ref[...], 0.0).astype(jnp.bfloat16)
    # conv2 + ReLU; intermediate activation never leaves VMEM/vregs
    acc2 = _taps_matmul(y1, masks, w2_ref, shifts)
    o_ref[...] = jnp.maximum(acc2 + b2_ref[...], 0.0).astype(o_ref.dtype)


def _conv_kernel(x_ref, mask_ref, w_ref, b_ref, o_ref, *, shifts, relu):
    acc = _taps_matmul(x_ref[...], mask_ref[...], w_ref, shifts)
    acc = acc + b_ref[...]
    if relu:
        acc = jnp.maximum(acc, 0.0)
    o_ref[...] = acc.astype(o_ref.dtype)


def fused_block_stage(skip_flat, up_flat, masks, shifts, w1a, w1b, b1, w2, b2, *, hw):
    Ca_p, M = skip_flat.shape
    Cb_p = up_flat.shape[0]
    Co_p = w2.shape[1]
    n_tap = masks.shape[0]
    m_blk = _choose_m_block(M, hw)
    return pl.pallas_call(
        functools.partial(_stage_kernel, shifts=shifts),
        out_shape=jax.ShapeDtypeStruct((Co_p, M), jnp.bfloat16),
        grid=(M // m_blk,),
        in_specs=[
            pl.BlockSpec((Ca_p, m_blk), lambda i: (0, i)),
            pl.BlockSpec((Cb_p, m_blk), lambda i: (0, i)),
            pl.BlockSpec((n_tap, m_blk), lambda i: (0, i)),
            pl.BlockSpec(w1a.shape, lambda i: (0, 0, 0)),
            pl.BlockSpec(w1b.shape, lambda i: (0, 0, 0)),
            pl.BlockSpec(b1.shape, lambda i: (0, 0)),
            pl.BlockSpec(w2.shape, lambda i: (0, 0, 0)),
            pl.BlockSpec(b2.shape, lambda i: (0, 0)),
        ],
        out_specs=pl.BlockSpec((Co_p, m_blk), lambda i: (0, i)),
        compiler_params=pltpu.CompilerParams(
            dimension_semantics=("parallel",),
            vmem_limit_bytes=32 * 1024 * 1024),
    )(skip_flat, up_flat, masks, w1a, w1b, b1, w2, b2)


def conv_same_flat(x_flat, masks, shifts, w_taps, b, *, hw, relu, out_dtype):
    Ci_p, M = x_flat.shape
    Co_p = w_taps.shape[1]
    n_tap = masks.shape[0]
    m_blk = _choose_m_block(M, hw)
    return pl.pallas_call(
        functools.partial(_conv_kernel, shifts=shifts, relu=relu),
        out_shape=jax.ShapeDtypeStruct((Co_p, M), out_dtype),
        grid=(M // m_blk,),
        in_specs=[
            pl.BlockSpec((Ci_p, m_blk), lambda i: (0, i)),
            pl.BlockSpec((n_tap, m_blk), lambda i: (0, i)),
            pl.BlockSpec(w_taps.shape, lambda i: (0, 0, 0)),
            pl.BlockSpec(b.shape, lambda i: (0, 0)),
        ],
        out_specs=pl.BlockSpec((Co_p, m_blk), lambda i: (0, i)),
        compiler_params=pltpu.CompilerParams(
            dimension_semantics=("parallel",),
            vmem_limit_bytes=32 * 1024 * 1024),
    )(x_flat, masks, w_taps, b)


# --------------------------- layout / weight prep --------------------------- #

def nchw_to_flat(x, c_pad):
    N, C, H, W = x.shape
    f = x.transpose(1, 0, 2, 3).reshape(C, N * H * W)
    if c_pad > C:
        f = jnp.pad(f, ((0, c_pad - C), (0, 0)))
    return f.astype(jnp.bfloat16)


def flat_to_nchw(f, C, N, H, W):
    return f[:C, :].reshape(C, N, H, W).transpose(1, 0, 2, 3)


def conv_w_to_taps(w, cout_pad, cin_pad):
    """(Cout, Cin, k, k) -> (k*k, cout_pad, cin_pad) bf16, tap order (dh major, dw minor)."""
    Cout, Cin, kh, kw = w.shape
    t = w.transpose(2, 3, 0, 1).reshape(kh * kw, Cout, Cin)
    t = jnp.pad(t, ((0, 0), (0, cout_pad - Cout), (0, cin_pad - Cin)))
    return t.astype(jnp.bfloat16)


def bias_col(b, c_pad):
    return jnp.pad(b.astype(jnp.float32), (0, c_pad - b.shape[0])).reshape(c_pad, 1)


def build_tap_masks(N, H, W, ksize):
    """Border-validity masks (k*k, N*H*W) bf16 and flat lane shifts for 'same' conv."""
    assert ksize % 2 == 1  # TODO(synk): even 'same' kernels (asymmetric padding) not implemented
    r = ksize // 2
    hh = np.arange(H)[:, None]
    ww = np.arange(W)[None, :]
    masks, shifts = [], []
    for dh in range(-r, r + 1):
        for dw in range(-r, r + 1):
            valid = ((hh + dh >= 0) & (hh + dh < H) &
                     (ww + dw >= 0) & (ww + dw < W)).astype(np.float32)
            masks.append(np.broadcast_to(valid[None], (N, H, W)).reshape(-1))
            shifts.append(dh * W + dw)
    return jnp.asarray(np.stack(masks, 0), dtype=jnp.bfloat16), tuple(shifts)


def upconv_gemm(x_flat, w, b, N, H, W):
    """ConvTranspose2d (kernel_size == stride) on a (Cin_p, N*H*W) flat activation."""
    Cin, Cout, k, _ = w.shape
    Cin_p = x_flat.shape[0]
    wg = w.transpose(2, 3, 1, 0).reshape(k * k * Cout, Cin)      # rows ordered (a, b, cout)
    wg = jnp.pad(wg, ((0, 0), (0, Cin_p - Cin)))
    bg = jnp.tile(b, k * k)
    y = gemm_bias(wg, x_flat, bg, relu=False, out_dtype=jnp.bfloat16)   # (k*k*Cout, N*H*W)
    # pixel-shuffle the taps onto the upsampled grid (small XLA rearrange)
    y = y.reshape(k, k, Cout, N, H, W).transpose(2, 3, 4, 0, 5, 1)
    up = y.reshape(Cout, N * (k * H) * (k * W))
    Co_p = _rup(Cout, 8)
    if Co_p > Cout:
        up = jnp.pad(up, ((0, Co_p - Cout), (0, 0)))
    return up


# ------------------------------- forward pass ------------------------------- #

def decoder_forward(x, feats, params):
    N, C0, H, W = x.shape
    cur = nchw_to_flat(x, _rup(C0, 8))
    for i in range(len(params["blocks"])):
        w_up = params["upconvs"][i]["w"]
        k = w_up.shape[2]                      # kernel_size == stride
        cur = upconv_gemm(cur, w_up, params["upconvs"][i]["b"], N, H, W)
        H, W = k * H, k * W
        skip = feats[-(i + 1)]
        Cskip = skip.shape[1]
        skip_flat = nchw_to_flat(skip, _rup(Cskip, 8))
        w1 = params["blocks"][i]["conv1_w"]
        Cout = w1.shape[0]
        Co_p = _rup(Cout, 8)
        masks, shifts = build_tap_masks(N, H, W, w1.shape[2])
        w1a = conv_w_to_taps(w1[:, :Cskip], Co_p, skip_flat.shape[0])
        w1b = conv_w_to_taps(w1[:, Cskip:], Co_p, cur.shape[0])
        w2 = conv_w_to_taps(params["blocks"][i]["conv2_w"], Co_p, Co_p)
        cur = fused_block_stage(
            skip_flat, cur, masks, shifts,
            w1a, w1b, bias_col(params["blocks"][i]["conv1_b"], Co_p),
            w2, bias_col(params["blocks"][i]["conv2_b"], Co_p),
            hw=H * W)
    ncls = params["conv_w"].shape[0]
    ncls_p = _rup(ncls, 8)
    masks, shifts = build_tap_masks(N, H, W, params["conv_w"].shape[2])
    wf = conv_w_to_taps(params["conv_w"], ncls_p, cur.shape[0])
    out_flat = conv_same_flat(cur, masks, shifts, wf, bias_col(params["conv_b"], ncls_p),
                              hw=H * W, relu=False, out_dtype=jnp.float32)
    return flat_to_nchw(out_flat, ncls, N, H, W)


# --------------------------- pure-JAX f32 reference -------------------------- #

def ref_decoder_forward(x, feats, params):
    def conv_same(x, w, b):
        kh, kw = w.shape[2], w.shape[3]
        p = kh // 2
        H, W = x.shape[2], x.shape[3]
        xp = jnp.pad(x, ((0, 0), (0, 0), (p, p), (p, p)))
        out = None
        for i in range(kh):
            for j in range(kw):
                c = jnp.einsum("nchw,oc->nohw", xp[:, :, i:i + H, j:j + W], w[:, :, i, j])
                out = c if out is None else out + c
        return out + b[None, :, None, None]

    def conv_t(x, w, b):
        k = w.shape[2]
        N, _, H, W = x.shape
        Cout = w.shape[1]
        y = jnp.einsum("nchw,coab->nohawb", x, w).reshape(N, Cout, H * k, W * k)
        return y + b[None, :, None, None]

    out = x
    for i in range(len(params["blocks"])):
        out = conv_t(out, params["upconvs"][i]["w"], params["upconvs"][i]["b"])
        out = jnp.concatenate([feats[-(i + 1)], out], axis=1)
        out = jax.nn.relu(conv_same(out, params["blocks"][i]["conv1_w"],
                                    params["blocks"][i]["conv1_b"]))
        out = jax.nn.relu(conv_same(out, params["blocks"][i]["conv2_w"],
                                    params["blocks"][i]["conv2_b"]))
    return conv_same(out, params["conv_w"], params["conv_b"])


# --------------------------------- params ----------------------------------- #

def init_params(key, channel_sizes, num_classes, upconv_k, block_k):
    def nrm(k, shape, scale=0.1):
        return scale * jax.random.normal(k, shape, dtype=jnp.float32)

    keys = iter(jax.random.split(key, 64))
    n = len(channel_sizes)
    params = {"upconvs": [], "blocks": []}
    for i in range(n - 1):
        ci, co = channel_sizes[i], channel_sizes[i + 1]
        params["upconvs"].append({
            "w": nrm(next(keys), (ci, co, upconv_k, upconv_k)),   # ConvTranspose2d layout
            "b": nrm(next(keys), (co,)),
        })
        params["blocks"].append({
            "conv1_w": nrm(next(keys), (co, ci, block_k, block_k)),
            "conv1_b": nrm(next(keys), (co,)),
            "conv2_w": nrm(next(keys), (co, co, block_k, block_k)),
            "conv2_b": nrm(next(keys), (co,)),
        })
    params["conv_w"] = nrm(next(keys), (num_classes, channel_sizes[-1], 3, 3))
    params["conv_b"] = nrm(next(keys), (num_classes,))
    return params


# ----------------------------------- main ------------------------------------ #

if __name__ == "__main__":
    # cfg: channel_sizes=[8,4,2], upconv_kernel_size=2, stride=2, block_kernel_size=3
    channel_sizes = [8, 4, 2]
    num_classes = 3
    upconv_k, stride, block_k = 2, 2, 3
    assert upconv_k == stride  # TODO(synk): overlapping-tap ConvTranspose2d not implemented

    key = jax.random.PRNGKey(0)
    k_p, k_x, k_f1, k_f2 = jax.random.split(key, 4)
    params = init_params(k_p, channel_sizes, num_classes, upconv_k, block_k)

    B, H, W = 2, 4, 4
    x = jax.random.normal(k_x, (B, channel_sizes[0], H, W), dtype=jnp.float32)     # (2, 8, 4, 4)
    # encoder skip features: feats[-1] used first (cs[0]-cs[1]=4 ch at 2Hx2W), then feats[-2]
    feat_deep = jax.random.normal(
        k_f2, (B, channel_sizes[1] - channel_sizes[2], 4 * H, 4 * W), dtype=jnp.float32)
    feat_shallow = jax.random.normal(
        k_f1, (B, channel_sizes[0] - channel_sizes[1], 2 * H, 2 * W), dtype=jnp.float32)
    feats = [feat_deep, feat_shallow]

    out = jax.jit(decoder_forward)(x, feats, params)
    out = jax.block_until_ready(out)

    expected_shape = (B, num_classes, 4 * H, 4 * W)
    assert out.shape == expected_shape, (out.shape, expected_shape)
    assert bool(jnp.all(jnp.isfinite(out)))

    ref = ref_decoder_forward(x, feats, params)
    max_err = float(jnp.max(jnp.abs(out - ref)))
    assert max_err < 5e-2, f"max abs err vs f32 reference: {max_err}"

    print("KERNEL_OK")
</pallas_src>

<mosaic_0001>
module attributes {stable_mosaic.version = 11 : i64} {
  func.func @_gemm_kernel(%arg0: i32, %arg1: i32, %arg2: memref<16x8xbf16, #tpu.memory_space<vmem>>, %arg3: memref<8x128xbf16, #tpu.memory_space<vmem>>, %arg4: memref<16x1xf32, #tpu.memory_space<vmem>>, %arg5: memref<16x128xbf16, #tpu.memory_space<vmem>>, %arg6: memref<16x128xf32, #tpu.memory_space<vmem>>) attributes {dimension_semantics = [#tpu.dimension_semantics<parallel>, #tpu.dimension_semantics<arbitrary>], iteration_bounds = array<i64: 1, 1>, scalar_prefetch = 0 : i64, scratch_operands = 1 : i64, tpu.core_type = #tpu.core_type<tc>, window_params = [{transform_indices = @transform_0, window_bounds = array<i64: 16, 8>}, {transform_indices = @transform_1, window_bounds = array<i64: 8, 128>}, {pipeline_mode = #tpu.pipeline_mode<synchronous>, transform_indices = @transform_2, window_bounds = array<i64: 16, 1>}, {transform_indices = @transform_3, window_bounds = array<i64: 16, 128>}]} {
    %c0_i32 = arith.constant 0 : i32
    %0 = arith.cmpi eq, %arg1, %c0_i32 : i32
    %1 = arith.extui %0 : i1 to i32
    %c0_i32_0 = arith.constant 0 : i32
    %2 = arith.cmpi ne, %1, %c0_i32_0 : i32
    scf.if %2 {
      %cst_10 = arith.constant 0.000000e+00 : f32
      %12 = vector.broadcast %cst_10 : f32 to vector<16x128xf32>
      %c0_11 = arith.constant 0 : index
      %c0_12 = arith.constant 0 : index
      %13 = vector.load %arg6[%c0_11, %c0_12] : memref<16x128xf32, #tpu.memory_space<vmem>>, vector<16x128xf32>
      tpu.vector_store %arg6[%c0_11, %c0_12], %12 {strides = array<i32>} : memref<16x128xf32, #tpu.memory_space<vmem>>, vector<16x128xf32>,
    } else {
    }
    %c0 = arith.constant 0 : index
    %c0_1 = arith.constant 0 : index
    %3 = vector.load %arg6[%c0, %c0_1] : memref<16x128xf32, #tpu.memory_space<vmem>>, vector<16x128xf32>
    %c0_2 = arith.constant 0 : index
    %c0_3 = arith.constant 0 : index
    %4 = vector.load %arg2[%c0_2, %c0_3] : memref<16x8xbf16, #tpu.memory_space<vmem>>, vector<16x8xbf16>
    %c0_4 = arith.constant 0 : index
    %c0_5 = arith.constant 0 : index
    %5 = vector.load %arg3[%c0_4, %c0_5] : memref<8x128xbf16, #tpu.memory_space<vmem>>, vector<8x128xbf16>
    %cst = arith.constant dense<0.000000e+00> : vector<16x128xf32>
    %6 = tpu.matmul %4, %5, %cst {dimension_numbers = #tpu.dot_dimension_numbers<[1], [0], [0], [1], [0, 0, 1, 1], [], []>} : vector<16x8xbf16>, vector<8x128xbf16>, vector<16x128xf32> -> vector<16x128xf32>
    %7 = arith.addf %3, %6 : vector<16x128xf32>
    %c0_6 = arith.constant 0 : index
    %c0_7 = arith.constant 0 : index
    %8 = vector.load %arg6[%c0_6, %c0_7] : memref<16x128xf32, #tpu.memory_space<vmem>>, vector<16x128xf32>
    tpu.vector_store %arg6[%c0_6, %c0_7], %7 {strides = array<i32>} : memref<16x128xf32, #tpu.memory_space<vmem>>, vector<16x128xf32>,
    %c0_i32_8 = arith.constant 0 : i32
    %9 = arith.cmpi eq, %arg1, %c0_i32_8 : i32
    %10 = arith.extui %9 : i1 to i32
    %c0_i32_9 = arith.constant 0 : i32
    %11 = arith.cmpi ne, %10, %c0_i32_9 : i32
    scf.if %11 {
      %c0_10 = arith.constant 0 : index
      %c0_11 = arith.constant 0 : index
      %12 = vector.load %arg6[%c0_10, %c0_11] : memref<16x128xf32, #tpu.memory_space<vmem>>, vector<16x128xf32>
      %c0_12 = arith.constant 0 : index
      %c0_13 = arith.constant 0 : index
      %13 = vector.load %arg4[%c0_12, %c0_13] : memref<16x1xf32, #tpu.memory_space<vmem>>, vector<16x1xf32>
      %14 = vector.broadcast %13 : vector<16x1xf32> to vector<16x128xf32>
      %15 = arith.addf %12, %14 : vector<16x128xf32>
      %16 = arith.truncf %15 : vector<16x128xf32> to vector<16x128xbf16>
      %c0_14 = arith.constant 0 : index
      %c0_15 = arith.constant 0 : index
      %17 = vector.load %arg5[%c0_14, %c0_15] : memref<16x128xbf16, #tpu.memory_space<vmem>>, vector<16x128xbf16>
      tpu.vector_store %arg5[%c0_14, %c0_15], %16 {strides = array<i32>} : memref<16x128xbf16, #tpu.memory_space<vmem>>, vector<16x128xbf16>,
    } else {
    }
    return
  }
  func.func @transform_0(%arg0: i32, %arg1: i32) -> (i32, i32) {
    %c0_i32 = arith.constant 0 : i32
    %c0_i32_0 = arith.constant 0 : i32
    return %c0_i32, %arg1 : i32, i32
  }
  func.func @transform_1(%arg0: i32, %arg1: i32) -> (i32, i32) {
    %c0_i32 = arith.constant 0 : i32
    return %arg1, %arg0 : i32, i32
  }
  func.func @transform_2(%arg0: i32, %arg1: i32) -> (i32, i32) {
    %c0_i32 = arith.constant 0 : i32
    %c0_i32_0 = arith.constant 0 : i32
    %c0_i32_1 = arith.constant 0 : i32
    return %c0_i32, %c0_i32_0 : i32, i32
  }
  func.func @transform_3(%arg0: i32, %arg1: i32) -> (i32, i32) {
    %c0_i32 = arith.constant 0 : i32
    %c0_i32_0 = arith.constant 0 : i32
    return %c0_i32, %arg0 : i32, i32
  }
}

module attributes {stable_mosaic.version = 11 : i64} {
  func.func @_stage_kernel(%arg0: i32, %arg1: memref<8x128xbf16, #tpu.memory_space<vmem>>, %arg2: memref<8x128xbf16, #tpu.memory_space<vmem>>, %arg3: memref<9x128xbf16, #tpu.memory_space<vmem>>, %arg4: memref<9x8x8xbf16, #tpu.memory_space<vmem>>, %arg5: memref<9x8x8xbf16, #tpu.memory_space<vmem>>, %arg6: memref<8x1xf32, #tpu.memory_space<vmem>>, %arg7: memref<9x8x8xbf16, #tpu.memory_space<vmem>>, %arg8: memref<8x1xf32, #tpu.memory_space<vmem>>, %arg9: memref<8x128xbf16, #tpu.memory_space<vmem>>) attributes {dimension_semantics = [#tpu.dimension_semantics<parallel>], iteration_bounds = array<i64: 1>, scalar_prefetch = 0 : i64, scratch_operands = 0 : i64, tpu.core_type = #tpu.core_type<tc>, window_params = [{transform_indices = @transform_0, window_bounds = array<i64: 8, 128>}, {transform_indices = @transform_1, window_bounds = array<i64: 8, 128>}, {transform_indices = @transform_2, window_bounds = array<i64: 9, 128>}, {pipeline_mode = #tpu.pipeline_mode<synchronous>, transform_indices = @transform_3, window_bounds = array<i64: 9, 8, 8>}, {pipeline_mode = #tpu.pipeline_mode<synchronous>, transform_indices = @transform_4, window_bounds = array<i64: 9, 8, 8>}, {pipeline_mode = #tpu.pipeline_mode<synchronous>, transform_indices = @transform_5, window_bounds = array<i64: 8, 1>}, {pipeline_mode = #tpu.pipeline_mode<synchronous>, transform_indices = @transform_6, window_bounds = array<i64: 9, 8, 8>}, {pipeline_mode = #tpu.pipeline_mode<synchronous>, transform_indices = @transform_7, window_bounds = array<i64: 8, 1>}, {transform_indices = @transform_8, window_bounds = array<i64: 8, 128>}]} {
    %c0 = arith.constant 0 : index
    %c0_0 = arith.constant 0 : index
    %0 = vector.load %arg3[%c0, %c0_0] : memref<9x128xbf16, #tpu.memory_space<vmem>>, vector<9x128xbf16>
    %c0_1 = arith.constant 0 : index
    %c0_2 = arith.constant 0 : index
    %1 = vector.load %arg1[%c0_1, %c0_2] : memref<8x128xbf16, #tpu.memory_space<vmem>>, vector<8x128xbf16>
    %2 = vector.extract_strided_slice %1 {offsets = [0, 119], sizes = [8, 9], strides = [1, 1]} : vector<8x128xbf16> to vector<8x9xbf16>
    %3 = vector.extract_strided_slice %1 {offsets = [0, 0], sizes = [8, 119], strides = [1, 1]} : vector<8x128xbf16> to vector<8x119xbf16>
    %4 = tpu.concatenate %2, %3 in 1 : vector<8x9xbf16>, vector<8x119xbf16> -> vector<8x128xbf16>
    %5 = vector.extract_strided_slice %0 {offsets = [0, 0], sizes = [1, 128], strides = [1, 1]} : vector<9x128xbf16> to vector<1x128xbf16>
    %6 = vector.broadcast %5 : vector<1x128xbf16> to vector<8x128xbf16>
    %7 = arith.mulf %4, %6 : vector<8x128xbf16>
    %c0_3 = arith.constant 0 : index
    %c0_4 = arith.constant 0 : index
    %c0_5 = arith.constant 0 : index
    %8 = vector.load %arg4[%c0_3, %c0_4, %c0_5] : memref<9x8x8xbf16, #tpu.memory_space<vmem>>, vector<1x8x8xbf16>
    %9 = vector.shape_cast %8 : vector<1x8x8xbf16> to vector<8x8xbf16>
    %cst = arith.constant dense<0.000000e+00> : vector<8x128xf32>
    %10 = tpu.matmul %9, %7, %cst {dimension_numbers = #tpu.dot_dimension_numbers<[1], [0], [0], [1], [0, 0, 1, 1], [], []>} : vector<8x8xbf16>, vector<8x128xbf16>, vector<8x128xf32> -> vector<8x128xf32>
    %11 = vector.extract_strided_slice %1 {offsets = [0, 120], sizes = [8, 8], strides = [1, 1]} : vector<8x128xbf16> to vector<8x8xbf16>
    %12 = vector.extract_strided_slice %1 {offsets = [0, 0], sizes = [8, 120], strides = [1, 1]} : vector<8x128xbf16> to vector<8x120xbf16>
    %13 = tpu.concatenate %11, %12 in 1 : vector<8x8xbf16>, vector<8x120xbf16> -> vector<8x128xbf16>
    %14 = vector.extract_strided_slice %0 {offsets = [1, 0], sizes = [1, 128], strides = [1, 1]} : vector<9x128xbf16> to vector<1x128xbf16>
    %15 = vector.broadcast %14 : vector<1x128xbf16> to vector<8x128xbf16>
    %16 = arith.mulf %13, %15 : vector<8x128xbf16>
    %c1 = arith.constant 1 : index
    %c0_6 = arith.constant 0 : index
    %c0_7 = arith.constant 0 : index
    %17 = vector.load %arg4[%c1, %c0_6, %c0_7] : memref<9x8x8xbf16, #tpu.memory_space<vmem>>, vector<1x8x8xbf16>
    %18 = vector.shape_cast %17 : vector<1x8x8xbf16> to vector<8x8xbf16>
    %cst_8 = arith.constant dense<0.000000e+00> : vector<8x128xf32>
    %19 = tpu.matmul %18, %16, %cst_8 {dimension_numbers = #tpu.dot_dimension_numbers<[1], [0], [0], [1], [0, 0, 1, 1], [], []>} : vector<8x8xbf16>, vector<8x128xbf16>, vector<8x128xf32> -> vector<8x128xf32>
    %20 = arith.addf %10, %19 : vector<8x128xf32>
    %21 = vector.extract_strided_slice %1 {offsets = [0, 121], sizes = [8, 7], strides = [1, 1]} : vector<8x128xbf16> to vector<8x7xbf16>
    %22 = vector.extract_strided_slice %1 {offsets = [0, 0], sizes = [8, 121], strides = [1, 1]} : vector<8x128xbf16> to vector<8x121xbf16>
    %23 = tpu.concatenate %21, %22 in 1 : vector<8x7xbf16>, vector<8x121xbf16> -> vector<8x128xbf16>
    %24 = vector.extract_strided_slice %0 {offsets = [2, 0], sizes = [1, 128], strides = [1, 1]} : vector<9x128xbf16> to vector<1x128xbf16>
    %25 = vector.broadcast %24 : vector<1x128xbf16> to vector<8x128xbf16>
    %26 = arith.mulf %23, %25 : vector<8x128xbf16>
    %c2 = arith.constant 2 : index
    %c0_9 = arith.constant 0 : index
    %c0_10 = arith.constant 0 : index
    %27 = vector.load %arg4[%c2, %c0_9, %c0_10] : memref<9x8x8xbf16, #tpu.memory_space<vmem>>, vector<1x8x8xbf16>
    %28 = vector.shape_cast %27 : vector<1x8x8xbf16> to vector<8x8xbf16>
    %cst_11 = arith.constant dense<0.000000e+00> : vector<8x128xf32>
    %29 = tpu.matmul %28, %26, %cst_11 {dimension_numbers = #tpu.dot_dimension_numbers<[1], [0], [0], [1], [0, 0, 1, 1], [], []>} : vector<8x8xbf16>, vector<8x128xbf16>, vector<8x128xf32> -> vector<8x128xf32>
    %30 = arith.addf %20, %29 : vector<8x128xf32>
    %31 = vector.extract_strided_slice %1 {offsets = [0, 127], sizes = [8, 1], strides = [1, 1]} : vector<8x128xbf16> to vector<8x1xbf16>
    %32 = vector.extract_strided_slice %1 {offsets = [0, 0], sizes = [8, 127], strides = [1, 1]} : vector<8x128xbf16> to vector<8x127xbf16>
    %33 = tpu.concatenate %31, %32 in 1 : vector<8x1xbf16>, vector<8x127xbf16> -> vector<8x128xbf16>
    %34 = vector.extract_strided_slice %0 {offsets = [3, 0], sizes = [1, 128], strides = [1, 1]} : vector<9x128xbf16> to vector<1x128xbf16>
    %35 = vector.broadcast %34 : vector<1x128xbf16> to vector<8x128xbf16>
    %36 = arith.mulf %33, %35 : vector<8x128xbf16>
    %c3 = arith.constant 3 : index
    %c0_12 = arith.constant 0 : index
    %c0_13 = arith.constant 0 : index
    %37 = vector.load %arg4[%c3, %c0_12, %c0_13] : memref<9x8x8xbf16, #tpu.memory_space<vmem>>, vector<1x8x8xbf16>
    %38 = vector.shape_cast %37 : vector<1x8x8xbf16> to vector<8x8xbf16>
    %cst_14 = arith.constant dense<0.000000e+00> : vector<8x128xf32>
    %39 = tpu.matmul %38, %36, %cst_14 {dimension_numbers = #tpu.dot_dimension_numbers<[1], [0], [0], [1], [0, 0, 1, 1], [], []>} : vector<8x8xbf16>, vector<8x128xbf16>, vector<8x128xf32> -> vector<8x128xf32>
    %40 = arith.addf %30, %39 : vector<8x128xf32>
    %41 = vector.extract_strided_slice %0 {offsets = [4, 0], sizes = [1, 128], strides = [1, 1]} : vector<9x128xbf16> to vector<1x128xbf16>
    %42 = vector.broadcast %41 : vector<1x128xbf16> to vector<8x128xbf16>
    %43 = arith.mulf %1, %42 : vector<8x128xbf16>
    %c4 = arith.constant 4 : index
    %c0_15 = arith.constant 0 : index
    %c0_16 = arith.constant 0 : index
    %44 = vector.load %arg4[%c4, %c0_15, %c0_16] : memref<9x8x8xbf16, #tpu.memory_space<vmem>>, vector<1x8x8xbf16>
    %45 = vector.shape_cast %44 : vector<1x8x8xbf16> to vector<8x8xbf16>
    %cst_17 = arith.constant dense<0.000000e+00> : vector<8x128xf32>
    %46 = tpu.matmul %45, %43, %cst_17 {dimension_numbers = #tpu.dot_dimension_numbers<[1], [0], [0], [1], [0, 0, 1, 1], [], []>} : vector<8x8xbf16>, vector<8x128xbf16>, vector<8x128xf32> -> vector<8x128xf32>
    %47 = arith.addf %40, %46 : vector<8x128xf32>
    %48 = vector.extract_strided_slice %1 {offsets = [0, 1], sizes = [8, 127], strides = [1, 1]} : vector<8x128xbf16> to vector<8x127xbf16>
    %49 = vector.extract_strided_slice %1 {offsets = [0, 0], sizes = [8, 1], strides = [1, 1]} : vector<8x128xbf16> to vector<8x1xbf16>
    %50 = tpu.concatenate %48, %49 in 1 : vector<8x127xbf16>, vector<8x1xbf16> -> vector<8x128xbf16>
    %51 = vector.extract_strided_slice %0 {offsets = [5, 0], sizes = [1, 128], strides = [1, 1]} : vector<9x128xbf16> to vector<1x128xbf16>
    %52 = vector.broadcast %51 : vector<1x128xbf16> to vector<8x128xbf16>
    %53 = arith.mulf %50, %52 : vector<8x128xbf16>
    %c5 = arith.constant 5 : index
    %c0_18 = arith.constant 0 : index
    %c0_19 = arith.constant 0 : index
    %54 = vector.load %arg4[%c5, %c0_18, %c0_19] : memref<9x8x8xbf16, #tpu.memory_space<vmem>>, vector<1x8x8xbf16>
    %55 = vector.shape_cast %54 : vector<1x8x8xbf16> to vector<8x8xbf16>
    %cst_20 = arith.constant dense<0.000000e+00> : vector<8x128xf32>
    %56 = tpu.matmul %55, %53, %cst_20 {dimension_numbers = #tpu.dot_dimension_numbers<[1], [0], [0], [1], [0, 0, 1, 1], [], []>} : vector<8x8xbf16>, vector<8x128xbf16>, vector<8x128xf32> -> vector<8x128xf32>
    %57 = arith.addf %47, %56 : vector<8x128xf32>
    %58 = vector.extract_strided_slice %1 {offsets = [0, 7], sizes = [8, 121], strides = [1, 1]} : vector<8x128xbf16> to vector<8x121xbf16>
    %59 = vector.extract_strided_slice %1 {offsets = [0, 0], sizes = [8, 7], strides = [1, 1]} : vector<8x128xbf16> to vector<8x7xbf16>
    %60 = tpu.concatenate %58, %59 in 1 : vector<8x121xbf16>, vector<8x7xbf16> -> vector<8x128xbf16>
    %61 = vector.extract_strided_slice %0 {offsets = [6, 0], sizes = [1, 128], strides = [1, 1]} : vector<9x128xbf16> to vector<1x128xbf16>
    %62 = vector.broadcast %61 : vector<1x128xbf16> to vector<8x128xbf16>
    %63 = arith.mulf %60, %62 : vector<8x128xbf16>
    %c6 = arith.constant 6 : index
    %c0_21 = arith.constant 0 : index
    %c0_22 = arith.constant 0 : index
    %64 = vector.load %arg4[%c6, %c0_21, %c0_22] : memref<9x8x8xbf16, #tpu.memory_space<vmem>>, vector<1x8x8xbf16>
    %65 = vector.shape_cast %64 : vector<1x8x8xbf16> to vector<8x8xbf16>
    %cst_23 = arith.constant dense<0.000000e+00> : vector<8x128xf32>
    %66 = tpu.matmul %65, %63, %cst_23 {dimension_numbers = #tpu.dot_dimension_numbers<[1], [0], [0], [1], [0, 0, 1, 1], [], []>} : vector<8x8xbf16>, vector<8x128xbf16>, vector<8x128xf32> -> vector<8x128xf32>
    %67 = arith.addf %57, %66 : vector<8x128xf32>
    %68 = vector.extract_strided_slice %1 {offsets = [0, 8], sizes = [8, 120], strides = [1, 1]} : vector<8x128xbf16> to vector<8x120xbf16>
    %69 = vector.extract_strided_slice %1 {offsets = [0, 0], sizes = [8, 8], strides = [1, 1]} : vector<8x128xbf16> to vector<8x8xbf16>
    %70 = tpu.concatenate %68, %69 in 1 : vector<8x120xbf16>, vector<8x8xbf16> -> vector<8x128xbf16>
    %71 = vector.extract_strided_slice %0 {offsets = [7, 0], sizes = [1, 128], strides = [1, 1]} : vector<9x128xbf16> to vector<1x128xbf16>
    %72 = vector.broadcast %71 : vector<1x128xbf16> to vector<8x128xbf16>
    %73 = arith.mulf %70, %72 : vector<8x128xbf16>
    %c7 = arith.constant 7 : index
    %c0_24 = arith.constant 0 : index
    %c0_25 = arith.constant 0 : index
    %74 = vector.load %arg4[%c7, %c0_24, %c0_25] : memref<9x8x8xbf16, #tpu.memory_space<vmem>>, vector<1x8x8xbf16>
    %75 = vector.shape_cast %74 : vector<1x8x8xbf16> to vector<8x8xbf16>
    %cst_26 = arith.constant dense<0.000000e+00> : vector<8x128xf32>
    %76 = tpu.matmul %75, %73, %cst_26 {dimension_numbers = #tpu.dot_dimension_numbers<[1], [0], [0], [1], [0, 0, 1, 1], [], []>} : vector<8x8xbf16>, vector<8x128xbf16>, vector<8x128xf32> -> vector<8x128xf32>
    %77 = arith.addf %67, %76 : vector<8x128xf32>
    %78 = vector.extract_strided_slice %1 {offsets = [0, 9], sizes = [8, 119], strides = [1, 1]} : vector<8x128xbf16> to vector<8x119xbf16>
    %79 = vector.extract_strided_slice %1 {offsets = [0, 0], sizes = [8, 9], strides = [1, 1]} : vector<8x128xbf16> to vector<8x9xbf16>
    %80 = tpu.concatenate %78, %79 in 1 : vector<8x119xbf16>, vector<8x9xbf16> -> vector<8x128xbf16>
    %81 = vector.extract_strided_slice %0 {offsets = [8, 0], sizes = [1, 128], strides = [1, 1]} : vector<9x128xbf16> to vector<1x128xbf16>
    %82 = vector.broadcast %81 : vector<1x128xbf16> to vector<8x128xbf16>
    %83 = arith.mulf %80, %82 : vector<8x128xbf16>
    %c8 = arith.constant 8 : index
    %c0_27 = arith.constant 0 : index
    %c0_28 = arith.constant 0 : index
    %84 = vector.load %arg4[%c8, %c0_27, %c0_28] : memref<9x8x8xbf16, #tpu.memory_space<vmem>>, vector<1x8x8xbf16>
    %85 = vector.shape_cast %84 : vector<1x8x8xbf16> to vector<8x8xbf16>
    %cst_29 = arith.constant dense<0.000000e+00> : vector<8x128xf32>
    %86 = tpu.matmul %85, %83, %cst_29 {dimension_numbers = #tpu.dot_dimension_numbers<[1], [0], [0], [1], [0, 0, 1, 1], [], []>} : vector<8x8xbf16>, vector<8x128xbf16>, vector<8x128xf32> -> vector<8x128xf32>
    %87 = arith.addf %77, %86 : vector<8x128xf32>
    %c0_30 = arith.constant 0 : index
    %c0_31 = arith.constant 0 : index
    %88 = vector.load %arg2[%c0_30, %c0_31] : memref<8x128xbf16, #tpu.memory_space<vmem>>, vector<8x128xbf16>
    %89 = vector.extract_strided_slice %88 {offsets = [0, 119], sizes = [8, 9], strides = [1, 1]} : vector<8x128xbf16> to vector<8x9xbf16>
    %90 = vector.extract_strided_slice %88 {offsets = [0, 0], sizes = [8, 119], strides = [1, 1]} : vector<8x128xbf16> to vector<8x119xbf16>
    %91 = tpu.concatenate %89, %90 in 1 : vector<8x9xbf16>, vector<8x119xbf16> -> vector<8x128xbf16>
    %92 = vector.extract_strided_slice %0 {offsets = [0, 0], sizes = [1, 128], strides = [1, 1]} : vector<9x128xbf16> to vector<1x128xbf16>
    %93 = vector.broadcast %92 : vector<1x128xbf16> to vector<8x128xbf16>
    %94 = arith.mulf %91, %93 : vector<8x128xbf16>
    %c0_32 = arith.constant 0 : index
    %c0_33 = arith.constant 0 : index
    %c0_34 = arith.constant 0 : index
    %95 = vector.load %arg5[%c0_32, %c0_33, %c0_34] : memref<9x8x8xbf16, #tpu.memory_space<vmem>>, vector<1x8x8xbf16>
    %96 = vector.shape_cast %95 : vector<1x8x8xbf16> to vector<8x8xbf16>
    %cst_35 = arith.constant dense<0.000000e+00> : vector<8x128xf32>
    %97 = tpu.matmul %96, %94, %cst_35 {dimension_numbers = #tpu.dot_dimension_numbers<[1], [0], [0], [1], [0, 0, 1, 1], [], []>} : vector<8x8xbf16>, vector<8x128xbf16>, vector<8x128xf32> -> vector<8x128xf32>
    %98 = vector.extract_strided_slice %88 {offsets = [0, 120], sizes = [8, 8], strides = [1, 1]} : vector<8x128xbf16> to vector<8x8xbf16>
    %99 = vector.extract_strided_slice %88 {offsets = [0, 0], sizes = [8, 120], strides = [1, 1]} : vector<8x128xbf16> to vector<8x120xbf16>
    %100 = tpu.concatenate %98, %99 in 1 : vector<8x8xbf16>, vector<8x120xbf16> -> vector<8x128xbf16>
    %101 = vector.extract_strided_slice %0 {offsets = [1, 0], sizes = [1, 128], strides = [1, 1]} : vector<9x128xbf16> to vector<1x128xbf16>
    %102 = vector.broadcast %101 : vector<1x128xbf16> to vector<8x128xbf16>
    %103 = arith.mulf %100, %102 : vector<8x128xbf16>
    %c1_36 = arith.constant 1 : index
    %c0_37 = arith.constant 0 : index
    %c0_38 = arith.constant 0 : index
    %104 = vector.load %arg5[%c1_36, %c0_37, %c0_38] : memref<9x8x8xbf16, #tpu.memory_space<vmem>>, vector<1x8x8xbf16>
    %105 = vector.shape_cast %104 : vector<1x8x8xbf16> to vector<8x8xbf16>
    %cst_39 = arith.constant dense<0.000000e+00> : vector<8x128xf32>
    %106 = tpu.matmul %105, %103, %cst_39 {dimension_numbers = #tpu.dot_dimension_numbers<[1], [0], [0], [1], [0, 0, 1, 1], [], []>} : vector<8x8xbf16>, vector<8x128xbf16>, vector<8x128xf32> -> vector<8x128xf32>
    %107 = arith.addf %97, %106 : vector<8x128xf32>
    %108 = vector.extract_strided_slice %88 {offsets = [0, 121], sizes = [8, 7], strides = [1, 1]} : vector<8x128xbf16> to vector<8x7xbf16>
    %109 = vector.extract_strided_slice %88 {offsets = [0, 0], sizes = [8, 121], strides = [1, 1]} : vector<8x128xbf16> to vector<8x121xbf16>
    %110 = tpu.concatenate %108, %109 in 1 : vector<8x7xbf16>, vector<8x121xbf16> -> vector<8x128xbf16>
    %111 = vector.extract_strided_slice %0 {offsets = [2, 0], sizes = [1, 128], strides = [1, 1]} : vector<9x128xbf16> to vector<1x128xbf16>
    %112 = vector.broadcast %111 : vector<1x128xbf16> to vector<8x128xbf16>
    %113 = arith.mulf %110, %112 : vector<8x128xbf16>
    %c2_40 = arith.constant 2 : index
    %c0_41 = arith.constant 0 : index
    %c0_42 = arith.constant 0 : index
    %114 = vector.load %arg5[%c2_40, %c0_41, %c0_42] : memref<9x8x8xbf16, #tpu.memory_space<vmem>>, vector<1x8x8xbf16>
    %115 = vector.shape_cast %114 : vector<1x8x8xbf16> to vector<8x8xbf16>
    %cst_43 = arith.constant dense<0.000000e+00> : vector<8x128xf32>
    %116 = tpu.matmul %115, %113, %cst_43 {dimension_numbers = #tpu.dot_dimension_numbers<[1], [0], [0], [1], [0, 0, 1, 1], [], []>} : vector<8x8xbf16>, vector<8x128xbf16>, vector<8x128xf32> -> vector<8x128xf32>
    %117 = arith.addf %107, %116 : vector<8x128xf32>
    %118 = vector.extract_strided_slice %88 {offsets = [0, 127], sizes = [8, 1], strides = [1, 1]} : vector<8x128xbf16> to vector<8x1xbf16>
    %119 = vector.extract_strided_slice %88 {offsets = [0, 0], sizes = [8, 127], strides = [1, 1]} : vector<8x128xbf16> to vector<8x127xbf16>
    %120 = tpu.concatenate %118, %119 in 1 : vector<8x1xbf16>, vector<8x127xbf16> -> vector<8x128xbf16>
    %121 = vector.extract_strided_slice %0 {offsets = [3, 0], sizes = [1, 128], strides = [1, 1]} : vector<9x128xbf16> to vector<1x128xbf16>
    %122 = vector.broadcast %121 : vector<1x128xbf16> to vector<8x128xbf16>
    %123 = arith.mulf %120, %122 : vector<8x128xbf16>
    %c3_44 = arith.constant 3 : index
    %c0_45 = arith.constant 0 : index
    %c0_46 = arith.constant 0 : index
    %124 = vector.load %arg5[%c3_44, %c0_45, %c0_46] : memref<9x8x8xbf16, #tpu.memory_space<vmem>>, vector<1x8x8xbf16>
    %125 = vector.shape_cast %124 : vector<1x8x8xbf16> to vector<8x8xbf16>
    %cst_47 = arith.constant dense<0.000000e+00> : vector<8x128xf32>
    %126 = tpu.matmul %125, %123, %cst_47 {dimension_numbers = #tpu.dot_dimension_numbers<[1], [0], [0], [1], [0, 0, 1, 1], [], []>} : vector<8x8xbf16>, vector<8x128xbf16>, vector<8x128xf32> -> vector<8x128xf32>
    %127 = arith.addf %117, %126 : vector<8x128xf32>
    %128 = vector.extract_strided_slice %0 {offsets = [4, 0], sizes = [1, 128], strides = [1, 1]} : vector<9x128xbf16> to vector<1x128xbf16>
    %129 = vector.broadcast %128 : vector<1x128xbf16> to vector<8x128xbf16>
    %130 = arith.mulf %88, %129 : vector<8x128xbf16>
    %c4_48 = arith.constant 4 : index
    %c0_49 = arith.constant 0 : index
    %c0_50 = arith.constant 0 : index
    %131 = vector.load %arg5[%c4_48, %c0_49, %c0_50] : memref<9x8x8xbf16, #tpu.memory_space<vmem>>, vector<1x8x8xbf16>
    %132 = vector.shape_cast %131 : vector<1x8x8xbf16> to vector<8x8xbf16>
    %cst_51 = arith.constant dense<0.000000e+00> : vector<8x128xf32>
    %133 = tpu.matmul %132, %130, %cst_51 {dimension_numbers = #tpu.dot_dimension_numbers<[1], [0], [0], [1], [0, 0, 1, 1], [], []>} : vector<8x8xbf16>, vector<8x128xbf16>, vector<8x128xf32> -> vector<8x128xf32>
    %134 = arith.addf %127, %133 : vector<8x128xf32>
    %135 = vector.extract_strided_slice %88 {offsets = [0, 1], sizes = [8, 127], strides = [1, 1]} : vector<8x128xbf16> to vector<8x127xbf16>
    %136 = vector.extract_strided_slice %88 {offsets = [0, 0], sizes = [8, 1], strides = [1, 1]} : vector<8x128xbf16> to vector<8x1xbf16>
    %137 = tpu.concatenate %135, %136 in 1 : vector<8x127xbf16>, vector<8x1xbf16> -> vector<8x128xbf16>
    %138 = vector.extract_strided_slice %0 {offsets = [5, 0], sizes = [1, 128], strides = [1, 1]} : vector<9x128xbf16> to vector<1x128xbf16>
    %139 = vector.broadcast %138 : vector<1x128xbf16> to vector<8x128xbf16>
    %140 = arith.mulf %137, %139 : vector<8x128xbf16>
    %c5_52 = arith.constant 5 : index
    %c0_53 = arith.constant 0 : index
    %c0_54 = arith.constant 0 : index
    %141 = vector.load %arg5[%c5_52, %c0_53, %c0_54] : memref<9x8x8xbf16, #tpu.memory_space<vmem>>, vector<1x8x8xbf16>
    %142 = vector.shape_cast %141 : vector<1x8x8xbf16> to vector<8x8xbf16>
    %cst_55 = arith.constant dense<0.000000e+00> : vector<8x128xf32>
    %143 = tpu.matmul %142, %140, %cst_55 {dimension_numbers = #tpu.dot_dimension_numbers<[1], [0], [0], [1], [0, 0, 1, 1], [], []>} : vector<8x8xbf16>, vector<8x128xbf16>, vector<8x128xf32> -> vector<8x128xf32>
    %144 = arith.addf %134, %143 : vector<8x128xf32>
    %145 = vector.extract_strided_slice %88 {offsets = [0, 7], sizes = [8, 121], strides = [1, 1]} : vector<8x128xbf16> to vector<8x121xbf16>
    %146 = vector.extract_strided_slice %88 {offsets = [0, 0], sizes = [8, 7], strides = [1, 1]} : vector<8x128xbf16> to vector<8x7xbf16>
    %147 = tpu.concatenate %145, %146 in 1 : vector<8x121xbf16>, vector<8x7xbf16> -> vector<8x128xbf16>
    %148 = vector.extract_strided_slice %0 {offsets = [6, 0], sizes = [1, 128], strides = [1, 1]} : vector<9x128xbf16> to vector<1x128xbf16>
    %149 = vector.broadcast %148 : vector<1x128xbf16> to vector<8x128xbf16>
    %150 = arith.mulf %147, %149 : vector<8x128xbf16>
    %c6_56 = arith.constant 6 : index
    %c0_57 = arith.constant 0 : index
    %c0_58 = arith.constant 0 : index
    %151 = vector.load %arg5[%c6_56, %c0_57, %c0_58] : memref<9x8x8xbf16, #tpu.memory_space<vmem>>, vector<1x8x8xbf16>
    %152 = vector.shape_cast %151 : vector<1x8x8xbf16> to vector<8x8xbf16>
    %cst_59 = arith.constant dense<0.000000e+00> : vector<8x128xf32>
    %153 = tpu.matmul %152, %150, %cst_59 {dimension_numbers = #tpu.dot_dimension_numbers<[1], [0], [0], [1], [0, 0, 1, 1], [], []>} : vector<8x8xbf16>, vector<8x128xbf16>, vector<8x128xf32> -> vector<8x128xf32>
    %154 = arith.addf %144, %153 : vector<8x128xf32>
    %155 = vector.extract_strided_slice %88 {offsets = [0, 8], sizes = [8, 120], strides = [1, 1]} : vector<8x128xbf16> to vector<8x120xbf16>
    %156 = vector.extract_strided_slice %88 {offsets = [0, 0], sizes = [8, 8], strides = [1, 1]} : vector<8x128xbf16> to vector<8x8xbf16>
    %157 = tpu.concatenate %155, %156 in 1 : vector<8x120xbf16>, vector<8x8xbf16> -> vector<8x128xbf16>
    %158 = vector.extract_strided_slice %0 {offsets = [7, 0], sizes = [1, 128], strides = [1, 1]} : vector<9x128xbf16> to vector<1x128xbf16>
    %159 = vector.broadcast %158 : vector<1x128xbf16> to vector<8x128xbf16>
    %160 = arith.mulf %157, %159 : vector<8x128xbf16>
    %c7_60 = arith.constant 7 : index
    %c0_61 = arith.constant 0 : index
    %c0_62 = arith.constant 0 : index
    %161 = vector.load %arg5[%c7_60, %c0_61, %c0_62] : memref<9x8x8xbf16, #tpu.memory_space<vmem>>, vector<1x8x8xbf16>
    %162 = vector.shape_cast %161 : vector<1x8x8xbf16> to vector<8x8xbf16>
    %cst_63 = arith.constant dense<0.000000e+00> : vector<8x128xf32>
    %163 = tpu.matmul %162, %160, %cst_63 {dimension_numbers = #tpu.dot_dimension_numbers<[1], [0], [0], [1], [0, 0, 1, 1], [], []>} : vector<8x8xbf16>, vector<8x128xbf16>, vector<8x128xf32> -> vector<8x128xf32>
    %164 = arith.addf %154, %163 : vector<8x128xf32>
    %165 = vector.extract_strided_slice %88 {offsets = [0, 9], sizes = [8, 119], strides = [1, 1]} : vector<8x128xbf16> to vector<8x119xbf16>
    %166 = vector.extract_strided_slice %88 {offsets = [0, 0], sizes = [8, 9], strides = [1, 1]} : vector<8x128xbf16> to vector<8x9xbf16>
    %167 = tpu.concatenate %165, %166 in 1 : vector<8x119xbf16>, vector<8x9xbf16> -> vector<8x128xbf16>
    %168 = vector.extract_strided_slice %0 {offsets = [8, 0], sizes = [1, 128], strides = [1, 1]} : vector<9x128xbf16> to vector<1x128xbf16>
    %169 = vector.broadcast %168 : vector<1x128xbf16> to vector<8x128xbf16>
    %170 = arith.mulf %167, %169 : vector<8x128xbf16>
    %c8_64 = arith.constant 8 : index
    %c0_65 = arith.constant 0 : index
    %c0_66 = arith.constant 0 : index
    %171 = vector.load %arg5[%c8_64, %c0_65, %c0_66] : memref<9x8x8xbf16, #tpu.memory_space<vmem>>, vector<1x8x8xbf16>
    %172 = vector.shape_cast %171 : vector<1x8x8xbf16> to vector<8x8xbf16>
    %cst_67 = arith.constant dense<0.000000e+00> : vector<8x128xf32>
    %173 = tpu.matmul %172, %170, %cst_67 {dimension_numbers = #tpu.dot_dimension_numbers<[1], [0], [0], [1], [0, 0, 1, 1], [], []>} : vector<8x8xbf16>, vector<8x128xbf16>, vector<8x128xf32> -> vector<8x128xf32>
    %174 = arith.addf %164, %173 : vector<8x128xf32>
    %175 = arith.addf %87, %174 : vector<8x128xf32>
    %c0_68 = arith.constant 0 : index
    %c0_69 = arith.constant 0 : index
    %176 = vector.load %arg6[%c0_68, %c0_69] : memref<8x1xf32, #tpu.memory_space<vmem>>, vector<8x1xf32>
    %177 = vector.broadcast %176 : vector<8x1xf32> to vector<8x128xf32>
    %178 = arith.addf %175, %177 : vector<8x128xf32>
    %cst_70 = arith.constant 0.000000e+00 : f32
    %179 = vector.broadcast %cst_70 : f32 to vector<8x128xf32>
    %180 = arith.maximumf %178, %179 : vector<8x128xf32>
    %181 = arith.truncf %180 : vector<8x128xf32> to vector<8x128xbf16>
    %182 = vector.extract_strided_slice %181 {offsets = [0, 119], sizes = [8, 9], strides = [1, 1]} : vector<8x128xbf16> to vector<8x9xbf16>
    %183 = vector.extract_strided_slice %181 {offsets = [0, 0], sizes = [8, 119], strides = [1, 1]} : vector<8x128xbf16> to vector<8x119xbf16>
    %184 = tpu.concatenate %182, %183 in 1 : vector<8x9xbf16>, vector<8x119xbf16> -> vector<8x128xbf16>
    %185 = vector.extract_strided_slice %0 {offsets = [0, 0], sizes = [1, 128], strides = [1, 1]} : vector<9x128xbf16> to vector<1x128xbf16>
    %186 = vector.broadcast %185 : vector<1x128xbf16> to vector<8x128xbf16>
    %187 = arith.mulf %184, %186 : vector<8x128xbf16>
    %c0_71 = arith.constant 0 : index
    %c0_72 = arith.constant 0 : index
    %c0_73 = arith.constant 0 : index
    %188 = vector.load %arg7[%c0_71, %c0_72, %c0_73] : memref<9x8x8xbf16, #tpu.memory_space<vmem>>, vector<1x8x8xbf16>
    %189 = vector.shape_cast %188 : vector<1x8x8xbf16> to vector<8x8xbf16>
    %cst_74 = arith.constant dense<0.000000e+00> : vector<8x128xf32>
    %190 = tpu.matmul %189, %187, %cst_74 {dimension_numbers = #tpu.dot_dimension_numbers<[1], [0], [0], [1], [0, 0, 1, 1], [], []>} : vector<8x8xbf16>, vector<8x128xbf16>, vector<8x128xf32> -> vector<8x128xf32>
    %191 = vector.extract_strided_slice %181 {offsets = [0, 120], sizes = [8, 8], strides = [1, 1]} : vector<8x128xbf16> to vector<8x8xbf16>
    %192 = vector.extract_strided_slice %181 {offsets = [0, 0], sizes = [8, 120], strides = [1, 1]} : vector<8x128xbf16> to vector<8x120xbf16>
    %193 = tpu.concatenate %191, %192 in 1 : vector<8x8xbf16>, vector<8x120xbf16> -> vector<8x128xbf16>
    %194 = vector.extract_strided_slice %0 {offsets = [1, 0], sizes = [1, 128], strides = [1, 1]} : vector<9x128xbf16> to vector<1x128xbf16>
    %195 = vector.broadcast %194 : vector<1x128xbf16> to vector<8x128xbf16>
    %196 = arith.mulf %193, %195 : vector<8x128xbf16>
    %c1_75 = arith.constant 1 : index
    %c0_76 = arith.constant 0 : index
    %c0_77 = arith.constant 0 : index
    %197 = vector.load %arg7[%c1_75, %c0_76, %c0_77] : memref<9x8x8xbf16, #tpu.memory_space<vmem>>, vector<1x8x8xbf16>
    %198 = vector.shape_cast %197 : vector<1x8x8xbf16> to vector<8x8xbf16>
    %cst_78 = arith.constant dense<0.000000e+00> : vector<8x128xf32>
    %199 = tpu.matmul %198, %196, %cst_78 {dimension_numbers = #tpu.dot_dimension_numbers<[1], [0], [0], [1], [0, 0, 1, 1], [], []>} : vector<8x8xbf16>, vector<8x128xbf16>, vector<8x128xf32> -> vector<8x128xf32>
    %200 = arith.addf %190, %199 : vector<8x128xf32>
    %201 = vector.extract_strided_slice %181 {offsets = [0, 121], sizes = [8, 7], strides = [1, 1]} : vector<8x128xbf16> to vector<8x7xbf16>
    %202 = vector.extract_strided_slice %181 {offsets = [0, 0], sizes = [8, 121], strides = [1, 1]} : vector<8x128xbf16> to vector<8x121xbf16>
    %203 = tpu.concatenate %201, %202 in 1 : vector<8x7xbf16>, vector<8x121xbf16> -> vector<8x128xbf16>
    %204 = vector.extract_strided_slice %0 {offsets = [2, 0], sizes = [1, 128], strides = [1, 1]} : vector<9x128xbf16> to vector<1x128xbf16>
    %205 = vector.broadcast %204 : vector<1x128xbf16> to vector<8x128xbf16>
    %206 = arith.mulf %203, %205 : vector<8x128xbf16>
    %c2_79 = arith.constant 2 : index
    %c0_80 = arith.constant 0 : index
    %c0_81 = arith.constant 0 : index
    %207 = vector.load %arg7[%c2_79, %c0_80, %c0_81] : memref<9x8x8xbf16, #tpu.memory_space<vmem>>, vector<1x8x8xbf16>
    %208 = vector.shape_cast %207 : vector<1x8x8xbf16> to vector<8x8xbf16>
    %cst_82 = arith.constant dense<0.000000e+00> : vector<8x128xf32>
    %209 = tpu.matmul %208, %206, %cst_82 {dimension_numbers = #tpu.dot_dimension_numbers<[1], [0], [0], [1], [0, 0, 1, 1], [], []>} : vector<8x8xbf16>, vector<8x128xbf16>, vector<8x128xf32> -> vector<8x128xf32>
    %210 = arith.addf %200, %209 : vector<8x128xf32>
    %211 = vector.extract_strided_slice %181 {offsets = [0, 127], sizes = [8, 1], strides = [1, 1]} : vector<8x128xbf16> to vector<8x1xbf16>
    %212 = vector.extract_strided_slice %181 {offsets = [0, 0], sizes = [8, 127], strides = [1, 1]} : vector<8x128xbf16> to vector<8x127xbf16>
    %213 = tpu.concatenate %211, %212 in 1 : vector<8x1xbf16>, vector<8x127xbf16> -> vector<8x128xbf16>
    %214 = vector.extract_strided_slice %0 {offsets = [3, 0], sizes = [1, 128], strides = [1, 1]} : vector<9x128xbf16> to vector<1x128xbf16>
    %215 = vector.broadcast %214 : vector<1x128xbf16> to vector<8x128xbf16>
    %216 = arith.mulf %213, %215 : vector<8x128xbf16>
    %c3_83 = arith.constant 3 : index
    %c0_84 = arith.constant 0 : index
    %c0_85 = arith.constant 0 : index
    %217 = vector.load %arg7[%c3_83, %c0_84, %c0_85] : memref<9x8x8xbf16, #tpu.memory_space<vmem>>, vector<1x8x8xbf16>
    %218 = vector.shape_cast %217 : vector<1x8x8xbf16> to vector<8x8xbf16>
    %cst_86 = arith.constant dense<0.000000e+00> : vector<8x128xf32>
    %219 = tpu.matmul %218, %216, %cst_86 {dimension_numbers = #tpu.dot_dimension_numbers<[1], [0], [0], [1], [0, 0, 1, 1], [], []>} : vector<8x8xbf16>, vector<8x128xbf16>, vector<8x128xf32> -> vector<8x128xf32>
    %220 = arith.addf %210, %219 : vector<8x128xf32>
    %221 = vector.extract_strided_slice %0 {offsets = [4, 0], sizes = [1, 128], strides = [1, 1]} : vector<9x128xbf16> to vector<1x128xbf16>
    %222 = vector.broadcast %221 : vector<1x128xbf16> to vector<8x128xbf16>
    %223 = arith.mulf %181, %222 : vector<8x128xbf16>
    %c4_87 = arith.constant 4 : index
    %c0_88 = arith.constant 0 : index
    %c0_89 = arith.constant 0 : index
    %224 = vector.load %arg7[%c4_87, %c0_88, %c0_89] : memref<9x8x8xbf16, #tpu.memory_space<vmem>>, vector<1x8x8xbf16>
    %225 = vector.shape_cast %224 : vector<1x8x8xbf16> to vector<8x8xbf16>
    %cst_90 = arith.constant dense<0.000000e+00> : vector<8x128xf32>
    %226 = tpu.matmul %225, %223, %cst_90 {dimension_numbers = #tpu.dot_dimension_numbers<[1], [0], [0], [1], [0, 0, 1, 1], [], []>} : vector<8x8xbf16>, vector<8x128xbf16>, vector<8x128xf32> -> vector<8x128xf32>
    %227 = arith.addf %220, %226 : vector<8x128xf32>
    %228 = vector.extract_strided_slice %181 {offsets = [0, 1], sizes = [8, 127], strides = [1, 1]} : vector<8x128xbf16> to vector<8x127xbf16>
    %229 = vector.extract_strided_slice %181 {offsets = [0, 0], sizes = [8, 1], strides = [1, 1]} : vector<8x128xbf16> to vector<8x1xbf16>
    %230 = tpu.concatenate %228, %229 in 1 : vector<8x127xbf16>, vector<8x1xbf16> -> vector<8x128xbf16>
    %231 = vector.extract_strided_slice %0 {offsets = [5, 0], sizes = [1, 128], strides = [1, 1]} : vector<9x128xbf16> to vector<1x128xbf16>
    %232 = vector.broadcast %231 : vector<1x128xbf16> to vector<8x128xbf16>
    %233 = arith.mulf %230, %232 : vector<8x128xbf16>
    %c5_91 = arith.constant 5 : index
    %c0_92 = arith.constant 0 : index
    %c0_93 = arith.constant 0 : index
    %234 = vector.load %arg7[%c5_91, %c0_92, %c0_93] : memref<9x8x8xbf16, #tpu.memory_space<vmem>>, vector<1x8x8xbf16>
    %235 = vector.shape_cast %234 : vector<1x8x8xbf16> to vector<8x8xbf16>
    %cst_94 = arith.constant dense<0.000000e+00> : vector<8x128xf32>
    %236 = tpu.matmul %235, %233, %cst_94 {dimension_numbers = #tpu.dot_dimension_numbers<[1], [0], [0], [1], [0, 0, 1, 1], [], []>} : vector<8x8xbf16>, vector<8x128xbf16>, vector<8x128xf32> -> vector<8x128xf32>
    %237 = arith.addf %227, %236 : vector<8x128xf32>
    %238 = vector.extract_strided_slice %181 {offsets = [0, 7], sizes = [8, 121], strides = [1, 1]} : vector<8x128xbf16> to vector<8x121xbf16>
    %239 = vector.extract_strided_slice %181 {offsets = [0, 0], sizes = [8, 7], strides = [1, 1]} : vector<8x128xbf16> to vector<8x7xbf16>
    %240 = tpu.concatenate %238, %239 in 1 : vector<8x121xbf16>, vector<8x7xbf16> -> vector<8x128xbf16>
    %241 = vector.extract_strided_slice %0 {offsets = [6, 0], sizes = [1, 128], strides = [1, 1]} : vector<9x128xbf16> to vector<1x128xbf16>
    %242 = vector.broadcast %241 : vector<1x128xbf16> to vector<8x128xbf16>
    %243 = arith.mulf %240, %242 : vector<8x128xbf16>
    %c6_95 = arith.constant 6 : index
    %c0_96 = arith.constant 0 : index
    %c0_97 = arith.constant 0 : index
    %244 = vector.load %arg7[%c6_95, %c0_96, %c0_97] : memref<9x8x8xbf16, #tpu.memory_space<vmem>>, vector<1x8x8xbf16>
    %245 = vector.shape_cast %244 : vector<1x8x8xbf16> to vector<8x8xbf16>
    %cst_98 = arith.constant dense<0.000000e+00> : vector<8x128xf32>
    %246 = tpu.matmul %245, %243, %cst_98 {dimension_numbers = #tpu.dot_dimension_numbers<[1], [0], [0], [1], [0, 0, 1, 1], [], []>} : vector<8x8xbf16>, vector<8x128xbf16>, vector<8x128xf32> -> vector<8x128xf32>
    %247 = arith.addf %237, %246 : vector<8x128xf32>
    %248 = vector.extract_strided_slice %181 {offsets = [0, 8], sizes = [8, 120], strides = [1, 1]} : vector<8x128xbf16> to vector<8x120xbf16>
    %249 = vector.extract_strided_slice %181 {offsets = [0, 0], sizes = [8, 8], strides = [1, 1]} : vector<8x128xbf16> to vector<8x8xbf16>
    %250 = tpu.concatenate %248, %249 in 1 : vector<8x120xbf16>, vector<8x8xbf16> -> vector<8x128xbf16>
    %251 = vector.extract_strided_slice %0 {offsets = [7, 0], sizes = [1, 128], strides = [1, 1]} : vector<9x128xbf16> to vector<1x128xbf16>
    %252 = vector.broadcast %251 : vector<1x128xbf16> to vector<8x128xbf16>
    %253 = arith.mulf %250, %252 : vector<8x128xbf16>
    %c7_99 = arith.constant 7 : index
    %c0_100 = arith.constant 0 : index
    %c0_101 = arith.constant 0 : index
    %254 = vector.load %arg7[%c7_99, %c0_100, %c0_101] : memref<9x8x8xbf16, #tpu.memory_space<vmem>>, vector<1x8x8xbf16>
    %255 = vector.shape_cast %254 : vector<1x8x8xbf16> to vector<8x8xbf16>
    %cst_102 = arith.constant dense<0.000000e+00> : vector<8x128xf32>
    %256 = tpu.matmul %255, %253, %cst_102 {dimension_numbers = #tpu.dot_dimension_numbers<[1], [0], [0], [1], [0, 0, 1, 1], [], []>} : vector<8x8xbf16>, vector<8x128xbf16>, vector<8x128xf32> -> vector<8x128xf32>
    %257 = arith.addf %247, %256 : vector<8x128xf32>
    %258 = vector.extract_strided_slice %181 {offsets = [0, 9], sizes = [8, 119], strides = [1, 1]} : vector<8x128xbf16> to vector<8x119xbf16>
    %259 = vector.extract_strided_slice %181 {offsets = [0, 0], sizes = [8, 9], strides = [1, 1]} : vector<8x128xbf16> to vector<8x9xbf16>
    %260 = tpu.concatenate %258, %259 in 1 : vector<8x119xbf16>, vector<8x9xbf16> -> vector<8x128xbf16>
    %261 = vector.extract_strided_slice %0 {offsets = [8, 0], sizes = [1, 128], strides = [1, 1]} : vector<9x128xbf16> to vector<1x128xbf16>
    %262 = vector.broadcast %261 : vector<1x128xbf16> to vector<8x128xbf16>
    %263 = arith.mulf %260, %262 : vector<8x128xbf16>
    %c8_103 = arith.constant 8 : index
    %c0_104 = arith.constant 0 : index
    %c0_105 = arith.constant 0 : index
    %264 = vector.load %arg7[%c8_103, %c0_104, %c0_105] : memref<9x8x8xbf16, #tpu.memory_space<vmem>>, vector<1x8x8xbf16>
    %265 = vector.shape_cast %264 : vector<1x8x8xbf16> to vector<8x8xbf16>
    %cst_106 = arith.constant dense<0.000000e+00> : vector<8x128xf32>
    %266 = tpu.matmul %265, %263, %cst_106 {dimension_numbers = #tpu.dot_dimension_numbers<[1], [0], [0], [1], [0, 0, 1, 1], [], []>} : vector<8x8xbf16>, vector<8x128xbf16>, vector<8x128xf32> -> vector<8x128xf32>
    %267 = arith.addf %257, %266 : vector<8x128xf32>
    %c0_107 = arith.constant 0 : index
    %c0_108 = arith.constant 0 : index
    %268 = vector.load %arg8[%c0_107, %c0_108] : memref<8x1xf32, #tpu.memory_space<vmem>>, vector<8x1xf32>
    %269 = vector.broadcast %268 : vector<8x1xf32> to vector<8x128xf32>
    %270 = arith.addf %267, %269 : vector<8x128xf32>
    %cst_109 = arith.constant 0.000000e+00 : f32
    %271 = vector.broadcast %cst_109 : f32 to vector<8x128xf32>
    %272 = arith.maximumf %270, %271 : vector<8x128xf32>
    %273 = arith.truncf %272 : vector<8x128xf32> to vector<8x128xbf16>
    %c0_110 = arith.constant 0 : index
    %c0_111 = arith.constant 0 : index
    %274 = vector.load %arg9[%c0_110, %c0_111] : memref<8x128xbf16, #tpu.memory_space<vmem>>, vector<8x128xbf16>
    tpu.vector_store %arg9[%c0_110, %c0_111], %273 {strides = array<i32>} : memref<8x128xbf16, #tpu.memory_space<vmem>>, vector<8x128xbf16>,
    return
  }
  func.func @transform_0(%arg0: i32) -> (i32, i32) {
    %c0_i32 = arith.constant 0 : i32
    %c0_i32_0 = arith.constant 0 : i32
    return %c0_i32, %arg0 : i32, i32
  }
  func.func @transform_1(%arg0: i32) -> (i32, i32) {
    %c0_i32 = arith.constant 0 : i32
    %c0_i32_0 = arith.constant 0 : i32
    return %c0_i32, %arg0 : i32, i32
  }
  func.func @transform_2(%arg0: i32) -> (i32, i32) {
    %c0_i32 = arith.constant 0 : i32
    %c0_i32_0 = arith.constant 0 : i32
    return %c0_i32, %arg0 : i32, i32
  }
  func.func @transform_3(%arg0: i32) -> (i32, i32, i32) {
    %c0_i32 = arith.constant 0 : i32
    %c0_i32_0 = arith.constant 0 : i32
    %c0_i32_1 = arith.constant 0 : i32
    %c0_i32_2 = arith.constant 0 : i32
    return %c0_i32, %c0_i32_0, %c0_i32_1 : i32, i32, i32
  }
  func.func @transform_4(%arg0: i32) -> (i32, i32, i32) {
    %c0_i32 = arith.constant 0 : i32
    %c0_i32_0 = arith.constant 0 : i32
    %c0_i32_1 = arith.constant 0 : i32
    %c0_i32_2 = arith.constant 0 : i32
    return %c0_i32, %c0_i32_0, %c0_i32_1 : i32, i32, i32
  }
  func.func @transform_5(%arg0: i32) -> (i32, i32) {
    %c0_i32 = arith.constant 0 : i32
    %c0_i32_0 = arith.constant 0 : i32
    %c0_i32_1 = arith.constant 0 : i32
    return %c0_i32, %c0_i32_0 : i32, i32
  }
  func.func @transform_6(%arg0: i32) -> (i32, i32, i32) {
    %c0_i32 = arith.constant 0 : i32
    %c0_i32_0 = arith.constant 0 : i32
    %c0_i32_1 = arith.constant 0 : i32
    %c0_i32_2 = arith.constant 0 : i32
    return %c0_i32, %c0_i32_0, %c0_i32_1 : i32, i32, i32
  }
  func.func @transform_7(%arg0: i32) -> (i32, i32) {
    %c0_i32 = arith.constant 0 : i32
    %c0_i32_0 = arith.constant 0 : i32
    %c0_i32_1 = arith.constant 0 : i32
    return %c0_i32, %c0_i32_0 : i32, i32
  }
  func.func @transform_8(%arg0: i32) -> (i32, i32) {
    %c0_i32 = arith.constant 0 : i32
    %c0_i32_0 = arith.constant 0 : i32
    return %c0_i32, %arg0 : i32, i32
  }
}

module attributes {stable_mosaic.version = 11 : i64} {
  func.func @_gemm_kernel(%arg0: i32, %arg1: i32, %arg2: memref<8x8xbf16, #tpu.memory_space<vmem>>, %arg3: memref<8x128xbf16, #tpu.memory_space<vmem>>, %arg4: memref<8x1xf32, #tpu.memory_space<vmem>>, %arg5: memref<8x128xbf16, #tpu.memory_space<vmem>>, %arg6: memref<8x128xf32, #tpu.memory_space<vmem>>) attributes {dimension_semantics = [#tpu.dimension_semantics<parallel>, #tpu.dimension_semantics<arbitrary>], iteration_bounds = array<i64: 1, 1>, scalar_prefetch = 0 : i64, scratch_operands = 1 : i64, tpu.core_type = #tpu.core_type<tc>, window_params = [{transform_indices = @transform_0, window_bounds = array<i64: 8, 8>}, {transform_indices = @transform_1, window_bounds = array<i64: 8, 128>}, {pipeline_mode = #tpu.pipeline_mode<synchronous>, transform_indices = @transform_2, window_bounds = array<i64: 8, 1>}, {transform_indices = @transform_3, window_bounds = array<i64: 8, 128>}]} {
    %c0_i32 = arith.constant 0 : i32
    %0 = arith.cmpi eq, %arg1, %c0_i32 : i32
    %1 = arith.extui %0 : i1 to i32
    %c0_i32_0 = arith.constant 0 : i32
    %2 = arith.cmpi ne, %1, %c0_i32_0 : i32
    scf.if %2 {
      %cst_10 = arith.constant 0.000000e+00 : f32
      %12 = vector.broadcast %cst_10 : f32 to vector<8x128xf32>
      %c0_11 = arith.constant 0 : index
      %c0_12 = arith.constant 0 : index
      %13 = vector.load %arg6[%c0_11, %c0_12] : memref<8x128xf32, #tpu.memory_space<vmem>>, vector<8x128xf32>
      tpu.vector_store %arg6[%c0_11, %c0_12], %12 {strides = array<i32>} : memref<8x128xf32, #tpu.memory_space<vmem>>, vector<8x128xf32>,
    } else {
    }
    %c0 = arith.constant 0 : index
    %c0_1 = arith.constant 0 : index
    %3 = vector.load %arg6[%c0, %c0_1] : memref<8x128xf32, #tpu.memory_space<vmem>>, vector<8x128xf32>
    %c0_2 = arith.constant 0 : index
    %c0_3 = arith.constant 0 : index
    %4 = vector.load %arg2[%c0_2, %c0_3] : memref<8x8xbf16, #tpu.memory_space<vmem>>, vector<8x8xbf16>
    %c0_4 = arith.constant 0 : index
    %c0_5 = arith.constant 0 : index
    %5 = vector.load %arg3[%c0_4, %c0_5] : memref<8x128xbf16, #tpu.memory_space<vmem>>, vector<8x128xbf16>
    %cst = arith.constant dense<0.000000e+00> : vector<8x128xf32>
    %6 = tpu.matmul %4, %5, %cst {dimension_numbers = #tpu.dot_dimension_numbers<[1], [0], [0], [1], [0, 0, 1, 1], [], []>} : vector<8x8xbf16>, vector<8x128xbf16>, vector<8x128xf32> -> vector<8x128xf32>
    %7 = arith.addf %3, %6 : vector<8x128xf32>
    %c0_6 = arith.constant 0 : index
    %c0_7 = arith.constant 0 : index
    %8 = vector.load %arg6[%c0_6, %c0_7] : memref<8x128xf32, #tpu.memory_space<vmem>>, vector<8x128xf32>
    tpu.vector_store %arg6[%c0_6, %c0_7], %7 {strides = array<i32>} : memref<8x128xf32, #tpu.memory_space<vmem>>, vector<8x128xf32>,
    %c0_i32_8 = arith.constant 0 : i32
    %9 = arith.cmpi eq, %arg1, %c0_i32_8 : i32
    %10 = arith.extui %9 : i1 to i32
    %c0_i32_9 = arith.constant 0 : i32
    %11 = arith.cmpi ne, %10, %c0_i32_9 : i32
    scf.if %11 {
      %c0_10 = arith.constant 0 : index
      %c0_11 = arith.constant 0 : index
      %12 = vector.load %arg6[%c0_10, %c0_11] : memref<8x128xf32, #tpu.memory_space<vmem>>, vector<8x128xf32>
      %c0_12 = arith.constant 0 : index
      %c0_13 = arith.constant 0 : index
      %13 = vector.load %arg4[%c0_12, %c0_13] : memref<8x1xf32, #tpu.memory_space<vmem>>, vector<8x1xf32>
      %14 = vector.broadcast %13 : vector<8x1xf32> to vector<8x128xf32>
      %15 = arith.addf %12, %14 : vector<8x128xf32>
      %16 = arith.truncf %15 : vector<8x128xf32> to vector<8x128xbf16>
      %c0_14 = arith.constant 0 : index
      %c0_15 = arith.constant 0 : index
      %17 = vector.load %arg5[%c0_14, %c0_15] : memref<8x128xbf16, #tpu.memory_space<vmem>>, vector<8x128xbf16>
      tpu.vector_store %arg5[%c0_14, %c0_15], %16 {strides = array<i32>} : memref<8x128xbf16, #tpu.memory_space<vmem>>, vector<8x128xbf16>,
    } else {
    }
    return
  }
  func.func @transform_0(%arg0: i32, %arg1: i32) -> (i32, i32) {
    %c0_i32 = arith.constant 0 : i32
    %c0_i32_0 = arith.constant 0 : i32
    return %c0_i32, %arg1 : i32, i32
  }
  func.func @transform_1(%arg0: i32, %arg1: i32) -> (i32, i32) {
    %c0_i32 = arith.constant 0 : i32
    return %arg1, %arg0 : i32, i32
  }
  func.func @transform_2(%arg0: i32, %arg1: i32) -> (i32, i32) {
    %c0_i32 = arith.constant 0 : i32
    %c0_i32_0 = arith.constant 0 : i32
    %c0_i32_1 = arith.constant 0 : i32
    return %c0_i32, %c0_i32_0 : i32, i32
  }
  func.func @transform_3(%arg0: i32, %arg1: i32) -> (i32, i32) {
    %c0_i32 = arith.constant 0 : i32
    %c0_i32_0 = arith.constant 0 : i32
    return %c0_i32, %arg0 : i32, i32
  }
}

module attributes {stable_mosaic.version = 11 : i64} {
  func.func @_stage_kernel(%arg0: i32, %arg1: memref<8x512xbf16, #tpu.memory_space<vmem>>, %arg2: memref<8x512xbf16, #tpu.memory_space<vmem>>, %arg3: memref<9x512xbf16, #tpu.memory_space<vmem>>, %arg4: memref<9x8x8xbf16, #tpu.memory_space<vmem>>, %arg5: memref<9x8x8xbf16, #tpu.memory_space<vmem>>, %arg6: memref<8x1xf32, #tpu.memory_space<vmem>>, %arg7: memref<9x8x8xbf16, #tpu.memory_space<vmem>>, %arg8: memref<8x1xf32, #tpu.memory_space<vmem>>, %arg9: memref<8x512xbf16, #tpu.memory_space<vmem>>) attributes {dimension_semantics = [#tpu.dimension_semantics<parallel>], iteration_bounds = array<i64: 1>, scalar_prefetch = 0 : i64, scratch_operands = 0 : i64, tpu.core_type = #tpu.core_type<tc>, window_params = [{transform_indices = @transform_0, window_bounds = array<i64: 8, 512>}, {transform_indices = @transform_1, window_bounds = array<i64: 8, 512>}, {transform_indices = @transform_2, window_bounds = array<i64: 9, 512>}, {pipeline_mode = #tpu.pipeline_mode<synchronous>, transform_indices = @transform_3, window_bounds = array<i64: 9, 8, 8>}, {pipeline_mode = #tpu.pipeline_mode<synchronous>, transform_indices = @transform_4, window_bounds = array<i64: 9, 8, 8>}, {pipeline_mode = #tpu.pipeline_mode<synchronous>, transform_indices = @transform_5, window_bounds = array<i64: 8, 1>}, {pipeline_mode = #tpu.pipeline_mode<synchronous>, transform_indices = @transform_6, window_bounds = array<i64: 9, 8, 8>}, {pipeline_mode = #tpu.pipeline_mode<synchronous>, transform_indices = @transform_7, window_bounds = array<i64: 8, 1>}, {transform_indices = @transform_8, window_bounds = array<i64: 8, 512>}]} {
    %c0 = arith.constant 0 : index
    %c0_0 = arith.constant 0 : index
    %0 = vector.load %arg3[%c0, %c0_0] : memref<9x512xbf16, #tpu.memory_space<vmem>>, vector<9x512xbf16>
    %c0_1 = arith.constant 0 : index
    %c0_2 = arith.constant 0 : index
    %1 = vector.load %arg1[%c0_1, %c0_2] : memref<8x512xbf16, #tpu.memory_space<vmem>>, vector<8x512xbf16>
    %2 = vector.extract_strided_slice %1 {offsets = [0, 495], sizes = [8, 17], strides = [1, 1]} : vector<8x512xbf16> to vector<8x17xbf16>
    %3 = vector.extract_strided_slice %1 {offsets = [0, 0], sizes = [8, 495], strides = [1, 1]} : vector<8x512xbf16> to vector<8x495xbf16>
    %4 = tpu.concatenate %2, %3 in 1 : vector<8x17xbf16>, vector<8x495xbf16> -> vector<8x512xbf16>
    %5 = vector.extract_strided_slice %0 {offsets = [0, 0], sizes = [1, 512], strides = [1, 1]} : vector<9x512xbf16> to vector<1x512xbf16>
    %6 = vector.broadcast %5 : vector<1x512xbf16> to vector<8x512xbf16>
    %7 = arith.mulf %4, %6 : vector<8x512xbf16>
    %c0_3 = arith.constant 0 : index
    %c0_4 = arith.constant 0 : index
    %c0_5 = arith.constant 0 : index
    %8 = vector.load %arg4[%c0_3, %c0_4, %c0_5] : memref<9x8x8xbf16, #tpu.memory_space<vmem>>, vector<1x8x8xbf16>
    %9 = vector.shape_cast %8 : vector<1x8x8xbf16> to vector<8x8xbf16>
    %cst = arith.constant dense<0.000000e+00> : vector<8x512xf32>
    %10 = tpu.matmul %9, %7, %cst {dimension_numbers = #tpu.dot_dimension_numbers<[1], [0], [0], [1], [0, 0, 1, 1], [], []>} : vector<8x8xbf16>, vector<8x512xbf16>, vector<8x512xf32> -> vector<8x512xf32>
    %11 = vector.extract_strided_slice %1 {offsets = [0, 496], sizes = [8, 16], strides = [1, 1]} : vector<8x512xbf16> to vector<8x16xbf16>
    %12 = vector.extract_strided_slice %1 {offsets = [0, 0], sizes = [8, 496], strides = [1, 1]} : vector<8x512xbf16> to vector<8x496xbf16>
    %13 = tpu.concatenate %11, %12 in 1 : vector<8x16xbf16>, vector<8x496xbf16> -> vector<8x512xbf16>
    %14 = vector.extract_strided_slice %0 {offsets = [1, 0], sizes = [1, 512], strides = [1, 1]} : vector<9x512xbf16> to vector<1x512xbf16>
    %15 = vector.broadcast %14 : vector<1x512xbf16> to vector<8x512xbf16>
    %16 = arith.mulf %13, %15 : vector<8x512xbf16>
    %c1 = arith.constant 1 : index
    %c0_6 = arith.constant 0 : index
    %c0_7 = arith.constant 0 : index
    %17 = vector.load %arg4[%c1, %c0_6, %c0_7] : memref<9x8x8xbf16, #tpu.memory_space<vmem>>, vector<1x8x8xbf16>
    %18 = vector.shape_cast %17 : vector<1x8x8xbf16> to vector<8x8xbf16>
    %cst_8 = arith.constant dense<0.000000e+00> : vector<8x512xf32>
    %19 = tpu.matmul %18, %16, %cst_8 {dimension_numbers = #tpu.dot_dimension_numbers<[1], [0], [0], [1], [0, 0, 1, 1], [], []>} : vector<8x8xbf16>, vector<8x512xbf16>, vector<8x512xf32> -> vector<8x512xf32>
    %20 = arith.addf %10, %19 : vector<8x512xf32>
    %21 = vector.extract_strided_slice %1 {offsets = [0, 497], sizes = [8, 15], strides = [1, 1]} : vector<8x512xbf16> to vector<8x15xbf16>
    %22 = vector.extract_strided_slice %1 {offsets = [0, 0], sizes = [8, 497], strides = [1, 1]} : vector<8x512xbf16> to vector<8x497xbf16>
    %23 = tpu.concatenate %21, %22 in 1 : vector<8x15xbf16>, vector<8x497xbf16> -> vector<8x512xbf16>
    %24 = vector.extract_strided_slice %0 {offsets = [2, 0], sizes = [1, 512], strides = [1, 1]} : vector<9x512xbf16> to vector<1x512xbf16>
    %25 = vector.broadcast %24 : vector<1x512xbf16> to vector<8x512xbf16>
    %26 = arith.mulf %23, %25 : vector<8x512xbf16>
    %c2 = arith.constant 2 : index
    %c0_9 = arith.constant 0 : index
    %c0_10 = arith.constant 0 : index
    %27 = vector.load %arg4[%c2, %c0_9, %c0_10] : memref<9x8x8xbf16, #tpu.memory_space<vmem>>, vector<1x8x8xbf16>
    %28 = vector.shape_cast %27 : vector<1x8x8xbf16> to vector<8x8xbf16>
    %cst_11 = arith.constant dense<0.000000e+00> : vector<8x512xf32>
    %29 = tpu.matmul %28, %26, %cst_11 {dimension_numbers = #tpu.dot_dimension_numbers<[1], [0], [0], [1], [0, 0, 1, 1], [], []>} : vector<8x8xbf16>, vector<8x512xbf16>, vector<8x512xf32> -> vector<8x512xf32>
    %30 = arith.addf %20, %29 : vector<8x512xf32>
    %31 = vector.extract_strided_slice %1 {offsets = [0, 511], sizes = [8, 1], strides = [1, 1]} : vector<8x512xbf16> to vector<8x1xbf16>
    %32 = vector.extract_strided_slice %1 {offsets = [0, 0], sizes = [8, 511], strides = [1, 1]} : vector<8x512xbf16> to vector<8x511xbf16>
    %33 = tpu.concatenate %31, %32 in 1 : vector<8x1xbf16>, vector<8x511xbf16> -> vector<8x512xbf16>
    %34 = vector.extract_strided_slice %0 {offsets = [3, 0], sizes = [1, 512], strides = [1, 1]} : vector<9x512xbf16> to vector<1x512xbf16>
    %35 = vector.broadcast %34 : vector<1x512xbf16> to vector<8x512xbf16>
    %36 = arith.mulf %33, %35 : vector<8x512xbf16>
    %c3 = arith.constant 3 : index
    %c0_12 = arith.constant 0 : index
    %c0_13 = arith.constant 0 : index
    %37 = vector.load %arg4[%c3, %c0_12, %c0_13] : memref<9x8x8xbf16, #tpu.memory_space<vmem>>, vector<1x8x8xbf16>
    %38 = vector.shape_cast %37 : vector<1x8x8xbf16> to vector<8x8xbf16>
    %cst_14 = arith.constant dense<0.000000e+00> : vector<8x512xf32>
    %39 = tpu.matmul %38, %36, %cst_14 {dimension_numbers = #tpu.dot_dimension_numbers<[1], [0], [0], [1], [0, 0, 1, 1], [], []>} : vector<8x8xbf16>, vector<8x512xbf16>, vector<8x512xf32> -> vector<8x512xf32>
    %40 = arith.addf %30, %39 : vector<8x512xf32>
    %41 = vector.extract_strided_slice %0 {offsets = [4, 0], sizes = [1, 512], strides = [1, 1]} : vector<9x512xbf16> to vector<1x512xbf16>
    %42 = vector.broadcast %41 : vector<1x512xbf16> to vector<8x512xbf16>
    %43 = arith.mulf %1, %42 : vector<8x512xbf16>
    %c4 = arith.constant 4 : index
    %c0_15 = arith.constant 0 : index
    %c0_16 = arith.constant 0 : index
    %44 = vector.load %arg4[%c4, %c0_15, %c0_16] : memref<9x8x8xbf16, #tpu.memory_space<vmem>>, vector<1x8x8xbf16>
    %45 = vector.shape_cast %44 : vector<1x8x8xbf16> to vector<8x8xbf16>
    %cst_17 = arith.constant dense<0.000000e+00> : vector<8x512xf32>
    %46 = tpu.matmul %45, %43, %cst_17 {dimension_numbers = #tpu.dot_dimension_numbers<[1], [0], [0], [1], [0, 0, 1, 1], [], []>} : vector<8x8xbf16>, vector<8x512xbf16>, vector<8x512xf32> -> vector<8x512xf32>
    %47 = arith.addf %40, %46 : vector<8x512xf32>
    %48 = vector.extract_strided_slice %1 {offsets = [0, 1], sizes = [8, 511], strides = [1, 1]} : vector<8x512xbf16> to vector<8x511xbf16>
    %49 = vector.extract_strided_slice %1 {offsets = [0, 0], sizes = [8, 1], strides = [1, 1]} : vector<8x512xbf16> to vector<8x1xbf16>
    %50 = tpu.concatenate %48, %49 in 1 : vector<8x511xbf16>, vector<8x1xbf16> -> vector<8x512xbf16>
    %51 = vector.extract_strided_slice %0 {offsets = [5, 0], sizes = [1, 512], strides = [1, 1]} : vector<9x512xbf16> to vector<1x512xbf16>
    %52 = vector.broadcast %51 : vector<1x512xbf16> to vector<8x512xbf16>
    %53 = arith.mulf %50, %52 : vector<8x512xbf16>
    %c5 = arith.constant 5 : index
    %c0_18 = arith.constant 0 : index
    %c0_19 = arith.constant 0 : index
    %54 = vector.load %arg4[%c5, %c0_18, %c0_19] : memref<9x8x8xbf16, #tpu.memory_space<vmem>>, vector<1x8x8xbf16>
    %55 = vector.shape_cast %54 : vector<1x8x8xbf16> to vector<8x8xbf16>
    %cst_20 = arith.constant dense<0.000000e+00> : vector<8x512xf32>
    %56 = tpu.matmul %55, %53, %cst_20 {dimension_numbers = #tpu.dot_dimension_numbers<[1], [0], [0], [1], [0, 0, 1, 1], [], []>} : vector<8x8xbf16>, vector<8x512xbf16>, vector<8x512xf32> -> vector<8x512xf32>
    %57 = arith.addf %47, %56 : vector<8x512xf32>
    %58 = vector.extract_strided_slice %1 {offsets = [0, 15], sizes = [8, 497], strides = [1, 1]} : vector<8x512xbf16> to vector<8x497xbf16>
    %59 = vector.extract_strided_slice %1 {offsets = [0, 0], sizes = [8, 15], strides = [1, 1]} : vector<8x512xbf16> to vector<8x15xbf16>
    %60 = tpu.concatenate %58, %59 in 1 : vector<8x497xbf16>, vector<8x15xbf16> -> vector<8x512xbf16>
    %61 = vector.extract_strided_slice %0 {offsets = [6, 0], sizes = [1, 512], strides = [1, 1]} : vector<9x512xbf16> to vector<1x512xbf16>
    %62 = vector.broadcast %61 : vector<1x512xbf16> to vector<8x512xbf16>
    %63 = arith.mulf %60, %62 : vector<8x512xbf16>
    %c6 = arith.constant 6 : index
    %c0_21 = arith.constant 0 : index
    %c0_22 = arith.constant 0 : index
    %64 = vector.load %arg4[%c6, %c0_21, %c0_22] : memref<9x8x8xbf16, #tpu.memory_space<vmem>>, vector<1x8x8xbf16>
    %65 = vector.shape_cast %64 : vector<1x8x8xbf16> to vector<8x8xbf16>
    %cst_23 = arith.constant dense<0.000000e+00> : vector<8x512xf32>
    %66 = tpu.matmul %65, %63, %cst_23 {dimension_numbers = #tpu.dot_dimension_numbers<[1], [0], [0], [1], [0, 0, 1, 1], [], []>} : vector<8x8xbf16>, vector<8x512xbf16>, vector<8x512xf32> -> vector<8x512xf32>
    %67 = arith.addf %57, %66 : vector<8x512xf32>
    %68 = vector.extract_strided_slice %1 {offsets = [0, 16], sizes = [8, 496], strides = [1, 1]} : vector<8x512xbf16> to vector<8x496xbf16>
    %69 = vector.extract_strided_slice %1 {offsets = [0, 0], sizes = [8, 16], strides = [1, 1]} : vector<8x512xbf16> to vector<8x16xbf16>
    %70 = tpu.concatenate %68, %69 in 1 : vector<8x496xbf16>, vector<8x16xbf16> -> vector<8x512xbf16>
    %71 = vector.extract_strided_slice %0 {offsets = [7, 0], sizes = [1, 512], strides = [1, 1]} : vector<9x512xbf16> to vector<1x512xbf16>
    %72 = vector.broadcast %71 : vector<1x512xbf16> to vector<8x512xbf16>
    %73 = arith.mulf %70, %72 : vector<8x512xbf16>
    %c7 = arith.constant 7 : index
    %c0_24 = arith.constant 0 : index
    %c0_25 = arith.constant 0 : index
    %74 = vector.load %arg4[%c7, %c0_24, %c0_25] : memref<9x8x8xbf16, #tpu.memory_space<vmem>>, vector<1x8x8xbf16>
    %75 = vector.shape_cast %74 : vector<1x8x8xbf16> to vector<8x8xbf16>
    %cst_26 = arith.constant dense<0.000000e+00> : vector<8x512xf32>
    %76 = tpu.matmul %75, %73, %cst_26 {dimension_numbers = #tpu.dot_dimension_numbers<[1], [0], [0], [1], [0, 0, 1, 1], [], []>} : vector<8x8xbf16>, vector<8x512xbf16>, vector<8x512xf32> -> vector<8x512xf32>
    %77 = arith.addf %67, %76 : vector<8x512xf32>
    %78 = vector.extract_strided_slice %1 {offsets = [0, 17], sizes = [8, 495], strides = [1, 1]} : vector<8x512xbf16> to vector<8x495xbf16>
    %79 = vector.extract_strided_slice %1 {offsets = [0, 0], sizes = [8, 17], strides = [1, 1]} : vector<8x512xbf16> to vector<8x17xbf16>
    %80 = tpu.concatenate %78, %79 in 1 : vector<8x495xbf16>, vector<8x17xbf16> -> vector<8x512xbf16>
    %81 = vector.extract_strided_slice %0 {offsets = [8, 0], sizes = [1, 512], strides = [1, 1]} : vector<9x512xbf16> to vector<1x512xbf16>
    %82 = vector.broadcast %81 : vector<1x512xbf16> to vector<8x512xbf16>
    %83 = arith.mulf %80, %82 : vector<8x512xbf16>
    %c8 = arith.constant 8 : index
    %c0_27 = arith.constant 0 : index
    %c0_28 = arith.constant 0 : index
    %84 = vector.load %arg4[%c8, %c0_27, %c0_28] : memref<9x8x8xbf16, #tpu.memory_space<vmem>>, vector<1x8x8xbf16>
    %85 = vector.shape_cast %84 : vector<1x8x8xbf16> to vector<8x8xbf16>
    %cst_29 = arith.constant dense<0.000000e+00> : vector<8x512xf32>
    %86 = tpu.matmul %85, %83, %cst_29 {dimension_numbers = #tpu.dot_dimension_numbers<[1], [0], [0], [1], [0, 0, 1, 1], [], []>} : vector<8x8xbf16>, vector<8x512xbf16>, vector<8x512xf32> -> vector<8x512xf32>
    %87 = arith.addf %77, %86 : vector<8x512xf32>
    %c0_30 = arith.constant 0 : index
    %c0_31 = arith.constant 0 : index
    %88 = vector.load %arg2[%c0_30, %c0_31] : memref<8x512xbf16, #tpu.memory_space<vmem>>, vector<8x512xbf16>
    %89 = vector.extract_strided_slice %88 {offsets = [0, 495], sizes = [8, 17], strides = [1, 1]} : vector<8x512xbf16> to vector<8x17xbf16>
    %90 = vector.extract_strided_slice %88 {offsets = [0, 0], sizes = [8, 495], strides = [1, 1]} : vector<8x512xbf16> to vector<8x495xbf16>
    %91 = tpu.concatenate %89, %90 in 1 : vector<8x17xbf16>, vector<8x495xbf16> -> vector<8x512xbf16>
    %92 = vector.extract_strided_slice %0 {offsets = [0, 0], sizes = [1, 512], strides = [1, 1]} : vector<9x512xbf16> to vector<1x512xbf16>
    %93 = vector.broadcast %92 : vector<1x512xbf16> to vector<8x512xbf16>
    %94 = arith.mulf %91, %93 : vector<8x512xbf16>
    %c0_32 = arith.constant 0 : index
    %c0_33 = arith.constant 0 : index
    %c0_34 = arith.constant 0 : index
    %95 = vector.load %arg5[%c0_32, %c0_33, %c0_34] : memref<9x8x8xbf16, #tpu.memory_space<vmem>>, vector<1x8x8xbf16>
    %96 = vector.shape_cast %95 : vector<1x8x8xbf16> to vector<8x8xbf16>
    %cst_35 = arith.constant dense<0.000000e+00> : vector<8x512xf32>
    %97 = tpu.matmul %96, %94, %cst_35 {dimension_numbers = #tpu.dot_dimension_numbers<[1], [0], [0], [1], [0, 0, 1, 1], [], []>} : vector<8x8xbf16>, vector<8x512xbf16>, vector<8x512xf32> -> vector<8x512xf32>
    %98 = vector.extract_strided_slice %88 {offsets = [0, 496], sizes = [8, 16], strides = [1, 1]} : vector<8x512xbf16> to vector<8x16xbf16>
    %99 = vector.extract_strided_slice %88 {offsets = [0, 0], sizes = [8, 496], strides = [1, 1]} : vector<8x512xbf16> to vector<8x496xbf16>
    %100 = tpu.concatenate %98, %99 in 1 : vector<8x16xbf16>, vector<8x496xbf16> -> vector<8x512xbf16>
    %101 = vector.extract_strided_slice %0 {offsets = [1, 0], sizes = [1, 512], strides = [1, 1]} : vector<9x512xbf16> to vector<1x512xbf16>
    %102 = vector.broadcast %101 : vector<1x512xbf16> to vector<8x512xbf16>
    %103 = arith.mulf %100, %102 : vector<8x512xbf16>
    %c1_36 = arith.constant 1 : index
    %c0_37 = arith.constant 0 : index
    %c0_38 = arith.constant 0 : index
    %104 = vector.load %arg5[%c1_36, %c0_37, %c0_38] : memref<9x8x8xbf16, #tpu.memory_space<vmem>>, vector<1x8x8xbf16>
    %105 = vector.shape_cast %104 : vector<1x8x8xbf16> to vector<8x8xbf16>
    %cst_39 = arith.constant dense<0.000000e+00> : vector<8x512xf32>
    %106 = tpu.matmul %105, %103, %cst_39 {dimension_numbers = #tpu.dot_dimension_numbers<[1], [0], [0], [1], [0, 0, 1, 1], [], []>} : vector<8x8xbf16>, vector<8x512xbf16>, vector<8x512xf32> -> vector<8x512xf32>
    %107 = arith.addf %97, %106 : vector<8x512xf32>
    %108 = vector.extract_strided_slice %88 {offsets = [0, 497], sizes = [8, 15], strides = [1, 1]} : vector<8x512xbf16> to vector<8x15xbf16>
    %109 = vector.extract_strided_slice %88 {offsets = [0, 0], sizes = [8, 497], strides = [1, 1]} : vector<8x512xbf16> to vector<8x497xbf16>
    %110 = tpu.concatenate %108, %109 in 1 : vector<8x15xbf16>, vector<8x497xbf16> -> vector<8x512xbf16>
    %111 = vector.extract_strided_slice %0 {offsets = [2, 0], sizes = [1, 512], strides = [1, 1]} : vector<9x512xbf16> to vector<1x512xbf16>
    %112 = vector.broadcast %111 : vector<1x512xbf16> to vector<8x512xbf16>
    %113 = arith.mulf %110, %112 : vector<8x512xbf16>
    %c2_40 = arith.constant 2 : index
    %c0_41 = arith.constant 0 : index
    %c0_42 = arith.constant 0 : index
    %114 = vector.load %arg5[%c2_40, %c0_41, %c0_42] : memref<9x8x8xbf16, #tpu.memory_space<vmem>>, vector<1x8x8xbf16>
    %115 = vector.shape_cast %114 : vector<1x8x8xbf16> to vector<8x8xbf16>
    %cst_43 = arith.constant dense<0.000000e+00> : vector<8x512xf32>
    %116 = tpu.matmul %115, %113, %cst_43 {dimension_numbers = #tpu.dot_dimension_numbers<[1], [0], [0], [1], [0, 0, 1, 1], [], []>} : vector<8x8xbf16>, vector<8x512xbf16>, vector<8x512xf32> -> vector<8x512xf32>
    %117 = arith.addf %107, %116 : vector<8x512xf32>
    %118 = vector.extract_strided_slice %88 {offsets = [0, 511], sizes = [8, 1], strides = [1, 1]} : vector<8x512xbf16> to vector<8x1xbf16>
    %119 = vector.extract_strided_slice %88 {offsets = [0, 0], sizes = [8, 511], strides = [1, 1]} : vector<8x512xbf16> to vector<8x511xbf16>
    %120 = tpu.concatenate %118, %119 in 1 : vector<8x1xbf16>, vector<8x511xbf16> -> vector<8x512xbf16>
    %121 = vector.extract_strided_slice %0 {offsets = [3, 0], sizes = [1, 512], strides = [1, 1]} : vector<9x512xbf16> to vector<1x512xbf16>
    %122 = vector.broadcast %121 : vector<1x512xbf16> to vector<8x512xbf16>
    %123 = arith.mulf %120, %122 : vector<8x512xbf16>
    %c3_44 = arith.constant 3 : index
    %c0_45 = arith.constant 0 : index
    %c0_46 = arith.constant 0 : index
    %124 = vector.load %arg5[%c3_44, %c0_45, %c0_46] : memref<9x8x8xbf16, #tpu.memory_space<vmem>>, vector<1x8x8xbf16>
    %125 = vector.shape_cast %124 : vector<1x8x8xbf16> to vector<8x8xbf16>
    %cst_47 = arith.constant dense<0.000000e+00> : vector<8x512xf32>
    %126 = tpu.matmul %125, %123, %cst_47 {dimension_numbers = #tpu.dot_dimension_numbers<[1], [0], [0], [1], [0, 0, 1, 1], [], []>} : vector<8x8xbf16>, vector<8x512xbf16>, vector<8x512xf32> -> vector<8x512xf32>
    %127 = arith.addf %117, %126 : vector<8x512xf32>
    %128 = vector.extract_strided_slice %0 {offsets = [4, 0], sizes = [1, 512], strides = [1, 1]} : vector<9x512xbf16> to vector<1x512xbf16>
    %129 = vector.broadcast %128 : vector<1x512xbf16> to vector<8x512xbf16>
    %130 = arith.mulf %88, %129 : vector<8x512xbf16>
    %c4_48 = arith.constant 4 : index
    %c0_49 = arith.constant 0 : index
    %c0_50 = arith.constant 0 : index
    %131 = vector.load %arg5[%c4_48, %c0_49, %c0_50] : memref<9x8x8xbf16, #tpu.memory_space<vmem>>, vector<1x8x8xbf16>
    %132 = vector.shape_cast %131 : vector<1x8x8xbf16> to vector<8x8xbf16>
    %cst_51 = arith.constant dense<0.000000e+00> : vector<8x512xf32>
    %133 = tpu.matmul %132, %130, %cst_51 {dimension_numbers = #tpu.dot_dimension_numbers<[1], [0], [0], [1], [0, 0, 1, 1], [], []>} : vector<8x8xbf16>, vector<8x512xbf16>, vector<8x512xf32> -> vector<8x512xf32>
    %134 = arith.addf %127, %133 : vector<8x512xf32>
    %135 = vector.extract_strided_slice %88 {offsets = [0, 1], sizes = [8, 511], strides = [1, 1]} : vector<8x512xbf16> to vector<8x511xbf16>
    %136 = vector.extract_strided_slice %88 {offsets = [0, 0], sizes = [8, 1], strides = [1, 1]} : vector<8x512xbf16> to vector<8x1xbf16>
    %137 = tpu.concatenate %135, %136 in 1 : vector<8x511xbf16>, vector<8x1xbf16> -> vector<8x512xbf16>
    %138 = vector.extract_strided_slice %0 {offsets = [5, 0], sizes = [1, 512], strides = [1, 1]} : vector<9x512xbf16> to vector<1x512xbf16>
    %139 = vector.broadcast %138 : vector<1x512xbf16> to vector<8x512xbf16>
    %140 = arith.mulf %137, %139 : vector<8x512xbf16>
    %c5_52 = arith.constant 5 : index
    %c0_53 = arith.constant 0 : index
    %c0_54 = arith.constant 0 : index
    %141 = vector.load %arg5[%c5_52, %c0_53, %c0_54] : memref<9x8x8xbf16, #tpu.memory_space<vmem>>, vector<1x8x8xbf16>
    %142 = vector.shape_cast %141 : vector<1x8x8xbf16> to vector<8x8xbf16>
    %cst_55 = arith.constant dense<0.000000e+00> : vector<8x512xf32>
    %143 = tpu.matmul %142, %140, %cst_55 {dimension_numbers = #tpu.dot_dimension_numbers<[1], [0], [0], [1], [0, 0, 1, 1], [], []>} : vector<8x8xbf16>, vector<8x512xbf16>, vector<8x512xf32> -> vector<8x512xf32>
    %144 = arith.addf %134, %143 : vector<8x512xf32>
    %145 = vector.extract_strided_slice %88 {offsets = [0, 15], sizes = [8, 497], strides = [1, 1]} : vector<8x512xbf16> to vector<8x497xbf16>
    %146 = vector.extract_strided_slice %88 {offsets = [0, 0], sizes = [8, 15], strides = [1, 1]} : vector<8x512xbf16> to vector<8x15xbf16>
    %147 = tpu.concatenate %145, %146 in 1 : vector<8x497xbf16>, vector<8x15xbf16> -> vector<8x512xbf16>
    %148 = vector.extract_strided_slice %0 {offsets = [6, 0], sizes = [1, 512], strides = [1, 1]} : vector<9x512xbf16> to vector<1x512xbf16>
    %149 = vector.broadcast %148 : vector<1x512xbf16> to vector<8x512xbf16>
    %150 = arith.mulf %147, %149 : vector<8x512xbf16>
    %c6_56 = arith.constant 6 : index
    %c0_57 = arith.constant 0 : index
    %c0_58 = arith.constant 0 : index
    %151 = vector.load %arg5[%c6_56, %c0_57, %c0_58] : memref<9x8x8xbf16, #tpu.memory_space<vmem>>, vector<1x8x8xbf16>
    %152 = vector.shape_cast %151 : vector<1x8x8xbf16> to vector<8x8xbf16>
    %cst_59 = arith.constant dense<0.000000e+00> : vector<8x512xf32>
    %153 = tpu.matmul %152, %150, %cst_59 {dimension_numbers = #tpu.dot_dimension_numbers<[1], [0], [0], [1], [0, 0, 1, 1], [], []>} : vector<8x8xbf16>, vector<8x512xbf16>, vector<8x512xf32> -> vector<8x512xf32>
    %154 = arith.addf %144, %153 : vector<8x512xf32>
    %155 = vector.extract_strided_slice %88 {offsets = [0, 16], sizes = [8, 496], strides = [1, 1]} : vector<8x512xbf16> to vector<8x496xbf16>
    %156 = vector.extract_strided_slice %88 {offsets = [0, 0], sizes = [8, 16], strides = [1, 1]} : vector<8x512xbf16> to vector<8x16xbf16>
    %157 = tpu.concatenate %155, %156 in 1 : vector<8x496xbf16>, vector<8x16xbf16> -> vector<8x512xbf16>
    %158 = vector.extract_strided_slice %0 {offsets = [7, 0], sizes = [1, 512], strides = [1, 1]} : vector<9x512xbf16> to vector<1x512xbf16>
    %159 = vector.broadcast %158 : vector<1x512xbf16> to vector<8x512xbf16>
    %160 = arith.mulf %157, %159 : vector<8x512xbf16>
    %c7_60 = arith.constant 7 : index
    %c0_61 = arith.constant 0 : index
    %c0_62 = arith.constant 0 : index
    %161 = vector.load %arg5[%c7_60, %c0_61, %c0_62] : memref<9x8x8xbf16, #tpu.memory_space<vmem>>, vector<1x8x8xbf16>
    %162 = vector.shape_cast %161 : vector<1x8x8xbf16> to vector<8x8xbf16>
    %cst_63 = arith.constant dense<0.000000e+00> : vector<8x512xf32>
    %163 = tpu.matmul %162, %160, %cst_63 {dimension_numbers = #tpu.dot_dimension_numbers<[1], [0], [0], [1], [0, 0, 1, 1], [], []>} : vector<8x8xbf16>, vector<8x512xbf16>, vector<8x512xf32> -> vector<8x512xf32>
    %164 = arith.addf %154, %163 : vector<8x512xf32>
    %165 = vector.extract_strided_slice %88 {offsets = [0, 17], sizes = [8, 495], strides = [1, 1]} : vector<8x512xbf16> to vector<8x495xbf16>
    %166 = vector.extract_strided_slice %88 {offsets = [0, 0], sizes = [8, 17], strides = [1, 1]} : vector<8x512xbf16> to vector<8x17xbf16>
    %167 = tpu.concatenate %165, %166 in 1 : vector<8x495xbf16>, vector<8x17xbf16> -> vector<8x512xbf16>
    %168 = vector.extract_strided_slice %0 {offsets = [8, 0], sizes = [1, 512], strides = [1, 1]} : vector<9x512xbf16> to vector<1x512xbf16>
    %169 = vector.broadcast %168 : vector<1x512xbf16> to vector<8x512xbf16>
    %170 = arith.mulf %167, %169 : vector<8x512xbf16>
    %c8_64 = arith.constant 8 : index
    %c0_65 = arith.constant 0 : index
    %c0_66 = arith.constant 0 : index
    %171 = vector.load %arg5[%c8_64, %c0_65, %c0_66] : memref<9x8x8xbf16, #tpu.memory_space<vmem>>, vector<1x8x8xbf16>
    %172 = vector.shape_cast %171 : vector<1x8x8xbf16> to vector<8x8xbf16>
    %cst_67 = arith.constant dense<0.000000e+00> : vector<8x512xf32>
    %173 = tpu.matmul %172, %170, %cst_67 {dimension_numbers = #tpu.dot_dimension_numbers<[1], [0], [0], [1], [0, 0, 1, 1], [], []>} : vector<8x8xbf16>, vector<8x512xbf16>, vector<8x512xf32> -> vector<8x512xf32>
    %174 = arith.addf %164, %173 : vector<8x512xf32>
    %175 = arith.addf %87, %174 : vector<8x512xf32>
    %c0_68 = arith.constant 0 : index
    %c0_69 = arith.constant 0 : index
    %176 = vector.load %arg6[%c0_68, %c0_69] : memref<8x1xf32, #tpu.memory_space<vmem>>, vector<8x1xf32>
    %177 = vector.broadcast %176 : vector<8x1xf32> to vector<8x512xf32>
    %178 = arith.addf %175, %177 : vector<8x512xf32>
    %cst_70 = arith.constant 0.000000e+00 : f32
    %179 = vector.broadcast %cst_70 : f32 to vector<8x512xf32>
    %180 = arith.maximumf %178, %179 : vector<8x512xf32>
    %181 = arith.truncf %180 : vector<8x512xf32> to vector<8x512xbf16>
    %182 = vector.extract_strided_slice %181 {offsets = [0, 495], sizes = [8, 17], strides = [1, 1]} : vector<8x512xbf16> to vector<8x17xbf16>
    %183 = vector.extract_strided_slice %181 {offsets = [0, 0], sizes = [8, 495], strides = [1, 1]} : vector<8x512xbf16> to vector<8x495xbf16>
    %184 = tpu.concatenate %182, %183 in 1 : vector<8x17xbf16>, vector<8x495xbf16> -> vector<8x512xbf16>
    %185 = vector.extract_strided_slice %0 {offsets = [0, 0], sizes = [1, 512], strides = [1, 1]} : vector<9x512xbf16> to vector<1x512xbf16>
    %186 = vector.broadcast %185 : vector<1x512xbf16> to vector<8x512xbf16>
    %187 = arith.mulf %184, %186 : vector<8x512xbf16>
    %c0_71 = arith.constant 0 : index
    %c0_72 = arith.constant 0 : index
    %c0_73 = arith.constant 0 : index
    %188 = vector.load %arg7[%c0_71, %c0_72, %c0_73] : memref<9x8x8xbf16, #tpu.memory_space<vmem>>, vector<1x8x8xbf16>
    %189 = vector.shape_cast %188 : vector<1x8x8xbf16> to vector<8x8xbf16>
    %cst_74 = arith.constant dense<0.000000e+00> : vector<8x512xf32>
    %190 = tpu.matmul %189, %187, %cst_74 {dimension_numbers = #tpu.dot_dimension_numbers<[1], [0], [0], [1], [0, 0, 1, 1], [], []>} : vector<8x8xbf16>, vector<8x512xbf16>, vector<8x512xf32> -> vector<8x512xf32>
    %191 = vector.extract_strided_slice %181 {offsets = [0, 496], sizes = [8, 16], strides = [1, 1]} : vector<8x512xbf16> to vector<8x16xbf16>
    %192 = vector.extract_strided_slice %181 {offsets = [0, 0], sizes = [8, 496], strides = [1, 1]} : vector<8x512xbf16> to vector<8x496xbf16>
    %193 = tpu.concatenate %191, %192 in 1 : vector<8x16xbf16>, vector<8x496xbf16> -> vector<8x512xbf16>
    %194 = vector.extract_strided_slice %0 {offsets = [1, 0], sizes = [1, 512], strides = [1, 1]} : vector<9x512xbf16> to vector<1x512xbf16>
    %195 = vector.broadcast %194 : vector<1x512xbf16> to vector<8x512xbf16>
    %196 = arith.mulf %193, %195 : vector<8x512xbf16>
    %c1_75 = arith.constant 1 : index
    %c0_76 = arith.constant 0 : index
    %c0_77 = arith.constant 0 : index
    %197 = vector.load %arg7[%c1_75, %c0_76, %c0_77] : memref<9x8x8xbf16, #tpu.memory_space<vmem>>, vector<1x8x8xbf16>
    %198 = vector.shape_cast %197 : vector<1x8x8xbf16> to vector<8x8xbf16>
    %cst_78 = arith.constant dense<0.000000e+00> : vector<8x512xf32>
    %199 = tpu.matmul %198, %196, %cst_78 {dimension_numbers = #tpu.dot_dimension_numbers<[1], [0], [0], [1], [0, 0, 1, 1], [], []>} : vector<8x8xbf16>, vector<8x512xbf16>, vector<8x512xf32> -> vector<8x512xf32>
    %200 = arith.addf %190, %199 : vector<8x512xf32>
    %201 = vector.extract_strided_slice %181 {offsets = [0, 497], sizes = [8, 15], strides = [1, 1]} : vector<8x512xbf16> to vector<8x15xbf16>
    %202 = vector.extract_strided_slice %181 {offsets = [0, 0], sizes = [8, 497], strides = [1, 1]} : vector<8x512xbf16> to vector<8x497xbf16>
    %203 = tpu.concatenate %201, %202 in 1 : vector<8x15xbf16>, vector<8x497xbf16> -> vector<8x512xbf16>
    %204 = vector.extract_strided_slice %0 {offsets = [2, 0], sizes = [1, 512], strides = [1, 1]} : vector<9x512xbf16> to vector<1x512xbf16>
    %205 = vector.broadcast %204 : vector<1x512xbf16> to vector<8x512xbf16>
    %206 = arith.mulf %203, %205 : vector<8x512xbf16>
    %c2_79 = arith.constant 2 : index
    %c0_80 = arith.constant 0 : index
    %c0_81 = arith.constant 0 : index
    %207 = vector.load %arg7[%c2_79, %c0_80, %c0_81] : memref<9x8x8xbf16, #tpu.memory_space<vmem>>, vector<1x8x8xbf16>
    %208 = vector.shape_cast %207 : vector<1x8x8xbf16> to vector<8x8xbf16>
    %cst_82 = arith.constant dense<0.000000e+00> : vector<8x512xf32>
    %209 = tpu.matmul %208, %206, %cst_82 {dimension_numbers = #tpu.dot_dimension_numbers<[1], [0], [0], [1], [0, 0, 1, 1], [], []>} : vector<8x8xbf16>, vector<8x512xbf16>, vector<8x512xf32> -> vector<8x512xf32>
    %210 = arith.addf %200, %209 : vector<8x512xf32>
    %211 = vector.extract_strided_slice %181 {offsets = [0, 511], sizes = [8, 1], strides = [1, 1]} : vector<8x512xbf16> to vector<8x1xbf16>
    %212 = vector.extract_strided_slice %181 {offsets = [0, 0], sizes = [8, 511], strides = [1, 1]} : vector<8x512xbf16> to vector<8x511xbf16>
    %213 = tpu.concatenate %211, %212 in 1 : vector<8x1xbf16>, vector<8x511xbf16> -> vector<8x512xbf16>
    %214 = vector.extract_strided_slice %0 {offsets = [3, 0], sizes = [1, 512], strides = [1, 1]} : vector<9x512xbf16> to vector<1x512xbf16>
    %215 = vector.broadcast %214 : vector<1x512xbf16> to vector<8x512xbf16>
    %216 = arith.mulf %213, %215 : vector<8x512xbf16>
    %c3_83 = arith.constant 3 : index
    %c0_84 = arith.constant 0 : index
    %c0_85 = arith.constant 0 : index
    %217 = vector.load %arg7[%c3_83, %c0_84, %c0_85] : memref<9x8x8xbf16, #tpu.memory_space<vmem>>, vector<1x8x8xbf16>
    %218 = vector.shape_cast %217 : vector<1x8x8xbf16> to vector<8x8xbf16>
    %cst_86 = arith.constant dense<0.000000e+00> : vector<8x512xf32>
    %219 = tpu.matmul %218, %216, %cst_86 {dimension_numbers = #tpu.dot_dimension_numbers<[1], [0], [0], [1], [0, 0, 1, 1], [], []>} : vector<8x8xbf16>, vector<8x512xbf16>, vector<8x512xf32> -> vector<8x512xf32>
    %220 = arith.addf %210, %219 : vector<8x512xf32>
    %221 = vector.extract_strided_slice %0 {offsets = [4, 0], sizes = [1, 512], strides = [1, 1]} : vector<9x512xbf16> to vector<1x512xbf16>
    %222 = vector.broadcast %221 : vector<1x512xbf16> to vector<8x512xbf16>
    %223 = arith.mulf %181, %222 : vector<8x512xbf16>
    %c4_87 = arith.constant 4 : index
    %c0_88 = arith.constant 0 : index
    %c0_89 = arith.constant 0 : index
    %224 = vector.load %arg7[%c4_87, %c0_88, %c0_89] : memref<9x8x8xbf16, #tpu.memory_space<vmem>>, vector<1x8x8xbf16>
    %225 = vector.shape_cast %224 : vector<1x8x8xbf16> to vector<8x8xbf16>
    %cst_90 = arith.constant dense<0.000000e+00> : vector<8x512xf32>
    %226 = tpu.matmul %225, %223, %cst_90 {dimension_numbers = #tpu.dot_dimension_numbers<[1], [0], [0], [1], [0, 0, 1, 1], [], []>} : vector<8x8xbf16>, vector<8x512xbf16>, vector<8x512xf32> -> vector<8x512xf32>
    %227 = arith.addf %220, %226 : vector<8x512xf32>
    %228 = vector.extract_strided_slice %181 {offsets = [0, 1], sizes = [8, 511], strides = [1, 1]} : vector<8x512xbf16> to vector<8x511xbf16>
    %229 = vector.extract_strided_slice %181 {offsets = [0, 0], sizes = [8, 1], strides = [1, 1]} : vector<8x512xbf16> to vector<8x1xbf16>
    %230 = tpu.concatenate %228, %229 in 1 : vector<8x511xbf16>, vector<8x1xbf16> -> vector<8x512xbf16>
    %231 = vector.extract_strided_slice %0 {offsets = [5, 0], sizes = [1, 512], strides = [1, 1]} : vector<9x512xbf16> to vector<1x512xbf16>
    %232 = vector.broadcast %231 : vector<1x512xbf16> to vector<8x512xbf16>
    %233 = arith.mulf %230, %232 : vector<8x512xbf16>
    %c5_91 = arith.constant 5 : index
    %c0_92 = arith.constant 0 : index
    %c0_93 = arith.constant 0 : index
    %234 = vector.load %arg7[%c5_91, %c0_92, %c0_93] : memref<9x8x8xbf16, #tpu.memory_space<vmem>>, vector<1x8x8xbf16>
    %235 = vector.shape_cast %234 : vector<1x8x8xbf16> to vector<8x8xbf16>
    %cst_94 = arith.constant dense<0.000000e+00> : vector<8x512xf32>
    %236 = tpu.matmul %235, %233, %cst_94 {dimension_numbers = #tpu.dot_dimension_numbers<[1], [0], [0], [1], [0, 0, 1, 1], [], []>} : vector<8x8xbf16>, vector<8x512xbf16>, vector<8x512xf32> -> vector<8x512xf32>
    %237 = arith.addf %227, %236 : vector<8x512xf32>
    %238 = vector.extract_strided_slice %181 {offsets = [0, 15], sizes = [8, 497], strides = [1, 1]} : vector<8x512xbf16> to vector<8x497xbf16>
    %239 = vector.extract_strided_slice %181 {offsets = [0, 0], sizes = [8, 15], strides = [1, 1]} : vector<8x512xbf16> to vector<8x15xbf16>
    %240 = tpu.concatenate %238, %239 in 1 : vector<8x497xbf16>, vector<8x15xbf16> -> vector<8x512xbf16>
    %241 = vector.extract_strided_slice %0 {offsets = [6, 0], sizes = [1, 512], strides = [1, 1]} : vector<9x512xbf16> to vector<1x512xbf16>
    %242 = vector.broadcast %241 : vector<1x512xbf16> to vector<8x512xbf16>
    %243 = arith.mulf %240, %242 : vector<8x512xbf16>
    %c6_95 = arith.constant 6 : index
    %c0_96 = arith.constant 0 : index
    %c0_97 = arith.constant 0 : index
    %244 = vector.load %arg7[%c6_95, %c0_96, %c0_97] : memref<9x8x8xbf16, #tpu.memory_space<vmem>>, vector<1x8x8xbf16>
    %245 = vector.shape_cast %244 : vector<1x8x8xbf16> to vector<8x8xbf16>
    %cst_98 = arith.constant dense<0.000000e+00> : vector<8x512xf32>
    %246 = tpu.matmul %245, %243, %cst_98 {dimension_numbers = #tpu.dot_dimension_numbers<[1], [0], [0], [1], [0, 0, 1, 1], [], []>} : vector<8x8xbf16>, vector<8x512xbf16>, vector<8x512xf32> -> vector<8x512xf32>
    %247 = arith.addf %237, %246 : vector<8x512xf32>
    %248 = vector.extract_strided_slice %181 {offsets = [0, 16], sizes = [8, 496], strides = [1, 1]} : vector<8x512xbf16> to vector<8x496xbf16>
    %249 = vector.extract_strided_slice %181 {offsets = [0, 0], sizes = [8, 16], strides = [1, 1]} : vector<8x512xbf16> to vector<8x16xbf16>
    %250 = tpu.concatenate %248, %249 in 1 : vector<8x496xbf16>, vector<8x16xbf16> -> vector<8x512xbf16>
    %251 = vector.extract_strided_slice %0 {offsets = [7, 0], sizes = [1, 512], strides = [1, 1]} : vector<9x512xbf16> to vector<1x512xbf16>
    %252 = vector.broadcast %251 : vector<1x512xbf16> to vector<8x512xbf16>
    %253 = arith.mulf %250, %252 : vector<8x512xbf16>
    %c7_99 = arith.constant 7 : index
    %c0_100 = arith.constant 0 : index
    %c0_101 = arith.constant 0 : index
    %254 = vector.load %arg7[%c7_99, %c0_100, %c0_101] : memref<9x8x8xbf16, #tpu.memory_space<vmem>>, vector<1x8x8xbf16>
    %255 = vector.shape_cast %254 : vector<1x8x8xbf16> to vector<8x8xbf16>
    %cst_102 = arith.constant dense<0.000000e+00> : vector<8x512xf32>
    %256 = tpu.matmul %255, %253, %cst_102 {dimension_numbers = #tpu.dot_dimension_numbers<[1], [0], [0], [1], [0, 0, 1, 1], [], []>} : vector<8x8xbf16>, vector<8x512xbf16>, vector<8x512xf32> -> vector<8x512xf32>
    %257 = arith.addf %247, %256 : vector<8x512xf32>
    %258 = vector.extract_strided_slice %181 {offsets = [0, 17], sizes = [8, 495], strides = [1, 1]} : vector<8x512xbf16> to vector<8x495xbf16>
    %259 = vector.extract_strided_slice %181 {offsets = [0, 0], sizes = [8, 17], strides = [1, 1]} : vector<8x512xbf16> to vector<8x17xbf16>
    %260 = tpu.concatenate %258, %259 in 1 : vector<8x495xbf16>, vector<8x17xbf16> -> vector<8x512xbf16>
    %261 = vector.extract_strided_slice %0 {offsets = [8, 0], sizes = [1, 512], strides = [1, 1]} : vector<9x512xbf16> to vector<1x512xbf16>
    %262 = vector.broadcast %261 : vector<1x512xbf16> to vector<8x512xbf16>
    %263 = arith.mulf %260, %262 : vector<8x512xbf16>
    %c8_103 = arith.constant 8 : index
    %c0_104 = arith.constant 0 : index
    %c0_105 = arith.constant 0 : index
    %264 = vector.load %arg7[%c8_103, %c0_104, %c0_105] : memref<9x8x8xbf16, #tpu.memory_space<vmem>>, vector<1x8x8xbf16>
    %265 = vector.shape_cast %264 : vector<1x8x8xbf16> to vector<8x8xbf16>
    %cst_106 = arith.constant dense<0.000000e+00> : vector<8x512xf32>
    %266 = tpu.matmul %265, %263, %cst_106 {dimension_numbers = #tpu.dot_dimension_numbers<[1], [0], [0], [1], [0, 0, 1, 1], [], []>} : vector<8x8xbf16>, vector<8x512xbf16>, vector<8x512xf32> -> vector<8x512xf32>
    %267 = arith.addf %257, %266 : vector<8x512xf32>
    %c0_107 = arith.constant 0 : index
    %c0_108 = arith.constant 0 : index
    %268 = vector.load %arg8[%c0_107, %c0_108] : memref<8x1xf32, #tpu.memory_space<vmem>>, vector<8x1xf32>
    %269 = vector.broadcast %268 : vector<8x1xf32> to vector<8x512xf32>
    %270 = arith.addf %267, %269 : vector<8x512xf32>
    %cst_109 = arith.constant 0.000000e+00 : f32
    %271 = vector.broadcast %cst_109 : f32 to vector<8x512xf32>
    %272 = arith.maximumf %270, %271 : vector<8x512xf32>
    %273 = arith.truncf %272 : vector<8x512xf32> to vector<8x512xbf16>
    %c0_110 = arith.constant 0 : index
    %c0_111 = arith.constant 0 : index
    %274 = vector.load %arg9[%c0_110, %c0_111] : memref<8x512xbf16, #tpu.memory_space<vmem>>, vector<8x512xbf16>
    tpu.vector_store %arg9[%c0_110, %c0_111], %273 {strides = array<i32>} : memref<8x512xbf16, #tpu.memory_space<vmem>>, vector<8x512xbf16>,
    return
  }
  func.func @transform_0(%arg0: i32) -> (i32, i32) {
    %c0_i32 = arith.constant 0 : i32
    %c0_i32_0 = arith.constant 0 : i32
    return %c0_i32, %arg0 : i32, i32
  }
  func.func @transform_1(%arg0: i32) -> (i32, i32) {
    %c0_i32 = arith.constant 0 : i32
    %c0_i32_0 = arith.constant 0 : i32
    return %c0_i32, %arg0 : i32, i32
  }
  func.func @transform_2(%arg0: i32) -> (i32, i32) {
    %c0_i32 = arith.constant 0 : i32
    %c0_i32_0 = arith.constant 0 : i32
    return %c0_i32, %arg0 : i32, i32
  }
  func.func @transform_3(%arg0: i32) -> (i32, i32, i32) {
    %c0_i32 = arith.constant 0 : i32
    %c0_i32_0 = arith.constant 0 : i32
    %c0_i32_1 = arith.constant 0 : i32
    %c0_i32_2 = arith.constant 0 : i32
    return %c0_i32, %c0_i32_0, %c0_i32_1 : i32, i32, i32
  }
  func.func @transform_4(%arg0: i32) -> (i32, i32, i32) {
    %c0_i32 = arith.constant 0 : i32
    %c0_i32_0 = arith.constant 0 : i32
    %c0_i32_1 = arith.constant 0 : i32
    %c0_i32_2 = arith.constant 0 : i32
    return %c0_i32, %c0_i32_0, %c0_i32_1 : i32, i32, i32
  }
  func.func @transform_5(%arg0: i32) -> (i32, i32) {
    %c0_i32 = arith.constant 0 : i32
    %c0_i32_0 = arith.constant 0 : i32
    %c0_i32_1 = arith.constant 0 : i32
    return %c0_i32, %c0_i32_0 : i32, i32
  }
  func.func @transform_6(%arg0: i32) -> (i32, i32, i32) {
    %c0_i32 = arith.constant 0 : i32
    %c0_i32_0 = arith.constant 0 : i32
    %c0_i32_1 = arith.constant 0 : i32
    %c0_i32_2 = arith.constant 0 : i32
    return %c0_i32, %c0_i32_0, %c0_i32_1 : i32, i32, i32
  }
  func.func @transform_7(%arg0: i32) -> (i32, i32) {
    %c0_i32 = arith.constant 0 : i32
    %c0_i32_0 = arith.constant 0 : i32
    %c0_i32_1 = arith.constant 0 : i32
    return %c0_i32, %c0_i32_0 : i32, i32
  }
  func.func @transform_8(%arg0: i32) -> (i32, i32) {
    %c0_i32 = arith.constant 0 : i32
    %c0_i32_0 = arith.constant 0 : i32
    return %c0_i32, %arg0 : i32, i32
  }
}

module attributes {stable_mosaic.version = 11 : i64} {
  func.func @_conv_kernel(%arg0: i32, %arg1: memref<8x512xbf16, #tpu.memory_space<vmem>>, %arg2: memref<9x512xbf16, #tpu.memory_space<vmem>>, %arg3: memref<9x8x8xbf16, #tpu.memory_space<vmem>>, %arg4: memref<8x1xf32, #tpu.memory_space<vmem>>, %arg5: memref<8x512xf32, #tpu.memory_space<vmem>>) attributes {dimension_semantics = [#tpu.dimension_semantics<parallel>], iteration_bounds = array<i64: 1>, scalar_prefetch = 0 : i64, scratch_operands = 0 : i64, tpu.core_type = #tpu.core_type<tc>, window_params = [{transform_indices = @transform_0, window_bounds = array<i64: 8, 512>}, {transform_indices = @transform_1, window_bounds = array<i64: 9, 512>}, {pipeline_mode = #tpu.pipeline_mode<synchronous>, transform_indices = @transform_2, window_bounds = array<i64: 9, 8, 8>}, {pipeline_mode = #tpu.pipeline_mode<synchronous>, transform_indices = @transform_3, window_bounds = array<i64: 8, 1>}, {transform_indices = @transform_4, window_bounds = array<i64: 8, 512>}]} {
    %c0 = arith.constant 0 : index
    %c0_0 = arith.constant 0 : index
    %0 = vector.load %arg1[%c0, %c0_0] : memref<8x512xbf16, #tpu.memory_space<vmem>>, vector<8x512xbf16>
    %c0_1 = arith.constant 0 : index
    %c0_2 = arith.constant 0 : index
    %1 = vector.load %arg2[%c0_1, %c0_2] : memref<9x512xbf16, #tpu.memory_space<vmem>>, vector<9x512xbf16>
    %2 = vector.extract_strided_slice %0 {offsets = [0, 495], sizes = [8, 17], strides = [1, 1]} : vector<8x512xbf16> to vector<8x17xbf16>
    %3 = vector.extract_strided_slice %0 {offsets = [0, 0], sizes = [8, 495], strides = [1, 1]} : vector<8x512xbf16> to vector<8x495xbf16>
    %4 = tpu.concatenate %2, %3 in 1 : vector<8x17xbf16>, vector<8x495xbf16> -> vector<8x512xbf16>
    %5 = vector.extract_strided_slice %1 {offsets = [0, 0], sizes = [1, 512], strides = [1, 1]} : vector<9x512xbf16> to vector<1x512xbf16>
    %6 = vector.broadcast %5 : vector<1x512xbf16> to vector<8x512xbf16>
    %7 = arith.mulf %4, %6 : vector<8x512xbf16>
    %c0_3 = arith.constant 0 : index
    %c0_4 = arith.constant 0 : index
    %c0_5 = arith.constant 0 : index
    %8 = vector.load %arg3[%c0_3, %c0_4, %c0_5] : memref<9x8x8xbf16, #tpu.memory_space<vmem>>, vector<1x8x8xbf16>
    %9 = vector.shape_cast %8 : vector<1x8x8xbf16> to vector<8x8xbf16>
    %cst = arith.constant dense<0.000000e+00> : vector<8x512xf32>
    %10 = tpu.matmul %9, %7, %cst {dimension_numbers = #tpu.dot_dimension_numbers<[1], [0], [0], [1], [0, 0, 1, 1], [], []>} : vector<8x8xbf16>, vector<8x512xbf16>, vector<8x512xf32> -> vector<8x512xf32>
    %11 = vector.extract_strided_slice %0 {offsets = [0, 496], sizes = [8, 16], strides = [1, 1]} : vector<8x512xbf16> to vector<8x16xbf16>
    %12 = vector.extract_strided_slice %0 {offsets = [0, 0], sizes = [8, 496], strides = [1, 1]} : vector<8x512xbf16> to vector<8x496xbf16>
    %13 = tpu.concatenate %11, %12 in 1 : vector<8x16xbf16>, vector<8x496xbf16> -> vector<8x512xbf16>
    %14 = vector.extract_strided_slice %1 {offsets = [1, 0], sizes = [1, 512], strides = [1, 1]} : vector<9x512xbf16> to vector<1x512xbf16>
    %15 = vector.broadcast %14 : vector<1x512xbf16> to vector<8x512xbf16>
    %16 = arith.mulf %13, %15 : vector<8x512xbf16>
    %c1 = arith.constant 1 : index
    %c0_6 = arith.constant 0 : index
    %c0_7 = arith.constant 0 : index
    %17 = vector.load %arg3[%c1, %c0_6, %c0_7] : memref<9x8x8xbf16, #tpu.memory_space<vmem>>, vector<1x8x8xbf16>
    %18 = vector.shape_cast %17 : vector<1x8x8xbf16> to vector<8x8xbf16>
    %cst_8 = arith.constant dense<0.000000e+00> : vector<8x512xf32>
    %19 = tpu.matmul %18, %16, %cst_8 {dimension_numbers = #tpu.dot_dimension_numbers<[1], [0], [0], [1], [0, 0, 1, 1], [], []>} : vector<8x8xbf16>, vector<8x512xbf16>, vector<8x512xf32> -> vector<8x512xf32>
    %20 = arith.addf %10, %19 : vector<8x512xf32>
    %21 = vector.extract_strided_slice %0 {offsets = [0, 497], sizes = [8, 15], strides = [1, 1]} : vector<8x512xbf16> to vector<8x15xbf16>
    %22 = vector.extract_strided_slice %0 {offsets = [0, 0], sizes = [8, 497], strides = [1, 1]} : vector<8x512xbf16> to vector<8x497xbf16>
    %23 = tpu.concatenate %21, %22 in 1 : vector<8x15xbf16>, vector<8x497xbf16> -> vector<8x512xbf16>
    %24 = vector.extract_strided_slice %1 {offsets = [2, 0], sizes = [1, 512], strides = [1, 1]} : vector<9x512xbf16> to vector<1x512xbf16>
    %25 = vector.broadcast %24 : vector<1x512xbf16> to vector<8x512xbf16>
    %26 = arith.mulf %23, %25 : vector<8x512xbf16>
    %c2 = arith.constant 2 : index
    %c0_9 = arith.constant 0 : index
    %c0_10 = arith.constant 0 : index
    %27 = vector.load %arg3[%c2, %c0_9, %c0_10] : memref<9x8x8xbf16, #tpu.memory_space<vmem>>, vector<1x8x8xbf16>
    %28 = vector.shape_cast %27 : vector<1x8x8xbf16> to vector<8x8xbf16>
    %cst_11 = arith.constant dense<0.000000e+00> : vector<8x512xf32>
    %29 = tpu.matmul %28, %26, %cst_11 {dimension_numbers = #tpu.dot_dimension_numbers<[1], [0], [0], [1], [0, 0, 1, 1], [], []>} : vector<8x8xbf16>, vector<8x512xbf16>, vector<8x512xf32> -> vector<8x512xf32>
    %30 = arith.addf %20, %29 : vector<8x512xf32>
    %31 = vector.extract_strided_slice %0 {offsets = [0, 511], sizes = [8, 1], strides = [1, 1]} : vector<8x512xbf16> to vector<8x1xbf16>
    %32 = vector.extract_strided_slice %0 {offsets = [0, 0], sizes = [8, 511], strides = [1, 1]} : vector<8x512xbf16> to vector<8x511xbf16>
    %33 = tpu.concatenate %31, %32 in 1 : vector<8x1xbf16>, vector<8x511xbf16> -> vector<8x512xbf16>
    %34 = vector.extract_strided_slice %1 {offsets = [3, 0], sizes = [1, 512], strides = [1, 1]} : vector<9x512xbf16> to vector<1x512xbf16>
    %35 = vector.broadcast %34 : vector<1x512xbf16> to vector<8x512xbf16>
    %36 = arith.mulf %33, %35 : vector<8x512xbf16>
    %c3 = arith.constant 3 : index
    %c0_12 = arith.constant 0 : index
    %c0_13 = arith.constant 0 : index
    %37 = vector.load %arg3[%c3, %c0_12, %c0_13] : memref<9x8x8xbf16, #tpu.memory_space<vmem>>, vector<1x8x8xbf16>
    %38 = vector.shape_cast %37 : vector<1x8x8xbf16> to vector<8x8xbf16>
    %cst_14 = arith.constant dense<0.000000e+00> : vector<8x512xf32>
    %39 = tpu.matmul %38, %36, %cst_14 {dimension_numbers = #tpu.dot_dimension_numbers<[1], [0], [0], [1], [0, 0, 1, 1], [], []>} : vector<8x8xbf16>, vector<8x512xbf16>, vector<8x512xf32> -> vector<8x512xf32>
    %40 = arith.addf %30, %39 : vector<8x512xf32>
    %41 = vector.extract_strided_slice %1 {offsets = [4, 0], sizes = [1, 512], strides = [1, 1]} : vector<9x512xbf16> to vector<1x512xbf16>
    %42 = vector.broadcast %41 : vector<1x512xbf16> to vector<8x512xbf16>
    %43 = arith.mulf %0, %42 : vector<8x512xbf16>
    %c4 = arith.constant 4 : index
    %c0_15 = arith.constant 0 : index
    %c0_16 = arith.constant 0 : index
    %44 = vector.load %arg3[%c4, %c0_15, %c0_16] : memref<9x8x8xbf16, #tpu.memory_space<vmem>>, vector<1x8x8xbf16>
    %45 = vector.shape_cast %44 : vector<1x8x8xbf16> to vector<8x8xbf16>
    %cst_17 = arith.constant dense<0.000000e+00> : vector<8x512xf32>
    %46 = tpu.matmul %45, %43, %cst_17 {dimension_numbers = #tpu.dot_dimension_numbers<[1], [0], [0], [1], [0, 0, 1, 1], [], []>} : vector<8x8xbf16>, vector<8x512xbf16>, vector<8x512xf32> -> vector<8x512xf32>
    %47 = arith.addf %40, %46 : vector<8x512xf32>
    %48 = vector.extract_strided_slice %0 {offsets = [0, 1], sizes = [8, 511], strides = [1, 1]} : vector<8x512xbf16> to vector<8x511xbf16>
    %49 = vector.extract_strided_slice %0 {offsets = [0, 0], sizes = [8, 1], strides = [1, 1]} : vector<8x512xbf16> to vector<8x1xbf16>
    %50 = tpu.concatenate %48, %49 in 1 : vector<8x511xbf16>, vector<8x1xbf16> -> vector<8x512xbf16>
    %51 = vector.extract_strided_slice %1 {offsets = [5, 0], sizes = [1, 512], strides = [1, 1]} : vector<9x512xbf16> to vector<1x512xbf16>
    %52 = vector.broadcast %51 : vector<1x512xbf16> to vector<8x512xbf16>
    %53 = arith.mulf %50, %52 : vector<8x512xbf16>
    %c5 = arith.constant 5 : index
    %c0_18 = arith.constant 0 : index
    %c0_19 = arith.constant 0 : index
    %54 = vector.load %arg3[%c5, %c0_18, %c0_19] : memref<9x8x8xbf16, #tpu.memory_space<vmem>>, vector<1x8x8xbf16>
    %55 = vector.shape_cast %54 : vector<1x8x8xbf16> to vector<8x8xbf16>
    %cst_20 = arith.constant dense<0.000000e+00> : vector<8x512xf32>
    %56 = tpu.matmul %55, %53, %cst_20 {dimension_numbers = #tpu.dot_dimension_numbers<[1], [0], [0], [1], [0, 0, 1, 1], [], []>} : vector<8x8xbf16>, vector<8x512xbf16>, vector<8x512xf32> -> vector<8x512xf32>
    %57 = arith.addf %47, %56 : vector<8x512xf32>
    %58 = vector.extract_strided_slice %0 {offsets = [0, 15], sizes = [8, 497], strides = [1, 1]} : vector<8x512xbf16> to vector<8x497xbf16>
    %59 = vector.extract_strided_slice %0 {offsets = [0, 0], sizes = [8, 15], strides = [1, 1]} : vector<8x512xbf16> to vector<8x15xbf16>
    %60 = tpu.concatenate %58, %59 in 1 : vector<8x497xbf16>, vector<8x15xbf16> -> vector<8x512xbf16>
    %61 = vector.extract_strided_slice %1 {offsets = [6, 0], sizes = [1, 512], strides = [1, 1]} : vector<9x512xbf16> to vector<1x512xbf16>
    %62 = vector.broadcast %61 : vector<1x512xbf16> to vector<8x512xbf16>
    %63 = arith.mulf %60, %62 : vector<8x512xbf16>
    %c6 = arith.constant 6 : index
    %c0_21 = arith.constant 0 : index
    %c0_22 = arith.constant 0 : index
    %64 = vector.load %arg3[%c6, %c0_21, %c0_22] : memref<9x8x8xbf16, #tpu.memory_space<vmem>>, vector<1x8x8xbf16>
    %65 = vector.shape_cast %64 : vector<1x8x8xbf16> to vector<8x8xbf16>
    %cst_23 = arith.constant dense<0.000000e+00> : vector<8x512xf32>
    %66 = tpu.matmul %65, %63, %cst_23 {dimension_numbers = #tpu.dot_dimension_numbers<[1], [0], [0], [1], [0, 0, 1, 1], [], []>} : vector<8x8xbf16>, vector<8x512xbf16>, vector<8x512xf32> -> vector<8x512xf32>
    %67 = arith.addf %57, %66 : vector<8x512xf32>
    %68 = vector.extract_strided_slice %0 {offsets = [0, 16], sizes = [8, 496], strides = [1, 1]} : vector<8x512xbf16> to vector<8x496xbf16>
    %69 = vector.extract_strided_slice %0 {offsets = [0, 0], sizes = [8, 16], strides = [1, 1]} : vector<8x512xbf16> to vector<8x16xbf16>
    %70 = tpu.concatenate %68, %69 in 1 : vector<8x496xbf16>, vector<8x16xbf16> -> vector<8x512xbf16>
    %71 = vector.extract_strided_slice %1 {offsets = [7, 0], sizes = [1, 512], strides = [1, 1]} : vector<9x512xbf16> to vector<1x512xbf16>
    %72 = vector.broadcast %71 : vector<1x512xbf16> to vector<8x512xbf16>
    %73 = arith.mulf %70, %72 : vector<8x512xbf16>
    %c7 = arith.constant 7 : index
    %c0_24 = arith.constant 0 : index
    %c0_25 = arith.constant 0 : index
    %74 = vector.load %arg3[%c7, %c0_24, %c0_25] : memref<9x8x8xbf16, #tpu.memory_space<vmem>>, vector<1x8x8xbf16>
    %75 = vector.shape_cast %74 : vector<1x8x8xbf16> to vector<8x8xbf16>
    %cst_26 = arith.constant dense<0.000000e+00> : vector<8x512xf32>
    %76 = tpu.matmul %75, %73, %cst_26 {dimension_numbers = #tpu.dot_dimension_numbers<[1], [0], [0], [1], [0, 0, 1, 1], [], []>} : vector<8x8xbf16>, vector<8x512xbf16>, vector<8x512xf32> -> vector<8x512xf32>
    %77 = arith.addf %67, %76 : vector<8x512xf32>
    %78 = vector.extract_strided_slice %0 {offsets = [0, 17], sizes = [8, 495], strides = [1, 1]} : vector<8x512xbf16> to vector<8x495xbf16>
    %79 = vector.extract_strided_slice %0 {offsets = [0, 0], sizes = [8, 17], strides = [1, 1]} : vector<8x512xbf16> to vector<8x17xbf16>
    %80 = tpu.concatenate %78, %79 in 1 : vector<8x495xbf16>, vector<8x17xbf16> -> vector<8x512xbf16>
    %81 = vector.extract_strided_slice %1 {offsets = [8, 0], sizes = [1, 512], strides = [1, 1]} : vector<9x512xbf16> to vector<1x512xbf16>
    %82 = vector.broadcast %81 : vector<1x512xbf16> to vector<8x512xbf16>
    %83 = arith.mulf %80, %82 : vector<8x512xbf16>
    %c8 = arith.constant 8 : index
    %c0_27 = arith.constant 0 : index
    %c0_28 = arith.constant 0 : index
    %84 = vector.load %arg3[%c8, %c0_27, %c0_28] : memref<9x8x8xbf16, #tpu.memory_space<vmem>>, vector<1x8x8xbf16>
    %85 = vector.shape_cast %84 : vector<1x8x8xbf16> to vector<8x8xbf16>
    %cst_29 = arith.constant dense<0.000000e+00> : vector<8x512xf32>
    %86 = tpu.matmul %85, %83, %cst_29 {dimension_numbers = #tpu.dot_dimension_numbers<[1], [0], [0], [1], [0, 0, 1, 1], [], []>} : vector<8x8xbf16>, vector<8x512xbf16>, vector<8x512xf32> -> vector<8x512xf32>
    %87 = arith.addf %77, %86 : vector<8x512xf32>
    %c0_30 = arith.constant 0 : index
    %c0_31 = arith.constant 0 : index
    %88 = vector.load %arg4[%c0_30, %c0_31] : memref<8x1xf32, #tpu.memory_space<vmem>>, vector<8x1xf32>
    %89 = vector.broadcast %88 : vector<8x1xf32> to vector<8x512xf32>
    %90 = arith.addf %87, %89 : vector<8x512xf32>
    %c0_32 = arith.constant 0 : index
    %c0_33 = arith.constant 0 : index
    %91 = vector.load %arg5[%c0_32, %c0_33] : memref<8x512xf32, #tpu.memory_space<vmem>>, vector<8x512xf32>
    tpu.vector_store %arg5[%c0_32, %c0_33], %90 {strides = array<i32>} : memref<8x512xf32, #tpu.memory_space<vmem>>, vector<8x512xf32>,
    return
  }
  func.func @transform_0(%arg0: i32) -> (i32, i32) {
    %c0_i32 = arith.constant 0 : i32
    %c0_i32_0 = arith.constant 0 : i32
    return %c0_i32, %arg0 : i32, i32
  }
  func.func @transform_1(%arg0: i32) -> (i32, i32) {
    %c0_i32 = arith.constant 0 : i32
    %c0_i32_0 = arith.constant 0 : i32
    return %c0_i32, %arg0 : i32, i32
  }
  func.func @transform_2(%arg0: i32) -> (i32, i32, i32) {
    %c0_i32 = arith.constant 0 : i32
    %c0_i32_0 = arith.constant 0 : i32
    %c0_i32_1 = arith.constant 0 : i32
    %c0_i32_2 = arith.constant 0 : i32
    return %c0_i32, %c0_i32_0, %c0_i32_1 : i32, i32, i32
  }
  func.func @transform_3(%arg0: i32) -> (i32, i32) {
    %c0_i32 = arith.constant 0 : i32
    %c0_i32_0 = arith.constant 0 : i32
    %c0_i32_1 = arith.constant 0 : i32
    return %c0_i32, %c0_i32_0 : i32, i32
  }
  func.func @transform_4(%arg0: i32) -> (i32, i32) {
    %c0_i32 = arith.constant 0 : i32
    %c0_i32_0 = arith.constant 0 : i32
    return %c0_i32, %arg0 : i32, i32
  }
}

</mosaic_0001>

<bundles_post_ra>
// kernel: tile.13
= control target key start
LH: loop header
LB: loop body
LE: loop exit
PB: predicated region body
PF: predicated region fallthrough
CT: control target
= control target key end

     0   :  { %s22_s0 = inlined_call_operand.vmem [shape: f32[4], index: 0, kind: input, shape index: {}]   ;;  %s23_s1 = inlined_call_operand.vmem [shape: f32[4,4], index: 1, kind: output, shape index: {}]  }
   0x1   :  { %v4_v0 = vld [vmem:[%s22_s0] ss:$0 sm:$0xff] }
   0x2   :  { %5 = vst [vmem:[%s23_s1] sm:$0xf] %v4_v0 }

// kernel: tile.18
= control target key start
LH: loop header
LB: loop body
LE: loop exit
PB: predicated region body
PF: predicated region fallthrough
CT: control target
= control target key end

     0   :  { %s22_s0 = inlined_call_operand.vmem [shape: f32[2], index: 0, kind: input, shape index: {}]   ;;  %s23_s1 = inlined_call_operand.vmem [shape: f32[4,2], index: 1, kind: output, shape index: {}]  }
   0x1   :  { %v4_v0 = vld [vmem:[%s22_s0] ss:$0 sm:$0xff] }
   0x2   :  { %5 = vst [vmem:[%s23_s1] sm:$0xf] %v4_v0 }

// kernel: decoder_forward.5
= control target key start
LH: loop header
LB: loop body
LE: loop exit
PB: predicated region body
PF: predicated region fallthrough
CT: control target
= control target key end

     0   :  { %vm35_vm0 = vcmask 1043456   ;;  %v141_v0 = vmov 0.0   ;;  %vm142_vm1 = vmmov 0   ;;  %vm31_vm2 = vcmask 64512   ;;  %s179_s1 = inlined_call_operand.vmem [shape: bf16[8,128], index: 1, kind: input, shape index: {}]   ;;  %s180_s0 = inlined_call_operand.vmem [shape: bf16[16,8], index: 0, kind: input, shape index: {}]   ;;  %s181_s2 = inlined_call_operand.vmem [shape: f32[16,1], index: 2, kind: input, shape index: {}]   ;;  %s182_s3 = inlined_call_operand.vmem [shape: bf16[16,128], index: 3, kind: output, shape index: {}]  }
   0x1   :  { %130 = vmatprep.subr.bf16.mxu0 %v141_v0  ;;  %v25_v1 = vld [vmem:[%s179_s1] sm:$0xf]  ;;  %132 = vmatprep.mubr.msk.bf16.mxu0 %vm142_vm1, %v141_v0  ;;  %v143_v5 = vmov 0   ;;  %v90_v6 = vld [vmem:[%s181_s2 + $0x8] sm:$0xff] }
   0x2   :  { %v37_v2 = vsel %vm35_vm0, %v25_v1, 0  ;;  %v140_v3 = vld [vmem:[%s180_s0] sm:$0xff]   ;;  %139 = vset.pattern.permute.xlu0 %v143_v5 }
   0x3   :  { %v89_v4 = vld [vmem:[%s181_s2] sm:$0xff]  ;;  %131 = vmatpush3.bf16.msra.mxu0 %v37_v2 }
   0x4   :  { %93 = vperm.xlu0 %139, %v89_v4  }
   0x6   :  { %133 = vmatmul.mubr.msk.bf16.vlgmr.msra.gmra.mxu0 %vm31_vm2, %v140_v3 }
   0x8   :  { %98 = vperm.xlu0 %139, %v90_v6  }
  0x7f   :  { %v94_v7 = vpop.permute.xlu0 %93 }
  0x83   :  { %v99_v10 = vpop.permute.xlu0 %98 }
  0xc6   :  { %v73_v8 = vpop.f32.mrf.mxu0 }
  0xc7   :  { %v101_v12 = vadd.f32 %v94_v7, %v73_v8 }
  0xc8   :  { %v134_v9 = vpop.f32.mrf.mxu0 }
  0xca   :  { %v76_v11 = vpop.f32.mrf.mxu0 }
  0xcb   :  { %v102_v13 = vadd.f32 %v99_v10, %v76_v11 }
  0xcc   :  { %v135_v14 = vpop.f32.mrf.mxu0 }
  0xcd   :  { %v126_v15 = vpack.c.bf16 %v102_v13, %v101_v12 }
  0xcf   :  { %127 = vst [vmem:[%s182_s3] sm:$0xff] %v126_v15  }

// kernel: decoder_forward.7
= control target key start
LH: loop header
LB: loop body
LE: loop exit
PB: predicated region body
PF: predicated region fallthrough
CT: control target
= control target key end

     0   :  { %vm27_vm0 = vcmask 1043456   ;;  %v103_v0 = vmov 0.0   ;;  %vm104_vm1 = vmmov 0   ;;  %v105_v4 = vmov 0   ;;  %s138_s1 = inlined_call_operand.vmem [shape: bf16[8,128], index: 1, kind: input, shape index: {}]   ;;  %s139_s0 = inlined_call_operand.vmem [shape: bf16[8,8], index: 0, kind: input, shape index: {}]   ;;  %s140_s2 = inlined_call_operand.vmem [shape: f32[8,1], index: 2, kind: input, shape index: {}]   ;;  %s141_s3 = inlined_call_operand.vmem [shape: bf16[8,128], index: 3, kind: output, shape index: {}]  }
   0x1   :  { %93 = vmatprep.subr.bf16.mxu0 %v103_v0  ;;  %v22_v1 = vld [vmem:[%s138_s1] sm:$0xf]  ;;  %95 = vmatprep.mubr.msk.bf16.mxu0 %vm104_vm1, %v103_v0  ;;  %vm23_vm2 = vcmask 64512  }
   0x2   :  { %v77_v2 = vld [vmem:[%s140_s2] sm:$0xff]  ;;  %v29_v3 = vsel %vm27_vm0, %v22_v1, 0  ;;  %102 = vset.pattern.permute.xlu0 %v105_v4 }
   0x3   :  { %94 = vmatpush3.bf16.msra.mxu0 %v29_v3  ;;  %v21_v5 = vld [vmem:[%s139_s0] sm:$0xf]  ;;  %80 = vperm.xlu0 %102, %v77_v2  }
   0x6   :  { %96 = vmatmul.mubr.msk.bf16.vlgmr.msra.gmra.mxu0 %vm23_vm2, %v21_v5 }
  0x7e   :  { %v81_v6 = vpop.permute.xlu0 %80 }
  0xc6   :  { %v65_v7 = vpop.f32.mrf.mxu0 }
  0xc7   :  { %v83_v8 = vadd.f32 %v81_v6, %v65_v7 }
  0xc8   :  { %v97_v9 = vpop.f32.mrf.mxu0 }
  0xc9   :  { %v84_v10 = vpack.c.bf16 %v83_v8, %v83_v8 }
  0xca   :  { %v68_v11 = vpop.f32.mrf.mxu0 }
  0xcb   :  { %85 = vst [vmem:[%s141_s3] sm:$0xf] %v84_v10 }
  0xcc   :  { %v98_v12 = vpop.f32.mrf.mxu0 }

// kernel: decoder_forward.6
= control target key start
LH: loop header
LB: loop body
LE: loop exit
PB: predicated region body
PF: predicated region fallthrough
CT: control target
= control target key end

     0   :  { %v1832_v1 = vmov 0.0   ;;  %vm1833_vm0 = vmmov 0   ;;  %s1834_s29 = smov 8   ;;  %s1836_s30 = smov 9   ;;  %v1842_v5 = vmov 0   ;;  %v43_v7 = vlaneseq  ;;  %s2209_s0 = inlined_call_operand.vmem [shape: bf16[8,128], index: 0, kind: input, shape index: {}]   ;;  %s2210_s1 = inlined_call_operand.vmem [shape: bf16[8,128], index: 1, kind: input, shape index: {}]   ;;  %s2211_s5 = inlined_call_operand.vmem [shape: f32[8,1], index: 5, kind: input, shape index: {}]   ;;  %s2212_s2 = inlined_call_operand.vmem [shape: bf16[9,128], index: 2, kind: input, shape index: {}]   ;;  %s2213_s3 = inlined_call_operand.vmem [shape: bf16[9,8,8], index: 3, kind: input, shape index: {}]   ;;  %s2214_s4 = inlined_call_operand.vmem [shape: bf16[9,8,8], index: 4, kind: input, shape index: {}]   ;;  %s2215_s7 = inlined_call_operand.vmem [shape: f32[8,1], index: 7, kind: input, shape index: {}]   ;;  %s2216_s6 = inlined_call_operand.vmem [shape: bf16[9,8,8], index: 6, kind: input, shape index: {}]   ;;  %s2217_s8 = inlined_call_operand.vmem [shape: bf16[8,128], index: 8, kind: output, shape index: {}]  }
   0x1   :  { %v1891_v0 = vld [vmem:[%s2209_s0] sm:$0xf]  ;;  %1656 = vmatprep.subr.bf16.mxu0 %v1832_v1  ;;  %1658 = vmatprep.mubr.msk.bf16.mxu0 %vm1833_vm0, %v1832_v1  ;;  %s1835_s0 = smov 7   ;;  %s1837_s9 = smov 1   ;;  %vm67_vm1 = vcmask 1043456   ;;  %vm51_vm2 = vcmask 64512  }
   0x2   :  { %v1549_v2 = vcombine.low %v1891_v0, %v1891_v0  ;;  %1662 = vmatprep.subr.bf16.mxu1 %v1832_v1  ;;  %1664 = vmatprep.mubr.msk.bf16.mxu1 %vm1833_vm0, %v1832_v1  ;;  %s1838_s10 = smov 127   ;;  %s1839_s11 = smov 121   ;;  %v1910_v3 = vld [vmem:[%s2210_s1] sm:$0xf]  ;;  %v44_v9 = vshrl.u32 %v43_v7, 7 }
   0x3   :  { %s1840_s14 = smov 120   ;;  %s1841_s15 = smov 119   ;;  %v1567_v4 = vcombine.low %v1910_v3, %v1910_v3  ;;  %1829 = vset.pattern.permute.xlu0 %v1842_v5  ;;  %v1046_v6 = vld [vmem:[%s2211_s5] sm:$0xff]  ;;  %v1553_v39 = vld [vmem:[%s2213_s3 + $0x8] sm:$0xf] }
   0x4   :  { %49 = vrot.lane.b32.xlu0 %v1549_v2, %s1834_s29  ;;  %157 = vrot.lane.b32.xlu1 %v1549_v2, %s1835_s0  ;;  %v30_v8 = vld [vmem:[%s2212_s2] sm:$0xf]  ;;  %v1930_v11 = vsub.s32 0, %v44_v9  ;;  %v163_v13 = vsub.s32 1, %v44_v9  ;;  %v275_v19 = vsub.s32 2, %v44_v9  ;;  %v391_v37 = vsub.s32 3, %v44_v9 }
   0x5   :  { %v54_v10 = vshrl.u32 %v30_v8, 16  ;;  %v41_v14 = vpack.i.b16 %v30_v8, %v30_v8  ;;  %v1550_v26 = vld [vmem:[%s2213_s3 + $0x4] sm:$0xf]  ;;  %v48_v33 = vld [vmem:[%s2213_s3] sm:$0xf] }
   0x6   :  { %v31_v44 = vld [vmem:[%s2212_s2 + $0x4] sm:$0x1]  ;;  %v1555_v45 = vld [vmem:[%s2213_s3 + $0xc] sm:$0xf]  ;;  %v1557_v51 = vld [vmem:[%s2213_s3 + $0x10] sm:$0xf] }
   0x7   :  { %v55_v12 = vpack.i.b16 %v54_v10, %v54_v10  ;;  %v1935_v16 = vrot.slane %v41_v14, %v163_v13  ;;  %v1939_v21 = vrot.slane %v41_v14, %v1930_v11  ;;  %v1952_v31 = vrot.slane %v41_v14, %v275_v19  ;;  %v1559_v56 = vld [vmem:[%s2213_s3 + $0x14] sm:$0xf]  ;;  %v1561_v60 = vld [vmem:[%s2213_s3 + $0x18] sm:$0xf]  ;;  %v1568_v10 = vld [vmem:[%s2214_s4 + $0x4] sm:$0xf] }
   0x8   :  { %36 = vrot.lane.b32.xlu0 %v1549_v2, %s1836_s30  ;;  %215 = vrot.lane.b32.xlu1 %v1549_v2, %s1837_s9  ;;  %v1977_v42 = vrot.slane %v41_v14, %v391_v37  ;;  %v506_v49 = vpack.i.b16 %v31_v44, %v31_v44 }
   0x9   :  { %v1933_v15 = vrot.slane %v55_v12, %v1930_v11  ;;  %v1942_v23 = vrot.slane %v55_v12, %v163_v13  ;;  %v277_v35 = vmul.bf16 %v1952_v31, %v1891_v0  ;;  %v1965_v36 = vrot.slane %v55_v12, %v275_v19  ;;  %v1563_v0 = vld [vmem:[%s2213_s3 + $0x1c] sm:$0xf]  ;;  %v571_v13 = vld [vmem:[%s2214_s4] sm:$0xf]  ;;  %v1571_v19 = vld [vmem:[%s2214_s4 + $0x8] sm:$0xf] }
   0xa   :  { %v1991_v48 = vrot.slane %v55_v12, %v391_v37  ;;  %v2003_v54 = vrot.slane %v506_v49, %v1930_v11  ;;  %v1579_v37 = vld [vmem:[%s2214_s4 + $0x18] sm:$0xf] }
   0xb   :  { %v284_v40 = vsel %vm67_vm1, %v277_v35, 0 }
   0xc   :  { %327 = vrot.lane.b32.xlu0 %v1549_v2, %s1838_s10  ;;  %385 = vrot.lane.b32.xlu1 %v1549_v2, %s1839_s11 }
  0x10   :  { %443 = vrot.lane.b32.xlu0 %v1549_v2, %s1840_s14  ;;  %501 = vrot.lane.b32.xlu1 %v1549_v2, %s1841_s15 }
  0x14   :  { %572 = vrot.lane.b32.xlu0 %v1567_v4, %s1834_s29  ;;  %566 = vrot.lane.b32.xlu1 %v1567_v4, %s1836_s30 }
  0x18   :  { %671 = vrot.lane.b32.xlu0 %v1567_v4, %s1835_s0  ;;  %725 = vrot.lane.b32.xlu1 %v1567_v4, %s1837_s9 }
  0x1c   :  { %829 = vrot.lane.b32.xlu0 %v1567_v4, %s1838_s10  ;;  %883 = vrot.lane.b32.xlu1 %v1567_v4, %s1839_s11 }
  0x20   :  { %937 = vrot.lane.b32.xlu0 %v1567_v4, %s1840_s14  ;;  %991 = vrot.lane.b32.xlu1 %v1567_v4, %s1841_s15 }
  0x24   :  { %1049 = vperm.xlu0 %1829, %v1046_v6   ;;  %v1565_v6 = vld [vmem:[%s2213_s3 + $0x20] sm:$0xf] }
  0x76   :  { %v50_v17 = vpop.permute.xlu0 %49  ;;  %v158_v18 = vpop.permute.xlu1 %157 }
  0x77   :  { %v61_v20 = vmul.bf16 %v1933_v15, %v50_v17  ;;  %v165_v22 = vmul.bf16 %v1935_v16, %v158_v18  ;;  %v779_v17 = vmul.bf16 %v1910_v3, %v1952_v31  ;;  %v1573_v3 = vld [vmem:[%s2214_s4 + $0xc] sm:$0xf] }
  0x79   :  { %v69_v24 = vsel %vm67_vm1, %v61_v20, 0  ;;  %v172_v29 = vsel %vm67_vm1, %v165_v22, 0  ;;  %v786_v20 = vsel %vm67_vm1, %v779_v17, 0 }
  0x7a   :  { %1657 = vmatpush3.bf16.msra.mxu0 %v69_v24  ;;  %v37_v25 = vpop.permute.xlu0 %36  ;;  %v216_v27 = vpop.permute.xlu1 %215 }
  0x7b   :  { %v47_v28 = vmul.bf16 %v1939_v21, %v37_v25  ;;  %1668 = vmatprep.subr.bf16.mxu0 %v1832_v1  ;;  %v223_v30 = vmul.bf16 %v1942_v23, %v216_v27 }
  0x7d   :  { %1659 = vmatmul.mubr.msk.bf16.vlgmr.msra.gmra.mxu0 %vm51_vm2, %v1550_v26  ;;  %v115_v32 = vsel %vm67_vm1, %v47_v28, 0  ;;  %v230_v34 = vsel %vm67_vm1, %v223_v30, 0  ;;  %v1575_v28 = vld [vmem:[%s2214_s4 + $0x10] sm:$0xf] }
  0x7e   :  { %1663 = vmatpush3.bf16.msra.mxu1 %v115_v32  ;;  %1669 = vmatpush3.bf16.msra.mxu0 %v172_v29  ;;  %v328_v38 = vpop.permute.xlu0 %327  ;;  %v386_v43 = vpop.permute.xlu1 %385 }
  0x7f   :  { %1670 = vmatprep.mubr.msk.bf16.mxu0 %vm1833_vm0, %v1832_v1  ;;  %1674 = vmatprep.subr.bf16.mxu1 %v1832_v1  ;;  %v335_v41 = vmul.bf16 %v1965_v36, %v328_v38  ;;  %v393_v47 = vmul.bf16 %v1977_v42, %v386_v43 }
  0x80   :  { %1680 = vmatprep.subr.bf16.mxu0 %v1832_v1 }
  0x81   :  { %1665 = vmatmul.mubr.msk.bf16.vlgmr.msra.gmra.mxu1 %vm51_vm2, %v48_v33  ;;  %v342_v46 = vsel %vm67_vm1, %v335_v41, 0  ;;  %v400_v52 = vsel %vm67_vm1, %v393_v47, 0  ;;  %v1577_v33 = vld [vmem:[%s2214_s4 + $0x14] sm:$0xf] }
  0x82   :  { %1675 = vmatpush3.bf16.msra.mxu1 %v230_v34  ;;  %1676 = vmatprep.mubr.msk.bf16.mxu1 %vm1833_vm0, %v1832_v1  ;;  %v444_v50 = vpop.permute.xlu0 %443  ;;  %v502_v55 = vpop.permute.xlu1 %501 }
  0x83   :  { %1686 = vmatprep.subr.bf16.mxu1 %v1832_v1  ;;  %v451_v53 = vmul.bf16 %v1991_v48, %v444_v50  ;;  %v512_v58 = vmul.bf16 %v2003_v54, %v502_v55 }
  0x85   :  { %1671 = vmatmul.mubr.msk.bf16.vlgmr.msra.gmra.mxu0 %vm51_vm2, %v1553_v39  ;;  %v458_v57 = vsel %vm67_vm1, %v451_v53, 0  ;;  %v519_v61 = vsel %vm67_vm1, %v512_v58, 0  ;;  %v1581_v39 = vld [vmem:[%s2214_s4 + $0x1c] sm:$0xf] }
  0x86   :  { %1681 = vmatpush3.bf16.msra.mxu0 %v284_v40  ;;  %1682 = vmatprep.mubr.msk.bf16.mxu0 %vm1833_vm0, %v1832_v1  ;;  %v573_v59 = vpop.permute.xlu0 %572  ;;  %v567_v63 = vpop.permute.xlu1 %566  ;;  %v1583_v40 = vld [vmem:[%s2214_s4 + $0x20] sm:$0xf] }
  0x87   :  { %1692 = vmatprep.subr.bf16.mxu0 %v1832_v1  ;;  %v576_v62 = vmul.bf16 %v573_v59, %v1933_v15  ;;  %v570_v4 = vmul.bf16 %v567_v63, %v1939_v21 }
  0x89   :  { %1677 = vmatmul.mubr.msk.bf16.vlgmr.msra.gmra.mxu1 %vm51_vm2, %v1555_v45  ;;  %v583_v2 = vsel %vm67_vm1, %v576_v62, 0  ;;  %v629_v7 = vsel %vm67_vm1, %v570_v4, 0 }
  0x8a   :  { %1687 = vmatpush3.bf16.msra.mxu1 %v342_v46  ;;  %1688 = vmatprep.mubr.msk.bf16.mxu1 %vm1833_vm0, %v1832_v1  ;;  %v672_v5 = vpop.permute.xlu0 %671  ;;  %v726_v9 = vpop.permute.xlu1 %725 }
  0x8b   :  { %1698 = vmatprep.subr.bf16.mxu1 %v1832_v1  ;;  %v675_v8 = vmul.bf16 %v672_v5, %v1935_v16  ;;  %v729_v12 = vmul.bf16 %v726_v9, %v1942_v23 }
  0x8d   :  { %1683 = vmatmul.mubr.msk.bf16.vlgmr.msra.gmra.mxu0 %vm51_vm2, %v1557_v51  ;;  %v682_v11 = vsel %vm67_vm1, %v675_v8, 0  ;;  %v736_v14 = vsel %vm67_vm1, %v729_v12, 0 }
  0x8e   :  { %1693 = vmatpush3.bf16.msra.mxu0 %v400_v52  ;;  %1694 = vmatprep.mubr.msk.bf16.mxu0 %vm1833_vm0, %v1832_v1  ;;  %v830_v18 = vpop.permute.xlu0 %829  ;;  %v884_v24 = vpop.permute.xlu1 %883 }
  0x8f   :  { %1704 = vmatprep.subr.bf16.mxu0 %v1832_v1  ;;  %v833_v22 = vmul.bf16 %v830_v18, %v1965_v36  ;;  %v887_v26 = vmul.bf16 %v884_v24, %v1977_v42 }
  0x91   :  { %1689 = vmatmul.mubr.msk.bf16.vlgmr.msra.gmra.mxu1 %vm51_vm2, %v1559_v56  ;;  %v840_v25 = vsel %vm67_vm1, %v833_v22, 0  ;;  %v894_v29 = vsel %vm67_vm1, %v887_v26, 0 }
  0x92   :  { %1699 = vmatpush3.bf16.msra.mxu1 %v458_v57  ;;  %1700 = vmatprep.mubr.msk.bf16.mxu1 %vm1833_vm0, %v1832_v1  ;;  %v938_v27 = vpop.permute.xlu0 %937  ;;  %v992_v32 = vpop.permute.xlu1 %991 }
  0x93   :  { %1710 = vmatprep.subr.bf16.mxu1 %v1832_v1  ;;  %v941_v30 = vmul.bf16 %v938_v27, %v1991_v48  ;;  %v995_v35 = vmul.bf16 %v992_v32, %v2003_v54 }
  0x95   :  { %1695 = vmatmul.mubr.msk.bf16.vlgmr.msra.gmra.mxu0 %vm51_vm2, %v1561_v60  ;;  %v948_v34 = vsel %vm67_vm1, %v941_v30, 0  ;;  %v1002_v38 = vsel %vm67_vm1, %v995_v35, 0 }
  0x96   :  { %1705 = vmatpush3.bf16.msra.mxu0 %v519_v61  ;;  %1706 = vmatprep.mubr.msk.bf16.mxu0 %vm1833_vm0, %v1832_v1 }
  0x97   :  { %1716 = vmatprep.subr.bf16.mxu0 %v1832_v1 }
  0x99   :  { %1701 = vmatmul.mubr.msk.bf16.vlgmr.msra.gmra.mxu1 %vm51_vm2, %v1563_v0 }
  0x9a   :  { %1711 = vmatpush3.bf16.msra.mxu1 %v583_v2  ;;  %1712 = vmatprep.mubr.msk.bf16.mxu1 %vm1833_vm0, %v1832_v1 }
  0x9b   :  { %1722 = vmatprep.subr.bf16.mxu1 %v1832_v1 }
  0x9d   :  { %1707 = vmatmul.mubr.msk.bf16.vlgmr.msra.gmra.mxu0 %vm51_vm2, %v1565_v6 }
  0x9e   :  { %1717 = vmatpush3.bf16.msra.mxu0 %v629_v7  ;;  %1718 = vmatprep.mubr.msk.bf16.mxu0 %vm1833_vm0, %v1832_v1 }
  0x9f   :  { %1728 = vmatprep.subr.bf16.mxu0 %v1832_v1 }
  0xa1   :  { %1713 = vmatmul.mubr.msk.bf16.vlgmr.msra.gmra.mxu1 %vm51_vm2, %v1568_v10 }
  0xa2   :  { %1723 = vmatpush3.bf16.msra.mxu1 %v682_v11  ;;  %1724 = vmatprep.mubr.msk.bf16.mxu1 %vm1833_vm0, %v1832_v1 }
  0xa3   :  { %1734 = vmatprep.subr.bf16.mxu1 %v1832_v1 }
  0xa5   :  { %1719 = vmatmul.mubr.msk.bf16.vlgmr.msra.gmra.mxu0 %vm51_vm2, %v571_v13 }
  0xa6   :  { %1729 = vmatpush3.bf16.msra.mxu0 %v736_v14  ;;  %1730 = vmatprep.mubr.msk.bf16.mxu0 %vm1833_vm0, %v1832_v1 }
  0xa7   :  { %1740 = vmatprep.subr.bf16.mxu0 %v1832_v1 }
  0xa9   :  { %1725 = vmatmul.mubr.msk.bf16.vlgmr.msra.gmra.mxu1 %vm51_vm2, %v1571_v19 }
  0xaa   :  { %1735 = vmatpush3.bf16.msra.mxu1 %v786_v20  ;;  %1736 = vmatprep.mubr.msk.bf16.mxu1 %vm1833_vm0, %v1832_v1 }
  0xab   :  { %1746 = vmatprep.subr.bf16.mxu1 %v1832_v1 }
  0xad   :  { %1731 = vmatmul.mubr.msk.bf16.vlgmr.msra.gmra.mxu0 %vm51_vm2, %v1573_v3 }
  0xae   :  { %1741 = vmatpush3.bf16.msra.mxu0 %v840_v25  ;;  %1742 = vmatprep.mubr.msk.bf16.mxu0 %vm1833_vm0, %v1832_v1 }
  0xaf   :  { %1752 = vmatprep.subr.bf16.mxu0 %v1832_v1 }
  0xb1   :  { %1737 = vmatmul.mubr.msk.bf16.vlgmr.msra.gmra.mxu1 %vm51_vm2, %v1575_v28 }
  0xb2   :  { %1747 = vmatpush3.bf16.msra.mxu1 %v894_v29  ;;  %1748 = vmatprep.mubr.msk.bf16.mxu1 %vm1833_vm0, %v1832_v1 }
  0xb3   :  { %1758 = vmatprep.subr.bf16.mxu1 %v1832_v1 }
  0xb5   :  { %1743 = vmatmul.mubr.msk.bf16.vlgmr.msra.gmra.mxu0 %vm51_vm2, %v1577_v33 }
  0xb6   :  { %1753 = vmatpush3.bf16.msra.mxu0 %v948_v34  ;;  %1754 = vmatprep.mubr.msk.bf16.mxu0 %vm1833_vm0, %v1832_v1 }
  0xb7   :  { %1764 = vmatprep.subr.bf16.mxu0 %v1832_v1 }
  0xb9   :  { %1749 = vmatmul.mubr.msk.bf16.vlgmr.msra.gmra.mxu1 %vm51_vm2, %v1579_v37 }
  0xba   :  { %1759 = vmatpush3.bf16.msra.mxu1 %v1002_v38  ;;  %1760 = vmatprep.mubr.msk.bf16.mxu1 %vm1833_vm0, %v1832_v1 }
  0xbb   :  { %1770 = vmatprep.subr.bf16.mxu1 %v1832_v1 }
  0xbd   :  { %1755 = vmatmul.mubr.msk.bf16.vlgmr.msra.gmra.mxu0 %vm51_vm2, %v1581_v39 }
  0xbe   :  { %1766 = vmatprep.mubr.msk.bf16.mxu0 %vm1833_vm0, %v1832_v1 }
  0xc1   :  { %1761 = vmatmul.mubr.msk.bf16.vlgmr.msra.gmra.mxu1 %vm51_vm2, %v1583_v40 }
  0xc2   :  { %1772 = vmatprep.mubr.msk.bf16.mxu1 %vm1833_vm0, %v1832_v1 }
 0x13d   :  { %v105_v41 = vpop.f32.mrf.mxu0 }
 0x13f   :  { %v1660_v43 = vpop.f32.mrf.mxu0 }
 0x141   :  { %v108_v44 = vpop.f32.mrf.mxu0  ;;  %v151_v45 = vpop.f32.mrf.mxu1 }
 0x142   :  { %v152_v43 = vadd.f32 %v151_v45, %v105_v41 }
 0x143   :  { %v1661_v46 = vpop.f32.mrf.mxu0  ;;  %v1666_v47 = vpop.f32.mrf.mxu1 }
 0x145   :  { %v154_v49 = vpop.f32.mrf.mxu1  ;;  %v208_v50 = vpop.f32.mrf.mxu0 }
 0x146   :  { %v214_v49 = vadd.f32 %v208_v50, %v152_v43 }
 0x147   :  { %v1667_v51 = vpop.f32.mrf.mxu1  ;;  %v1672_v52 = vpop.f32.mrf.mxu0 }
 0x149   :  { %v211_v53 = vpop.f32.mrf.mxu0  ;;  %v266_v55 = vpop.f32.mrf.mxu1 }
 0x14b   :  { %v1673_v56 = vpop.f32.mrf.mxu0  ;;  %v1678_v57 = vpop.f32.mrf.mxu1 }
 0x14c   :  { %v272_v56 = vadd.f32 %v266_v55, %v214_v49  ;;  %v1592_v49 = vld [vmem:[%s2216_s6 + $0x10] sm:$0xf] }
 0x14d   :  { %v269_v58 = vpop.f32.mrf.mxu1  ;;  %v320_v59 = vpop.f32.mrf.mxu0 }
 0x14f   :  { %v1679_v60 = vpop.f32.mrf.mxu1  ;;  %v1684_v61 = vpop.f32.mrf.mxu0 }
 0x150   :  { %v326_v61 = vadd.f32 %v320_v59, %v272_v56 }
 0x151   :  { %v323_v62 = vpop.f32.mrf.mxu0  ;;  %v378_v63 = vpop.f32.mrf.mxu1 }
 0x153   :  { %v1685_v0 = vpop.f32.mrf.mxu0  ;;  %v1690_v2 = vpop.f32.mrf.mxu1 }
 0x155   :  { %v381_v4 = vpop.f32.mrf.mxu1  ;;  %v436_v5 = vpop.f32.mrf.mxu0 }
 0x156   :  { %v384_v4 = vadd.f32 %v378_v63, %v326_v61 }
 0x157   :  { %v1691_v6 = vpop.f32.mrf.mxu1  ;;  %v1696_v7 = vpop.f32.mrf.mxu0 }
 0x158   :  { %v442_v41 = vadd.f32 %v436_v5, %v384_v4  ;;  %v1535_v5 = vld [vmem:[%s2215_s7] sm:$0xff] }
 0x159   :  { %v439_v8 = vpop.f32.mrf.mxu0  ;;  %v494_v9 = vpop.f32.mrf.mxu1 }
 0x15a   :  { %v500_v50 = vadd.f32 %v494_v9, %v442_v41 }
 0x15b   :  { %v1697_v10 = vpop.f32.mrf.mxu0  ;;  %v1702_v11 = vpop.f32.mrf.mxu1 }
 0x15d   :  { %v497_v12 = vpop.f32.mrf.mxu1  ;;  %v555_v13 = vpop.f32.mrf.mxu0 }
 0x15e   :  { %v561_v55 = vadd.f32 %v555_v13, %v500_v50 }
 0x15f   :  { %v1703_v14 = vpop.f32.mrf.mxu1  ;;  %v1708_v17 = vpop.f32.mrf.mxu0 }
 0x161   :  { %v558_v18 = vpop.f32.mrf.mxu0  ;;  %v619_v19 = vpop.f32.mrf.mxu1 }
 0x163   :  { %v1709_v20 = vpop.f32.mrf.mxu0  ;;  %v1714_v22 = vpop.f32.mrf.mxu1 }
 0x165   :  { %v622_v24 = vpop.f32.mrf.mxu1  ;;  %v665_v3 = vpop.f32.mrf.mxu0 }
 0x166   :  { %v666_v44 = vadd.f32 %v665_v3, %v619_v19  ;;  %v1050_v19 = vpop.permute.xlu0 %1049 }
 0x167   :  { %v1715_v25 = vpop.f32.mrf.mxu1  ;;  %v1720_v26 = vpop.f32.mrf.mxu0 }
 0x169   :  { %v668_v27 = vpop.f32.mrf.mxu0  ;;  %v718_v28 = vpop.f32.mrf.mxu1 }
 0x16a   :  { %v724_v51 = vadd.f32 %v718_v28, %v666_v44 }
 0x16b   :  { %v1721_v29 = vpop.f32.mrf.mxu0  ;;  %v1726_v30 = vpop.f32.mrf.mxu1 }
 0x16d   :  { %v721_v32 = vpop.f32.mrf.mxu1  ;;  %v772_v33 = vpop.f32.mrf.mxu0 }
 0x16e   :  { %v778_v57 = vadd.f32 %v772_v33, %v724_v51  ;;  %v1585_v32 = vld [vmem:[%s2216_s6 + $0x4] sm:$0xf] }
 0x16f   :  { %v1727_v34 = vpop.f32.mrf.mxu1  ;;  %v1732_v35 = vpop.f32.mrf.mxu0 }
 0x171   :  { %v775_v37 = vpop.f32.mrf.mxu0  ;;  %v822_v38 = vpop.f32.mrf.mxu1 }
 0x172   :  { %v828_v62 = vadd.f32 %v822_v38, %v778_v57 }
 0x173   :  { %v1733_v39 = vpop.f32.mrf.mxu0  ;;  %v1738_v40 = vpop.f32.mrf.mxu1 }
 0x174   :  { %v1588_v40 = vld [vmem:[%s2216_s6 + $0x8] sm:$0xf] }
 0x175   :  { %v825_v46 = vpop.f32.mrf.mxu1  ;;  %v876_v47 = vpop.f32.mrf.mxu0 }
 0x176   :  { %v882_v6 = vadd.f32 %v876_v47, %v828_v62 }
 0x177   :  { %v1739_v52 = vpop.f32.mrf.mxu1  ;;  %v1744_v53 = vpop.f32.mrf.mxu0 }
 0x178   :  { %v1594_v53 = vld [vmem:[%s2216_s6 + $0x14] sm:$0xf] }
 0x179   :  { %v879_v58 = vpop.f32.mrf.mxu0  ;;  %v930_v60 = vpop.f32.mrf.mxu1 }
 0x17a   :  { %v936_v45 = vadd.f32 %v930_v60, %v882_v6  ;;  %v1598_v60 = vld [vmem:[%s2216_s6 + $0x1c] sm:$0xf] }
 0x17b   :  { %v1745_v0 = vpop.f32.mrf.mxu0  ;;  %v1750_v2 = vpop.f32.mrf.mxu1 }
 0x17d   :  { %v933_v7 = vpop.f32.mrf.mxu1  ;;  %v984_v8 = vpop.f32.mrf.mxu0 }
 0x17e   :  { %v990_v12 = vadd.f32 %v984_v8, %v936_v45 }
 0x17f   :  { %v1751_v10 = vpop.f32.mrf.mxu1  ;;  %v1756_v11 = vpop.f32.mrf.mxu0 }
 0x181   :  { %v987_v14 = vpop.f32.mrf.mxu0  ;;  %v1038_v17 = vpop.f32.mrf.mxu1 }
 0x182   :  { %v1044_v18 = vadd.f32 %v1038_v17, %v990_v12 }
 0x183   :  { %v1757_v20 = vpop.f32.mrf.mxu0  ;;  %v1762_v59 = vpop.f32.mrf.mxu1 }
 0x184   :  { %v1045_v22 = vadd.f32 %v1044_v18, %v561_v55 }
 0x185   :  { %v1041_v24 = vpop.f32.mrf.mxu1 }
 0x186   :  { %v1052_v3 = vadd.f32 %v1050_v19, %v1045_v22 }
 0x187   :  { %v1763_v63 = vpop.f32.mrf.mxu1 }
 0x188   :  { %v1053_v25 = vmax.f32 %v1052_v3, 0.0 }
 0x18a   :  { %v1054_v26 = vpack.c.bf16 %v1053_v25, %v1053_v25 }
 0x18c   :  { %1161 = vrot.lane.b32.xlu0 %v1054_v26, %s1835_s0  ;;  %1062 = vrot.lane.b32.xlu1 %v1054_v26, %s1834_s29  ;;  %v1269_v38 = vmul.bf16 %v1054_v26, %v1952_v31  ;;  %v1590_v31 = vld [vmem:[%s2216_s6 + $0xc] sm:$0xf] }
 0x18e   :  { %v1276_v43 = vsel %vm67_vm1, %v1269_v38, 0 }
 0x190   :  { %1319 = vrot.lane.b32.xlu0 %v1054_v26, %s1838_s10  ;;  %1056 = vrot.lane.b32.xlu1 %v1054_v26, %s1836_s30 }
 0x194   :  { %1427 = vrot.lane.b32.xlu0 %v1054_v26, %s1840_s14  ;;  %1215 = vrot.lane.b32.xlu1 %v1054_v26, %s1837_s9 }
 0x198   :  { %1538 = vperm.xlu0 %1829, %v1535_v5   ;;  %1373 = vrot.lane.b32.xlu1 %v1054_v26, %s1839_s11 }
 0x19c   :  { %1481 = vrot.lane.b32.xlu1 %v1054_v26, %s1841_s15 }
 0x1fe   :  { %v1162_v9 = vpop.permute.xlu0 %1161  ;;  %v1063_v13 = vpop.permute.xlu1 %1062 }
 0x1ff   :  { %v1066_v27 = vmul.bf16 %v1063_v13, %v1933_v15  ;;  %v1165_v28 = vmul.bf16 %v1162_v9, %v1935_v16  ;;  %v1061_v16 = vld [vmem:[%s2216_s6] sm:$0xf] }
 0x201   :  { %v1073_v29 = vsel %vm67_vm1, %v1066_v27, 0  ;;  %v1172_v34 = vsel %vm67_vm1, %v1165_v28, 0 }
 0x202   :  { %1765 = vmatpush3.bf16.msra.mxu0 %v1073_v29  ;;  %v1057_v30 = vpop.permute.xlu1 %1056  ;;  %v1320_v39 = vpop.permute.xlu0 %1319 }
 0x203   :  { %v1060_v33 = vmul.bf16 %v1057_v30, %v1939_v21  ;;  %1776 = vmatprep.subr.bf16.mxu0 %v1832_v1 }
 0x205   :  { %v1119_v35 = vsel %vm67_vm1, %v1060_v33, 0  ;;  %1767 = vmatmul.mubr.msk.bf16.vlgmr.msra.gmra.mxu0 %vm51_vm2, %v1585_v32 }
 0x206   :  { %1771 = vmatpush3.bf16.msra.mxu1 %v1119_v35  ;;  %1777 = vmatpush3.bf16.msra.mxu0 %v1172_v34  ;;  %v1216_v15 = vpop.permute.xlu1 %1215 }
 0x207   :  { %v1219_v37 = vmul.bf16 %v1216_v15, %v1942_v23  ;;  %1782 = vmatprep.subr.bf16.mxu1 %v1832_v1  ;;  %1778 = vmatprep.mubr.msk.bf16.mxu0 %vm1833_vm0, %v1832_v1  ;;  %v1323_v23 = vmul.bf16 %v1320_v39, %v1965_v36  ;;  %v1428_v36 = vpop.permute.xlu0 %1427 }
 0x208   :  { %1788 = vmatprep.subr.bf16.mxu0 %v1832_v1  ;;  %v1431_v51 = vmul.bf16 %v1428_v36, %v1991_v48  ;;  %v1596_v48 = vld [vmem:[%s2216_s6 + $0x18] sm:$0xf] }
 0x209   :  { %v1226_v21 = vsel %vm67_vm1, %v1219_v37, 0  ;;  %1773 = vmatmul.mubr.msk.bf16.vlgmr.msra.gmra.mxu1 %vm51_vm2, %v1061_v16  ;;  %v1330_v46 = vsel %vm67_vm1, %v1323_v23, 0 }
 0x20a   :  { %1783 = vmatpush3.bf16.msra.mxu1 %v1226_v21  ;;  %1784 = vmatprep.mubr.msk.bf16.mxu1 %vm1833_vm0, %v1832_v1  ;;  %v1374_v44 = vpop.permute.xlu1 %1373  ;;  %v1438_v56 = vsel %vm67_vm1, %v1431_v51, 0 }
 0x20b   :  { %1794 = vmatprep.subr.bf16.mxu1 %v1832_v1  ;;  %v1377_v47 = vmul.bf16 %v1374_v44, %v1977_v42 }
 0x20d   :  { %1779 = vmatmul.mubr.msk.bf16.vlgmr.msra.gmra.mxu0 %vm51_vm2, %v1588_v40  ;;  %v1384_v52 = vsel %vm67_vm1, %v1377_v47, 0 }
 0x20e   :  { %1789 = vmatpush3.bf16.msra.mxu0 %v1276_v43  ;;  %1790 = vmatprep.mubr.msk.bf16.mxu0 %vm1833_vm0, %v1832_v1  ;;  %v1482_v42 = vpop.permute.xlu1 %1481 }
 0x20f   :  { %1800 = vmatprep.subr.bf16.mxu0 %v1832_v1  ;;  %v1485_v57 = vmul.bf16 %v1482_v42, %v2003_v54  ;;  %v1600_v54 = vld [vmem:[%s2216_s6 + $0x20] sm:$0xf] }
 0x211   :  { %1785 = vmatmul.mubr.msk.bf16.vlgmr.msra.gmra.mxu1 %vm51_vm2, %v1590_v31  ;;  %v1492_v58 = vsel %vm67_vm1, %v1485_v57, 0 }
 0x212   :  { %1795 = vmatpush3.bf16.msra.mxu1 %v1330_v46  ;;  %1796 = vmatprep.mubr.msk.bf16.mxu1 %vm1833_vm0, %v1832_v1 }
 0x213   :  { %1806 = vmatprep.subr.bf16.mxu1 %v1832_v1  ;;  %v1539_v15 = vpop.permute.xlu0 %1538 }
 0x215   :  { %1791 = vmatmul.mubr.msk.bf16.vlgmr.msra.gmra.mxu0 %vm51_vm2, %v1592_v49 }
 0x216   :  { %1801 = vmatpush3.bf16.msra.mxu0 %v1384_v52  ;;  %1802 = vmatprep.mubr.msk.bf16.mxu0 %vm1833_vm0, %v1832_v1 }
 0x217   :  { %1812 = vmatprep.subr.bf16.mxu0 %v1832_v1 }
 0x219   :  { %1797 = vmatmul.mubr.msk.bf16.vlgmr.msra.gmra.mxu1 %vm51_vm2, %v1594_v53 }
 0x21a   :  { %1807 = vmatpush3.bf16.msra.mxu1 %v1438_v56  ;;  %1808 = vmatprep.mubr.msk.bf16.mxu1 %vm1833_vm0, %v1832_v1 }
 0x21d   :  { %1803 = vmatmul.mubr.msk.bf16.vlgmr.msra.gmra.mxu0 %vm51_vm2, %v1596_v48 }
 0x21e   :  { %1813 = vmatpush3.bf16.msra.mxu0 %v1492_v58  ;;  %1814 = vmatprep.mubr.msk.bf16.mxu0 %vm1833_vm0, %v1832_v1 }
 0x221   :  { %1809 = vmatmul.mubr.msk.bf16.vlgmr.msra.gmra.mxu1 %vm51_vm2, %v1598_v60 }
 0x225   :  { %1815 = vmatmul.mubr.msk.bf16.vlgmr.msra.gmra.mxu0 %vm51_vm2, %v1600_v54 }
 0x2c5   :  { %v1109_v61 = vpop.f32.mrf.mxu0 }
 0x2c7   :  { %v1768_v62 = vpop.f32.mrf.mxu0 }
 0x2c9   :  { %v1112_v0 = vpop.f32.mrf.mxu0  ;;  %v1155_v2 = vpop.f32.mrf.mxu1 }
 0x2ca   :  { %v1156_v18 = vadd.f32 %v1155_v2, %v1109_v61 }
 0x2cb   :  { %v1769_v4 = vpop.f32.mrf.mxu0  ;;  %v1774_v6 = vpop.f32.mrf.mxu1 }
 0x2cd   :  { %v1158_v7 = vpop.f32.mrf.mxu1  ;;  %v1208_v8 = vpop.f32.mrf.mxu0 }
 0x2ce   :  { %v1214_v59 = vadd.f32 %v1208_v8, %v1156_v18 }
 0x2cf   :  { %v1775_v41 = vpop.f32.mrf.mxu1  ;;  %v1780_v45 = vpop.f32.mrf.mxu0 }
 0x2d1   :  { %v1211_v10 = vpop.f32.mrf.mxu0  ;;  %v1262_v1 = vpop.f32.mrf.mxu1 }
 0x2d2   :  { %v1268_v3 = vadd.f32 %v1262_v1, %v1214_v59 }
 0x2d3   :  { %v1781_v11 = vpop.f32.mrf.mxu0  ;;  %v1786_v50 = vpop.f32.mrf.mxu1 }
 0x2d5   :  { %v1265_v12 = vpop.f32.mrf.mxu1  ;;  %v1312_v14 = vpop.f32.mrf.mxu0 }
 0x2d6   :  { %v1318_v26 = vadd.f32 %v1312_v14, %v1268_v3 }
 0x2d7   :  { %v1787_v17 = vpop.f32.mrf.mxu1  ;;  %v1792_v55 = vpop.f32.mrf.mxu0 }
 0x2d9   :  { %v1315_v19 = vpop.f32.mrf.mxu0  ;;  %v1366_v20 = vpop.f32.mrf.mxu1 }
 0x2da   :  { %v1372_v13 = vadd.f32 %v1366_v20, %v1318_v26 }
 0x2db   :  { %v1793_v22 = vpop.f32.mrf.mxu0  ;;  %v1798_v24 = vpop.f32.mrf.mxu1 }
 0x2dd   :  { %v1369_v63 = vpop.f32.mrf.mxu1  ;;  %v1420_v25 = vpop.f32.mrf.mxu0 }
 0x2de   :  { %v1426_v29 = vadd.f32 %v1420_v25, %v1372_v13 }
 0x2df   :  { %v1799_v5 = vpop.f32.mrf.mxu1  ;;  %v1804_v9 = vpop.f32.mrf.mxu0 }
 0x2e1   :  { %v1423_v27 = vpop.f32.mrf.mxu0  ;;  %v1474_v28 = vpop.f32.mrf.mxu1 }
 0x2e2   :  { %v1480_v33 = vadd.f32 %v1474_v28, %v1426_v29 }
 0x2e3   :  { %v1805_v30 = vpop.f32.mrf.mxu0  ;;  %v1810_v32 = vpop.f32.mrf.mxu1 }
 0x2e5   :  { %v1528_v34 = vpop.f32.mrf.mxu0  ;;  %v1477_v35 = vpop.f32.mrf.mxu1 }
 0x2e6   :  { %v1534_v16 = vadd.f32 %v1528_v34, %v1480_v33 }
 0x2e7   :  { %v1816_v37 = vpop.f32.mrf.mxu0  ;;  %v1811_v21 = vpop.f32.mrf.mxu1 }
 0x2e8   :  { %v1541_v38 = vadd.f32 %v1539_v15, %v1534_v16 }
 0x2e9   :  { %v1531_v39 = vpop.f32.mrf.mxu0 }
 0x2ea   :  { %v1542_v40 = vmax.f32 %v1541_v38, 0.0 }
 0x2eb   :  { %v1817_v23 = vpop.f32.mrf.mxu0 }
 0x2ec   :  { %v1543_v43 = vpack.c.bf16 %v1542_v40, %v1542_v40 }
 0x2ee   :  { %1544 = vst [vmem:[%s2217_s8] sm:$0xf] %v1543_v43 }

// kernel: decoder_forward.9
= control target key start
LH: loop header
LB: loop body
LE: loop exit
PB: predicated region body
PF: predicated region fallthrough
CT: control target
= control target key end

     0   :  { %v1472_v4 = vmov 0   ;;  %s1473_s19 = smov 16   ;;  %s1475_s20 = smov 15   ;;  %v67_v10 = vlaneseq  ;;  %vm105_vm0 = vcmask 130048   ;;  %vm155_vm1 = vcmask 1043456   ;;  %s1783_s0 = inlined_call_operand.vmem [shape: bf16[8,512], index: 0, kind: input, shape index: {}]   ;;  %s1784_s3 = inlined_call_operand.vmem [shape: f32[8,1], index: 3, kind: input, shape index: {}]   ;;  %s1785_s1 = inlined_call_operand.vmem [shape: bf16[9,512], index: 1, kind: input, shape index: {}]   ;;  %s1786_s2 = inlined_call_operand.vmem [shape: bf16[9,8,8], index: 2, kind: input, shape index: {}]   ;;  %s1787_s4 = inlined_call_operand.vmem [shape: f32[8,512], index: 4, kind: output, shape index: {}]  }
   0x1   :  { %v1509_v0 = vld [vmem:[%s1783_s0 + $0x8] sm:$0xff]  ;;  %v1514_v1 = vld [vmem:[%s1783_s0] sm:$0xff]  ;;  %200 = vmatprep.mubr.bf16.mxu0 %v1472_v4  ;;  %241 = vmatprep.mubr.bf16.mxu1 %v1472_v4  ;;  %s1474_s0 = smov 17   ;;  %s1476_s21 = smov 1   ;;  %vm42_vm2 = vcmask 138240   ;;  %vm151_vm3 = vcmask 64512  }
   0x2   :  { %v1388_v2 = vcombine.high %v1509_v0, %v1509_v0  ;;  %v1390_v3 = vcombine.high %v1514_v1, %v1514_v1  ;;  %1459 = vset.pattern.permute.xlu0 %v1472_v4  ;;  %v1391_v5 = vcombine.low %v1509_v0, %v1509_v0  ;;  %v1389_v6 = vcombine.low %v1514_v1, %v1514_v1  ;;  %s1477_s22 = smov 127   ;;  %s1478_s23 = smov 113   ;;  %v1370_v7 = vld [vmem:[%s1784_s3] sm:$0xff]  ;;  %v21_v8 = vld [vmem:[%s1785_s1 + $0x8] sm:$0xff] }
   0x3   :  { %s1479_s24 = smov 112   ;;  %s1480_s25 = smov 111   ;;  %v20_v9 = vld [vmem:[%s1785_s1] sm:$0xff]  ;;  %v1395_v11 = vcombine.high %v21_v8, %v21_v8  ;;  %v1394_v14 = vcombine.low %v21_v8, %v21_v8  ;;  %v1536_v15 = vshrl.u32 %v67_v10, 7  ;;  %vm355_vm4 = vcmask 121856  }
   0x4   :  { %97 = vrot.lane.b32.xlu0 %v1388_v2, %s1473_s19  ;;  %101 = vrot.lane.b32.xlu1 %v1390_v3, %s1473_s19  ;;  %v1393_v12 = vcombine.high %v20_v9, %v20_v9  ;;  %v1392_v13 = vcombine.low %v20_v9, %v20_v9  ;;  %v1396_v51 = vld [vmem:[%s1786_s2 + $0x4] sm:$0xf]  ;;  %vm498_vm5 = vcmask 7168   ;;  %vm784_vm6 = vcmask 1039360  }
   0x5   :  { %v138_v16 = vshrl.u32 %v1395_v11, 16  ;;  %v131_v19 = vshrl.u32 %v1394_v14, 16  ;;  %v1539_v20 = vsub.s32 0, %v1536_v15  ;;  %v1559_v34 = vpack.i.b16 %v1395_v11, %v1395_v11 }
   0x6   :  { %v124_v17 = vshrl.u32 %v1393_v12, 16  ;;  %v117_v18 = vshrl.u32 %v1392_v13, 16  ;;  %v1557_v33 = vpack.i.b16 %v1392_v13, %v1392_v13  ;;  %v1561_v35 = vpack.i.b16 %v1393_v12, %v1393_v12 }
   0x7   :  { %v1541_v21 = vpack.i.b16 %v138_v16, %v138_v16  ;;  %v1547_v24 = vpack.i.b16 %v131_v19, %v131_v19  ;;  %v1563_v36 = vpack.i.b16 %v1394_v14, %v1394_v14  ;;  %v91_v52 = vrot.slane %v1559_v34, %v1539_v20  ;;  %v96_v16 = vld [vmem:[%s1786_s2] sm:$0xf] }
   0x8   :  { %103 = vrot.lane.b32.xlu1 %v1391_v5, %s1473_s19  ;;  %99 = vrot.lane.b32.xlu0 %v1389_v6, %s1473_s19  ;;  %v1543_v22 = vpack.i.b16 %v124_v17, %v124_v17  ;;  %v1545_v23 = vpack.i.b16 %v117_v18, %v117_v18  ;;  %v70_v46 = vrot.slane %v1557_v33, %v1539_v20  ;;  %v1586_v55 = vsub.s32 1, %v1536_v15 }
   0x9   :  { %v144_v27 = vrot.slane %v1541_v21, %v1539_v20  ;;  %v137_v30 = vrot.slane %v1547_v24, %v1539_v20  ;;  %v77_v53 = vrot.slane %v1561_v35, %v1539_v20  ;;  %v84_v54 = vrot.slane %v1563_v36, %v1539_v20 }
   0xa   :  { %v130_v28 = vrot.slane %v1543_v22, %v1539_v20  ;;  %v123_v29 = vrot.slane %v1545_v23, %v1539_v20  ;;  %v1589_v56 = vsub.s32 2, %v1536_v15  ;;  %v382_v17 = vrot.slane %v1559_v34, %v1586_v55 }
   0xb   :  { %v374_v18 = vrot.slane %v1561_v35, %v1586_v55  ;;  %v378_v19 = vrot.slane %v1563_v36, %v1586_v55  ;;  %vm927_vm7 = vcmask 924672   ;;  %vm1070_vm8 = vcmask 916480  }
   0xc   :  { %36 = vrot.lane.b32.xlu1 %v1389_v6, %s1474_s0  ;;  %27 = vrot.lane.b32.xlu0 %v1388_v2, %s1474_s0  ;;  %v644_v12 = vrot.slane %v1563_v36, %v1589_v56  ;;  %v648_v13 = vrot.slane %v1559_v34, %v1589_v56  ;;  %vm1213_vm9 = vcmask 908288  }
  0x10   :  { %40 = vrot.lane.b32.xlu1 %v1391_v5, %s1474_s0  ;;  %38 = vrot.lane.b32.xlu0 %v1390_v3, %s1474_s0 }
  0x14   :  { %349 = vrot.lane.b32.xlu1 %v1389_v6, %s1475_s20  ;;  %347 = vrot.lane.b32.xlu0 %v1388_v2, %s1475_s20 }
  0x18   :  { %353 = vrot.lane.b32.xlu1 %v1391_v5, %s1475_s20  ;;  %351 = vrot.lane.b32.xlu0 %v1390_v3, %s1475_s20 }
  0x1c   :  { %492 = vrot.lane.b32.xlu1 %v1389_v6, %s1476_s21  ;;  %490 = vrot.lane.b32.xlu0 %v1388_v2, %s1476_s21 }
  0x20   :  { %496 = vrot.lane.b32.xlu1 %v1391_v5, %s1476_s21  ;;  %494 = vrot.lane.b32.xlu0 %v1390_v3, %s1476_s21 }
  0x24   :  { %778 = vrot.lane.b32.xlu1 %v1390_v3, %s1477_s22  ;;  %776 = vrot.lane.b32.xlu0 %v1389_v6, %s1477_s22 }
  0x28   :  { %782 = vrot.lane.b32.xlu1 %v1388_v2, %s1477_s22  ;;  %780 = vrot.lane.b32.xlu0 %v1391_v5, %s1477_s22 }
  0x2c   :  { %921 = vrot.lane.b32.xlu1 %v1390_v3, %s1478_s23  ;;  %919 = vrot.lane.b32.xlu0 %v1389_v6, %s1478_s23 }
  0x30   :  { %925 = vrot.lane.b32.xlu1 %v1388_v2, %s1478_s23  ;;  %923 = vrot.lane.b32.xlu0 %v1391_v5, %s1478_s23 }
  0x34   :  { %1064 = vrot.lane.b32.xlu1 %v1390_v3, %s1479_s24  ;;  %1062 = vrot.lane.b32.xlu0 %v1389_v6, %s1479_s24 }
  0x38   :  { %1068 = vrot.lane.b32.xlu1 %v1388_v2, %s1479_s24  ;;  %1066 = vrot.lane.b32.xlu0 %v1391_v5, %s1479_s24 }
  0x3c   :  { %1207 = vrot.lane.b32.xlu1 %v1390_v3, %s1480_s25  ;;  %1205 = vrot.lane.b32.xlu0 %v1389_v6, %s1480_s25  ;;  %v636_v6 = vrot.slane %v1557_v33, %v1589_v56 }
  0x40   :  { %1211 = vrot.lane.b32.xlu1 %v1388_v2, %s1480_s25  ;;  %1209 = vrot.lane.b32.xlu0 %v1391_v5, %s1480_s25  ;;  %v370_v5 = vrot.slane %v1557_v33, %v1586_v55 }
  0x44   :  { %1373 = vperm.xlu0 %1459, %v1370_v7   ;;  %v640_v7 = vrot.slane %v1561_v35, %v1589_v56 }
  0x76   :  { %v98_v25 = vpop.permute.xlu0 %97  ;;  %v102_v26 = vpop.permute.xlu1 %101 }
  0x7a   :  { %v104_v31 = vpop.permute.xlu1 %103  ;;  %v100_v32 = vpop.permute.xlu0 %99 }
  0x7b   :  { %v107_v37 = vsel %vm105_vm0, %v102_v26, %v104_v31  ;;  %v108_v38 = vsel %vm105_vm0, %v104_v31, %v98_v25  ;;  %v106_v39 = vsel %vm105_vm0, %v100_v32, %v102_v26  ;;  %v115_v40 = vsel %vm105_vm0, %v98_v25, %v100_v32 }
  0x7c   :  { %v148_v41 = vmul.bf16 %v144_v27, %v108_v38  ;;  %v146_v42 = vmul.bf16 %v130_v28, %v106_v39  ;;  %v145_v43 = vmul.bf16 %v123_v29, %v115_v40  ;;  %v147_v44 = vmul.bf16 %v137_v30, %v107_v37 }
  0x7d   :  { %v1415_v25 = vcombine.low %v636_v6, %v640_v7  ;;  %v1416_v29 = vcombine.low %v644_v12, %v648_v13  ;;  %v799_v6 = vrot.slane %v1545_v23, %v1589_v56  ;;  %v807_v12 = vrot.slane %v1547_v24, %v1589_v56 }
  0x7e   :  { %1399 = vmatprep.subr.msk.bf16.mxu1 %vm155_vm1, %v148_v41  ;;  %v37_v45 = vpop.permute.xlu1 %36  ;;  %1397 = vmatprep.subr.msk.bf16.mxu0 %vm155_vm1, %v146_v42  ;;  %v28_v47 = vpop.permute.xlu0 %27  ;;  %v157_v48 = vsel %vm155_vm1, %v145_v43, 0  ;;  %v163_v49 = vsel %vm155_vm1, %v147_v44, 0  ;;  %v513_v42 = vrot.slane %v1545_v23, %v1586_v55 }
  0x7f   :  { %v52_v50 = vsel %vm42_vm2, %v28_v47, %v37_v45  ;;  %183 = vmatpush1.bf16.msra.mxu0 %v157_v48  ;;  %224 = vmatpush1.bf16.msra.mxu1 %v163_v49  ;;  %v661_v40 = vmul.bf16 %v1415_v25, %v1514_v1  ;;  %v1405_v1 = vld [vmem:[%s1786_s2 + $0x8] sm:$0xf]  ;;  %v525_v48 = vrot.slane %v1541_v21, %v1586_v55 }
  0x80   :  { %v92_v57 = vmul.bf16 %v70_v46, %v52_v50  ;;  %v662_v46 = vmul.bf16 %v1416_v29, %v1509_v0  ;;  %v517_v49 = vrot.slane %v1543_v22, %v1586_v55  ;;  %v521_v50 = vrot.slane %v1547_v24, %v1586_v55 }
  0x82   :  { %1400 = vmatmul.mubr.msk.bf16.vlgmr.msra.gmra.mxu1 %vm151_vm3, %v1396_v51  ;;  %v41_v58 = vpop.permute.xlu1 %40  ;;  %1398 = vmatmul.mubr.msk.bf16.vlgmr.msra.gmra.mxu0 %vm151_vm3, %v1396_v51  ;;  %v39_v59 = vpop.permute.xlu0 %38  ;;  %v254_v10 = vsel %vm155_vm1, %v92_v57, 0  ;;  %v1419_v51 = vcombine.high %v661_v40, %v661_v40  ;;  %v1418_v57 = vcombine.low %v661_v40, %v661_v40 }
  0x83   :  { %v45_v60 = vsel %vm42_vm2, %v41_v58, %v28_v47  ;;  %v43_v61 = vsel %vm42_vm2, %v37_v45, %v39_v59  ;;  %v44_v62 = vsel %vm42_vm2, %v39_v59, %v41_v58  ;;  %297 = vmatprep.mubr.bf16.mxu0 %v1472_v4  ;;  %338 = vmatprep.mubr.bf16.mxu1 %v1472_v4 }
  0x84   :  { %v95_v63 = vmul.bf16 %v91_v52, %v45_v60  ;;  %v93_v2 = vmul.bf16 %v77_v53, %v43_v61  ;;  %v94_v3 = vmul.bf16 %v84_v54, %v44_v62  ;;  %v1421_v54 = vcombine.high %v662_v46, %v662_v46 }
  0x85   :  { %v679_v13 = vsel %vm155_vm1, %v1418_v57, 0  ;;  %v1426_v57 = vld [vmem:[%s1786_s2 + $0x14] sm:$0xf] }
  0x86   :  { %v350_v8 = vpop.permute.xlu1 %349  ;;  %1401 = vmatprep.subr.msk.bf16.mxu0 %vm155_vm1, %v93_v2  ;;  %1403 = vmatprep.subr.msk.bf16.mxu1 %vm155_vm1, %v95_v63  ;;  %v348_v9 = vpop.permute.xlu0 %347  ;;  %v260_v11 = vsel %vm155_vm1, %v94_v3, 0  ;;  %v1420_v63 = vcombine.low %v662_v46, %v662_v46 }
  0x87   :  { %v365_v14 = vsel %vm355_vm4, %v348_v9, %v350_v8  ;;  %280 = vmatpush1.bf16.msra.mxu0 %v254_v10  ;;  %321 = vmatpush1.bf16.msra.mxu1 %v260_v11  ;;  %v811_v10 = vrot.slane %v1541_v21, %v1589_v56  ;;  %v803_v11 = vrot.slane %v1543_v22, %v1589_v56 }
  0x88   :  { %v383_v26 = vmul.bf16 %v370_v5, %v365_v14  ;;  %v685_v14 = vsel %vm155_vm1, %v1420_v63, 0 }
  0x8a   :  { %v354_v27 = vpop.permute.xlu1 %353  ;;  %1402 = vmatmul.mubr.msk.bf16.vlgmr.msra.gmra.mxu0 %vm151_vm3, %v96_v16  ;;  %1404 = vmatmul.mubr.msk.bf16.vlgmr.msra.gmra.mxu1 %vm151_vm3, %v96_v16  ;;  %v352_v28 = vpop.permute.xlu0 %351  ;;  %v393_v44 = vsel %vm155_vm1, %v383_v26, 0 }
  0x8b   :  { %v358_v30 = vsel %vm355_vm4, %v354_v27, %v348_v9  ;;  %v356_v31 = vsel %vm355_vm4, %v350_v8, %v352_v28  ;;  %v357_v32 = vsel %vm355_vm4, %v352_v28, %v354_v27  ;;  %436 = vmatprep.mubr.bf16.mxu0 %v1472_v4  ;;  %477 = vmatprep.mubr.bf16.mxu1 %v1472_v4  ;;  %v1410_v8 = vld [vmem:[%s1786_s2 + $0xc] sm:$0xf] }
  0x8c   :  { %v386_v37 = vmul.bf16 %v382_v17, %v358_v30  ;;  %v384_v38 = vmul.bf16 %v374_v18, %v356_v31  ;;  %v385_v39 = vmul.bf16 %v378_v19, %v357_v32  ;;  %v1677_v19 = vsub.s32 3, %v1536_v15  ;;  %v1417_v32 = vld [vmem:[%s1786_s2 + $0x10] sm:$0xf] }
  0x8e   :  { %v493_v41 = vpop.permute.xlu1 %492  ;;  %1406 = vmatprep.subr.msk.bf16.mxu0 %vm155_vm1, %v384_v38  ;;  %1408 = vmatprep.subr.msk.bf16.mxu1 %vm155_vm1, %v386_v37  ;;  %v491_v43 = vpop.permute.xlu0 %490  ;;  %v399_v45 = vsel %vm155_vm1, %v385_v39, 0  ;;  %v942_v15 = vrot.slane %v1557_v33, %v1677_v19  ;;  %v954_v38 = vrot.slane %v1559_v34, %v1677_v19  ;;  %v946_v40 = vrot.slane %v1561_v35, %v1677_v19  ;;  %v22_v34 = vld [vmem:[%s1785_s1 + $0x10] sm:$0x11]  ;;  %v23_v35 = vld [vmem:[%s1785_s1 + $0x18] sm:$0x11] }
  0x8f   :  { %v508_v47 = vsel %vm498_vm5, %v491_v43, %v493_v41  ;;  %419 = vmatpush1.bf16.msra.mxu0 %v393_v44  ;;  %460 = vmatpush1.bf16.msra.mxu1 %v399_v45 }
  0x90   :  { %v526_v52 = vmul.bf16 %v513_v42, %v508_v47 }
  0x92   :  { %v497_v0 = vpop.permute.xlu1 %496  ;;  %1407 = vmatmul.mubr.msk.bf16.vlgmr.msra.gmra.mxu0 %vm151_vm3, %v1405_v1  ;;  %1409 = vmatmul.mubr.msk.bf16.vlgmr.msra.gmra.mxu1 %vm151_vm3, %v1405_v1  ;;  %v495_v53 = vpop.permute.xlu0 %494  ;;  %v536_v2 = vsel %vm155_vm1, %v526_v52, 0  ;;  %v1085_v52 = vrot.slane %v1545_v23, %v1677_v19  ;;  %v1093_v23 = vrot.slane %v1547_v24, %v1677_v19 }
  0x93   :  { %v501_v58 = vsel %vm498_vm5, %v497_v0, %v491_v43  ;;  %v499_v59 = vsel %vm498_vm5, %v493_v41, %v495_v53  ;;  %v500_v60 = vsel %vm498_vm5, %v495_v53, %v497_v0  ;;  %579 = vmatprep.mubr.bf16.mxu0 %v1472_v4  ;;  %620 = vmatprep.mubr.bf16.mxu1 %v1472_v4 }
  0x94   :  { %v529_v55 = vmul.bf16 %v525_v48, %v501_v58  ;;  %v527_v61 = vmul.bf16 %v517_v49, %v499_v59  ;;  %v528_v62 = vmul.bf16 %v521_v50, %v500_v60  ;;  %v950_v41 = vrot.slane %v1563_v36, %v1677_v19 }
  0x95   :  { %v1441_v49 = vcombine.low %v22_v34, %v22_v34  ;;  %v1444_v50 = vcombine.high %v23_v35, %v23_v35  ;;  %v1442_v53 = vcombine.high %v22_v34, %v22_v34  ;;  %v1097_v59 = vrot.slane %v1541_v21, %v1677_v19 }
  0x96   :  { %1411 = vmatprep.subr.msk.bf16.mxu0 %vm155_vm1, %v527_v61  ;;  %1413 = vmatprep.subr.msk.bf16.mxu1 %vm155_vm1, %v529_v55  ;;  %v542_v3 = vsel %vm155_vm1, %v528_v62, 0  ;;  %v779_v5 = vpop.permute.xlu1 %778  ;;  %v777_v7 = vpop.permute.xlu0 %776  ;;  %v1089_v55 = vrot.slane %v1543_v22, %v1677_v19 }
  0x97   :  { %562 = vmatpush1.bf16.msra.mxu0 %v536_v2  ;;  %603 = vmatpush1.bf16.msra.mxu1 %v542_v3  ;;  %v785_v9 = vsel %vm784_vm6, %v777_v7, %v779_v5  ;;  %v1236_v62 = vpack.i.b16 %v1441_v49, %v1441_v49  ;;  %v1257_v63 = vpack.i.b16 %v1444_v50, %v1444_v50 }
  0x98   :  { %1422 = vmatprep.subr.msk.bf16.mxu0 %vm155_vm1, %v1419_v51  ;;  %1424 = vmatprep.subr.msk.bf16.mxu1 %vm155_vm1, %v1421_v54  ;;  %v812_v16 = vmul.bf16 %v799_v6, %v785_v9  ;;  %v1443_v54 = vcombine.low %v23_v35, %v23_v35  ;;  %v1243_v21 = vpack.i.b16 %v1442_v53, %v1442_v53 }
  0x9a   :  { %1412 = vmatmul.mubr.msk.bf16.vlgmr.msra.gmra.mxu0 %vm151_vm3, %v1410_v8  ;;  %1414 = vmatmul.mubr.msk.bf16.vlgmr.msra.gmra.mxu1 %vm151_vm3, %v1410_v8  ;;  %v783_v17 = vpop.permute.xlu1 %782  ;;  %v781_v18 = vpop.permute.xlu0 %780  ;;  %v822_v39 = vsel %vm155_vm1, %v812_v16, 0  ;;  %v1250_v6 = vpack.i.b16 %v1443_v54, %v1443_v54  ;;  %v1248_v19 = vrot.slane %v1243_v21, %v1539_v20 }
  0x9b   :  { %v794_v25 = vsel %vm784_vm6, %v783_v17, %v777_v7  ;;  %v786_v26 = vsel %vm784_vm6, %v779_v5, %v781_v18  ;;  %v787_v56 = vsel %vm784_vm6, %v781_v18, %v783_v17  ;;  %705 = vmatpush1.bf16.msra.mxu0 %v679_v13  ;;  %746 = vmatpush1.bf16.msra.mxu1 %v685_v14  ;;  %v1431_v14 = vld [vmem:[%s1786_s2 + $0x18] sm:$0xf] }
  0x9c   :  { %v815_v27 = vmul.bf16 %v811_v10, %v794_v25  ;;  %v813_v28 = vmul.bf16 %v803_v11, %v786_v26  ;;  %v814_v29 = vmul.bf16 %v807_v12, %v787_v56  ;;  %722 = vmatprep.mubr.bf16.mxu0 %v1472_v4  ;;  %763 = vmatprep.mubr.bf16.mxu1 %v1472_v4 }
  0x9d   :  { %v1241_v12 = vrot.slane %v1236_v62, %v1539_v20  ;;  %v1262_v17 = vrot.slane %v1257_v63, %v1539_v20  ;;  %v1255_v25 = vrot.slane %v1250_v6, %v1539_v20 }
  0x9e   :  { %v922_v30 = vpop.permute.xlu1 %921  ;;  %1427 = vmatprep.subr.msk.bf16.mxu0 %vm155_vm1, %v813_v28  ;;  %1429 = vmatprep.subr.msk.bf16.mxu1 %vm155_vm1, %v815_v27  ;;  %v920_v31 = vpop.permute.xlu0 %919  ;;  %v828_v33 = vsel %vm155_vm1, %v814_v29, 0 }
  0x9f   :  { %v928_v37 = vsel %vm927_vm7, %v920_v31, %v922_v30 }
  0xa0   :  { %v955_v42 = vmul.bf16 %v942_v15, %v928_v37  ;;  %v1436_v37 = vld [vmem:[%s1786_s2 + $0x1c] sm:$0xf] }
  0xa2   :  { %1423 = vmatmul.mubr.msk.bf16.vlgmr.msra.gmra.mxu0 %vm151_vm3, %v1417_v32  ;;  %1425 = vmatmul.mubr.msk.bf16.vlgmr.msra.gmra.mxu1 %vm151_vm3, %v1417_v32  ;;  %v926_v43 = vpop.permute.xlu1 %925  ;;  %v924_v44 = vpop.permute.xlu0 %923  ;;  %v965_v60 = vsel %vm155_vm1, %v955_v42, 0 }
  0xa3   :  { %848 = vmatpush1.bf16.msra.mxu0 %v822_v39  ;;  %v937_v36 = vsel %vm927_vm7, %v926_v43, %v920_v31  ;;  %v929_v45 = vsel %vm927_vm7, %v922_v30, %v924_v44  ;;  %v930_v46 = vsel %vm927_vm7, %v924_v44, %v926_v43  ;;  %889 = vmatpush1.bf16.msra.mxu1 %v828_v33 }
  0xa4   :  { %v958_v47 = vmul.bf16 %v954_v38, %v937_v36  ;;  %v956_v1 = vmul.bf16 %v946_v40, %v929_v45  ;;  %v957_v48 = vmul.bf16 %v950_v41, %v930_v46  ;;  %865 = vmatprep.mubr.bf16.mxu0 %v1472_v4  ;;  %906 = vmatprep.mubr.bf16.mxu1 %v1472_v4  ;;  %v1445_v40 = vld [vmem:[%s1786_s2 + $0x20] sm:$0xf] }
  0xa6   :  { %v1065_v51 = vpop.permute.xlu1 %1064  ;;  %1432 = vmatprep.subr.msk.bf16.mxu0 %vm155_vm1, %v956_v1  ;;  %1434 = vmatprep.subr.msk.bf16.mxu1 %vm155_vm1, %v958_v47  ;;  %v1063_v0 = vpop.permute.xlu0 %1062  ;;  %v971_v61 = vsel %vm155_vm1, %v957_v48, 0 }
  0xa7   :  { %v1071_v58 = vsel %vm1070_vm8, %v1063_v0, %v1065_v51 }
  0xa8   :  { %v1098_v2 = vmul.bf16 %v1085_v52, %v1071_v58 }
  0xaa   :  { %1428 = vmatmul.mubr.msk.bf16.vlgmr.msra.gmra.mxu0 %vm151_vm3, %v1426_v57  ;;  %1430 = vmatmul.mubr.msk.bf16.vlgmr.msra.gmra.mxu1 %vm151_vm3, %v1426_v57  ;;  %v1069_v3 = vpop.permute.xlu1 %1068  ;;  %v1067_v5 = vpop.permute.xlu0 %1066  ;;  %v1108_v18 = vsel %vm155_vm1, %v1098_v2, 0 }
  0xab   :  { %991 = vmatpush1.bf16.msra.mxu0 %v965_v60  ;;  %v1080_v7 = vsel %vm1070_vm8, %v1069_v3, %v1063_v0  ;;  %v1072_v22 = vsel %vm1070_vm8, %v1065_v51, %v1067_v5  ;;  %v1073_v24 = vsel %vm1070_vm8, %v1067_v5, %v1069_v3  ;;  %1032 = vmatpush1.bf16.msra.mxu1 %v971_v61 }
  0xac   :  { %v1101_v8 = vmul.bf16 %v1097_v59, %v1080_v7  ;;  %v1099_v9 = vmul.bf16 %v1089_v55, %v1072_v22  ;;  %v1100_v10 = vmul.bf16 %v1093_v23, %v1073_v24  ;;  %1008 = vmatprep.mubr.bf16.mxu0 %v1472_v4  ;;  %1049 = vmatprep.mubr.bf16.mxu1 %v1472_v4 }
  0xae   :  { %v1208_v11 = vpop.permute.xlu1 %1207  ;;  %1437 = vmatprep.subr.msk.bf16.mxu0 %vm155_vm1, %v1099_v9  ;;  %1439 = vmatprep.subr.msk.bf16.mxu1 %vm155_vm1, %v1101_v8  ;;  %v1206_v13 = vpop.permute.xlu0 %1205  ;;  %v1114_v26 = vsel %vm155_vm1, %v1100_v10, 0 }
  0xaf   :  { %v1214_v16 = vsel %vm1213_vm9, %v1206_v13, %v1208_v11 }
  0xb0   :  { %v1263_v56 = vmul.bf16 %v1241_v12, %v1214_v16 }
  0xb2   :  { %1433 = vmatmul.mubr.msk.bf16.vlgmr.msra.gmra.mxu0 %vm151_vm3, %v1431_v14  ;;  %1435 = vmatmul.mubr.msk.bf16.vlgmr.msra.gmra.mxu1 %vm151_vm3, %v1431_v14  ;;  %v1212_v27 = vpop.permute.xlu1 %1211  ;;  %v1210_v28 = vpop.permute.xlu0 %1209  ;;  %v1273_v38 = vsel %vm155_vm1, %v1263_v56, 0 }
  0xb3   :  { %1134 = vmatpush1.bf16.msra.mxu0 %v1108_v18  ;;  %v1223_v29 = vsel %vm1213_vm9, %v1212_v27, %v1206_v13  ;;  %v1215_v30 = vsel %vm1213_vm9, %v1208_v11, %v1210_v28  ;;  %v1216_v15 = vsel %vm1213_vm9, %v1210_v28, %v1212_v27  ;;  %1175 = vmatpush1.bf16.msra.mxu1 %v1114_v26 }
  0xb4   :  { %v1266_v31 = vmul.bf16 %v1262_v17, %v1223_v29  ;;  %v1264_v32 = vmul.bf16 %v1248_v19, %v1215_v30  ;;  %v1265_v20 = vmul.bf16 %v1255_v25, %v1216_v15  ;;  %1151 = vmatprep.mubr.bf16.mxu0 %v1472_v4  ;;  %1192 = vmatprep.mubr.bf16.mxu1 %v1472_v4 }
  0xb6   :  { %1446 = vmatprep.subr.msk.bf16.mxu0 %vm155_vm1, %v1264_v32  ;;  %1448 = vmatprep.subr.msk.bf16.mxu1 %vm155_vm1, %v1266_v31  ;;  %v1279_v39 = vsel %vm155_vm1, %v1265_v20, 0 }
  0xba   :  { %1438 = vmatmul.mubr.msk.bf16.vlgmr.msra.gmra.mxu0 %vm151_vm3, %v1436_v37  ;;  %1440 = vmatmul.mubr.msk.bf16.vlgmr.msra.gmra.mxu1 %vm151_vm3, %v1436_v37 }
  0xbb   :  { %1299 = vmatpush1.bf16.msra.mxu0 %v1273_v38  ;;  %1340 = vmatpush1.bf16.msra.mxu1 %v1279_v39 }
  0xbc   :  { %1316 = vmatprep.mubr.bf16.mxu0 %v1472_v4  ;;  %1357 = vmatprep.mubr.bf16.mxu1 %v1472_v4 }
  0xc2   :  { %1447 = vmatmul.mubr.msk.bf16.vlgmr.msra.gmra.mxu0 %vm151_vm3, %v1445_v40  ;;  %1449 = vmatmul.mubr.msk.bf16.vlgmr.msra.gmra.mxu1 %vm151_vm3, %v1445_v40 }
 0x142   :  { %v202_v41 = vpop.f32.mrf.mxu0  ;;  %v243_v33 = vpop.f32.mrf.mxu1 }
 0x144   :  { %v204_v42 = vpop.f32.mrf.mxu0  ;;  %v245_v43 = vpop.f32.mrf.mxu1 }
 0x146   :  { %v206_v44 = vpop.f32.mrf.mxu0  ;;  %v247_v34 = vpop.f32.mrf.mxu1 }
 0x148   :  { %v207_v35 = vpop.f32.mrf.mxu0  ;;  %v248_v36 = vpop.f32.mrf.mxu1 }
 0x14a   :  { %v299_v45 = vpop.f32.mrf.mxu0  ;;  %v340_v46 = vpop.f32.mrf.mxu1 }
 0x14b   :  { %v300_v27 = vadd.f32 %v299_v45, %v202_v41  ;;  %v341_v28 = vadd.f32 %v340_v46, %v243_v33 }
 0x14c   :  { %v301_v47 = vpop.f32.mrf.mxu0  ;;  %v342_v4 = vpop.f32.mrf.mxu1 }
 0x14d   :  { %v302_v15 = vadd.f32 %v301_v47, %v204_v42  ;;  %v343_v31 = vadd.f32 %v342_v4, %v245_v43 }
 0x14e   :  { %v303_v1 = vpop.f32.mrf.mxu0  ;;  %v344_v48 = vpop.f32.mrf.mxu1 }
 0x150   :  { %v304_v49 = vpop.f32.mrf.mxu0  ;;  %v345_v50 = vpop.f32.mrf.mxu1 }
 0x152   :  { %v438_v51 = vpop.f32.mrf.mxu0  ;;  %v479_v52 = vpop.f32.mrf.mxu1 }
 0x153   :  { %v486_v32 = vadd.f32 %v438_v51, %v300_v27  ;;  %v488_v20 = vadd.f32 %v479_v52, %v341_v28 }
 0x154   :  { %v440_v0 = vpop.f32.mrf.mxu0  ;;  %v481_v53 = vpop.f32.mrf.mxu1 }
 0x155   :  { %v487_v39 = vadd.f32 %v440_v0, %v302_v15  ;;  %v489_v40 = vadd.f32 %v481_v53, %v343_v31 }
 0x156   :  { %v442_v54 = vpop.f32.mrf.mxu0  ;;  %v483_v57 = vpop.f32.mrf.mxu1 }
 0x158   :  { %v443_v58 = vpop.f32.mrf.mxu0  ;;  %v484_v59 = vpop.f32.mrf.mxu1 }
 0x15a   :  { %v581_v60 = vpop.f32.mrf.mxu0  ;;  %v622_v55 = vpop.f32.mrf.mxu1 }
 0x15b   :  { %v629_v44 = vadd.f32 %v581_v60, %v486_v32  ;;  %v631_v34 = vadd.f32 %v622_v55, %v488_v20 }
 0x15c   :  { %v583_v23 = vpop.f32.mrf.mxu0  ;;  %v624_v61 = vpop.f32.mrf.mxu1 }
 0x15d   :  { %v630_v1 = vadd.f32 %v583_v23, %v487_v39  ;;  %v632_v48 = vadd.f32 %v624_v61, %v489_v40  ;;  %v1374_v23 = vpop.permute.xlu0 %1373 }
 0x15e   :  { %v585_v62 = vpop.f32.mrf.mxu0  ;;  %v626_v63 = vpop.f32.mrf.mxu1 }
 0x160   :  { %v586_v2 = vpop.f32.mrf.mxu0  ;;  %v627_v3 = vpop.f32.mrf.mxu1 }
 0x162   :  { %v724_v5 = vpop.f32.mrf.mxu0  ;;  %v765_v21 = vpop.f32.mrf.mxu1 }
 0x163   :  { %v772_v49 = vadd.f32 %v724_v5, %v629_v44  ;;  %v774_v50 = vadd.f32 %v765_v21, %v631_v34 }
 0x164   :  { %v726_v6 = vpop.f32.mrf.mxu0  ;;  %v767_v7 = vpop.f32.mrf.mxu1 }
 0x165   :  { %v773_v45 = vadd.f32 %v726_v6, %v630_v1  ;;  %v775_v46 = vadd.f32 %v767_v7, %v632_v48 }
 0x166   :  { %v728_v22 = vpop.f32.mrf.mxu0  ;;  %v769_v24 = vpop.f32.mrf.mxu1 }
 0x168   :  { %v729_v8 = vpop.f32.mrf.mxu0  ;;  %v770_v9 = vpop.f32.mrf.mxu1 }
 0x16a   :  { %v867_v10 = vpop.f32.mrf.mxu0  ;;  %v908_v11 = vpop.f32.mrf.mxu1 }
 0x16b   :  { %v915_v42 = vadd.f32 %v867_v10, %v772_v49  ;;  %v917_v43 = vadd.f32 %v908_v11, %v774_v50 }
 0x16c   :  { %v869_v12 = vpop.f32.mrf.mxu0  ;;  %v910_v13 = vpop.f32.mrf.mxu1 }
 0x16d   :  { %v916_v51 = vadd.f32 %v869_v12, %v773_v45  ;;  %v918_v52 = vadd.f32 %v910_v13, %v775_v46 }
 0x16e   :  { %v871_v14 = vpop.f32.mrf.mxu0  ;;  %v912_v16 = vpop.f32.mrf.mxu1 }
 0x170   :  { %v872_v17 = vpop.f32.mrf.mxu0  ;;  %v913_v18 = vpop.f32.mrf.mxu1 }
 0x172   :  { %v1010_v19 = vpop.f32.mrf.mxu0  ;;  %v1051_v25 = vpop.f32.mrf.mxu1 }
 0x173   :  { %v1058_v0 = vadd.f32 %v1010_v19, %v915_v42  ;;  %v1060_v53 = vadd.f32 %v1051_v25, %v917_v43 }
 0x174   :  { %v1012_v26 = vpop.f32.mrf.mxu0  ;;  %v1053_v56 = vpop.f32.mrf.mxu1 }
 0x175   :  { %v1059_v58 = vadd.f32 %v1012_v26, %v916_v51  ;;  %v1061_v59 = vadd.f32 %v1053_v56, %v918_v52 }
 0x176   :  { %v1014_v29 = vpop.f32.mrf.mxu0  ;;  %v1055_v30 = vpop.f32.mrf.mxu1 }
 0x178   :  { %v1015_v37 = vpop.f32.mrf.mxu0  ;;  %v1056_v38 = vpop.f32.mrf.mxu1 }
 0x17a   :  { %v1153_v35 = vpop.f32.mrf.mxu0  ;;  %v1194_v36 = vpop.f32.mrf.mxu1 }
 0x17b   :  { %v1201_v60 = vadd.f32 %v1153_v35, %v1058_v0  ;;  %v1203_v55 = vadd.f32 %v1194_v36, %v1060_v53 }
 0x17c   :  { %v1155_v41 = vpop.f32.mrf.mxu0  ;;  %v1196_v33 = vpop.f32.mrf.mxu1 }
 0x17d   :  { %v1202_v63 = vadd.f32 %v1155_v41, %v1059_v58  ;;  %v1204_v2 = vadd.f32 %v1196_v33, %v1061_v59 }
 0x17e   :  { %v1157_v47 = vpop.f32.mrf.mxu0  ;;  %v1198_v4 = vpop.f32.mrf.mxu1 }
 0x180   :  { %v1158_v54 = vpop.f32.mrf.mxu0  ;;  %v1199_v57 = vpop.f32.mrf.mxu1 }
 0x182   :  { %v1318_v61 = vpop.f32.mrf.mxu0  ;;  %v1359_v62 = vpop.f32.mrf.mxu1 }
 0x183   :  { %v1366_v3 = vadd.f32 %v1318_v61, %v1201_v60  ;;  %v1368_v5 = vadd.f32 %v1359_v62, %v1203_v55 }
 0x184   :  { %v1320_v21 = vpop.f32.mrf.mxu0  ;;  %v1361_v6 = vpop.f32.mrf.mxu1 }
 0x185   :  { %v1367_v7 = vadd.f32 %v1320_v21, %v1202_v63  ;;  %v1369_v22 = vadd.f32 %v1361_v6, %v1204_v2  ;;  %v1376_v24 = vadd.f32 %v1374_v23, %v1366_v3  ;;  %v1378_v8 = vadd.f32 %v1374_v23, %v1368_v5 }
 0x186   :  { %v1322_v9 = vpop.f32.mrf.mxu0  ;;  %v1363_v10 = vpop.f32.mrf.mxu1 }
 0x187   :  { %v1377_v11 = vadd.f32 %v1374_v23, %v1367_v7  ;;  %v1379_v12 = vadd.f32 %v1374_v23, %v1369_v22  ;;  %1380 = vst [vmem:[%s1787_s4] sm:$0xff] %v1376_v24  ;;  %1382 = vst [vmem:[%s1787_s4 + $0x10] sm:$0xff] %v1378_v8 }
 0x188   :  { %v1323_v13 = vpop.f32.mrf.mxu0  ;;  %v1364_v14 = vpop.f32.mrf.mxu1 }
 0x189   :  { %1381 = vst [vmem:[%s1787_s4 + $0x8] sm:$0xff] %v1377_v11  ;;  %1383 = vst [vmem:[%s1787_s4 + $0x18] sm:$0xff] %v1379_v12 }

// kernel: decoder_forward.8
= control target key start
LH: loop header
LB: loop body
LE: loop exit
PB: predicated region body
PF: predicated region fallthrough
CT: control target
= control target key end

     0   :  { %v4833_v4 = vmov 0   ;;  %s3849_s9 = smov 16   ;;  %s3851_s10 = smov 15   ;;  %v79_v16 = vlaneseq  ;;  %vm117_vm0 = vcmask 130048   ;;  %vm167_vm1 = vcmask 1043456   ;;  %s4824_s0 = inlined_call_operand.vmem [shape: bf16[8,512], index: 0, kind: input, shape index: {}]   ;;  %s4825_s1 = inlined_call_operand.vmem [shape: bf16[8,512], index: 1, kind: input, shape index: {}]   ;;  %s4826_s2 = inlined_call_operand.vmem [shape: bf16[9,512], index: 2, kind: input, shape index: {}]   ;;  %s4827_s3 = inlined_call_operand.vmem [shape: bf16[9,8,8], index: 3, kind: input, shape index: {}]   ;;  %s4828_s4 = inlined_call_operand.vmem [shape: bf16[9,8,8], index: 4, kind: input, shape index: {}]   ;;  %s4829_s5 = inlined_call_operand.vmem [shape: f32[8,1], index: 5, kind: input, shape index: {}]   ;;  %s4830_s7 = inlined_call_operand.vmem [shape: f32[8,1], index: 7, kind: input, shape index: {}]   ;;  %s4831_s6 = inlined_call_operand.vmem [shape: bf16[9,8,8], index: 6, kind: input, shape index: {}]   ;;  %s4832_s8 = inlined_call_operand.vmem [shape: bf16[8,512], index: 8, kind: output, shape index: {}]  }
   0x1   :  { %v3905_v0 = vld [vmem:[%s4824_s0 + $0x8] sm:$0xff]  ;;  %v3910_v1 = vld [vmem:[%s4824_s0] sm:$0xff]  ;;  %212 = vmatprep.mubr.bf16.mxu0 %v4833_v4  ;;  %253 = vmatprep.mubr.bf16.mxu1 %v4833_v4  ;;  %s3850_s0 = smov 17   ;;  %s3852_s11 = smov 1   ;;  %vm54_vm2 = vcmask 138240   ;;  %vm163_vm3 = vcmask 64512  }
   0x2   :  { %v3660_v2 = vcombine.high %v3905_v0, %v3905_v0  ;;  %v3662_v3 = vcombine.high %v3910_v1, %v3910_v1  ;;  %v3663_v5 = vcombine.low %v3905_v0, %v3905_v0  ;;  %v3661_v6 = vcombine.low %v3910_v1, %v3910_v1  ;;  %3831 = vset.pattern.permute.xlu0 %v4833_v4  ;;  %s3853_s12 = smov 127   ;;  %s3854_s13 = smov 113   ;;  %v3956_v7 = vld [vmem:[%s4825_s1] sm:$0xff]  ;;  %v3961_v8 = vld [vmem:[%s4825_s1 + $0x8] sm:$0xff] }
   0x3   :  { %s3855_s14 = smov 112   ;;  %s3856_s15 = smov 111   ;;  %v3967_v9 = vcombine.low %v3956_v7, %v3956_v7  ;;  %v3971_v10 = vcombine.high %v3961_v8, %v3961_v8  ;;  %v3979_v11 = vcombine.low %v3961_v8, %v3961_v8  ;;  %v3983_v12 = vcombine.high %v3956_v7, %v3956_v7  ;;  %v31_v13 = vld [vmem:[%s4826_s2 + $0x8] sm:$0xff]  ;;  %v30_v14 = vld [vmem:[%s4826_s2] sm:$0xff] }
   0x4   :  { %109 = vrot.lane.b32.xlu0 %v3660_v2, %s3849_s9  ;;  %113 = vrot.lane.b32.xlu1 %v3662_v3, %s3849_s9  ;;  %v3667_v15 = vcombine.high %v31_v13, %v31_v13  ;;  %v3665_v17 = vcombine.high %v30_v14, %v30_v14  ;;  %v3664_v18 = vcombine.low %v30_v14, %v30_v14  ;;  %v4031_v20 = vshrl.u32 %v79_v16, 7  ;;  %v3668_v56 = vld [vmem:[%s4827_s3 + $0x4] sm:$0xf] }
   0x5   :  { %v3666_v19 = vcombine.low %v31_v13, %v31_v13  ;;  %vm367_vm4 = vcmask 121856   ;;  %vm510_vm5 = vcmask 7168   ;;  %vm796_vm6 = vcmask 1039360  }
   0x6   :  { %v150_v21 = vshrl.u32 %v3667_v15, 16  ;;  %v136_v22 = vshrl.u32 %v3665_v17, 16  ;;  %v129_v23 = vshrl.u32 %v3664_v18, 16  ;;  %v4038_v25 = vsub.s32 0, %v4031_v20 }
   0x7   :  { %v143_v24 = vshrl.u32 %v3666_v19, 16  ;;  %v4072_v38 = vpack.i.b16 %v3664_v18, %v3664_v18  ;;  %v4074_v39 = vpack.i.b16 %v3667_v15, %v3667_v15  ;;  %v4076_v40 = vpack.i.b16 %v3665_v17, %v3665_v17 }
   0x8   :  { %115 = vrot.lane.b32.xlu1 %v3663_v5, %s3849_s9  ;;  %111 = vrot.lane.b32.xlu0 %v3661_v6, %s3849_s9  ;;  %v4040_v26 = vpack.i.b16 %v150_v21, %v150_v21  ;;  %v4042_v27 = vpack.i.b16 %v136_v22, %v136_v22  ;;  %v4044_v28 = vpack.i.b16 %v129_v23, %v129_v23  ;;  %v4119_v60 = vsub.s32 1, %v4031_v20  ;;  %v108_v23 = vld [vmem:[%s4827_s3] sm:$0xf] }
   0x9   :  { %v4046_v29 = vpack.i.b16 %v143_v24, %v143_v24  ;;  %v4078_v41 = vpack.i.b16 %v3666_v19, %v3666_v19  ;;  %v4096_v51 = vrot.slane %v4072_v38, %v4038_v25  ;;  %v4106_v57 = vrot.slane %v4074_v39, %v4038_v25 }
   0xa   :  { %v4054_v32 = vrot.slane %v4040_v26, %v4038_v25  ;;  %v4058_v33 = vrot.slane %v4042_v27, %v4038_v25  ;;  %v4062_v34 = vrot.slane %v4044_v28, %v4038_v25  ;;  %v4110_v58 = vrot.slane %v4076_v40, %v4038_v25 }
   0xb   :  { %v4066_v35 = vrot.slane %v4046_v29, %v4038_v25  ;;  %v4114_v59 = vrot.slane %v4078_v41, %v4038_v25  ;;  %v4124_v61 = vsub.s32 2, %v4031_v20  ;;  %v4167_v24 = vrot.slane %v4074_v39, %v4119_v60 }
   0xc   :  { %48 = vrot.lane.b32.xlu1 %v3661_v6, %s3850_s0  ;;  %39 = vrot.lane.b32.xlu0 %v3660_v2, %s3850_s0  ;;  %vm939_vm7 = vcmask 924672   ;;  %vm1082_vm8 = vcmask 916480   ;;  %vm1225_vm9 = vcmask 908288  }
   0xd   :  { %v4143_v13 = vrot.slane %v4072_v38, %v4124_v61  ;;  %v4147_v14 = vrot.slane %v4076_v40, %v4124_v61  ;;  %v4155_v19 = vrot.slane %v4078_v41, %v4124_v61  ;;  %v4159_v21 = vrot.slane %v4074_v39, %v4124_v61 }
   0xf   :  { %4859 = vst [vmem:[#allocation2_spill] sm:$0xff] %v4143_v13  ;;  %4860 = vst [vmem:[#allocation3_spill] sm:$0xff] %v4147_v14 }
  0x10   :  { %52 = vrot.lane.b32.xlu1 %v3663_v5, %s3850_s0  ;;  %50 = vrot.lane.b32.xlu0 %v3662_v3, %s3850_s0  ;;  %4861 = vst [vmem:[#allocation4_spill] sm:$0xff] %v4155_v19  ;;  %4862 = vst [vmem:[#allocation5_spill] sm:$0xff] %v4159_v21 }
  0x14   :  { %361 = vrot.lane.b32.xlu1 %v3661_v6, %s3851_s10  ;;  %359 = vrot.lane.b32.xlu0 %v3660_v2, %s3851_s10 }
  0x18   :  { %365 = vrot.lane.b32.xlu1 %v3663_v5, %s3851_s10  ;;  %363 = vrot.lane.b32.xlu0 %v3662_v3, %s3851_s10 }
  0x1c   :  { %504 = vrot.lane.b32.xlu1 %v3661_v6, %s3852_s11  ;;  %502 = vrot.lane.b32.xlu0 %v3660_v2, %s3852_s11 }
  0x20   :  { %508 = vrot.lane.b32.xlu1 %v3663_v5, %s3852_s11  ;;  %506 = vrot.lane.b32.xlu0 %v3662_v3, %s3852_s11 }
  0x24   :  { %790 = vrot.lane.b32.xlu1 %v3662_v3, %s3853_s12  ;;  %788 = vrot.lane.b32.xlu0 %v3661_v6, %s3853_s12 }
  0x28   :  { %794 = vrot.lane.b32.xlu1 %v3660_v2, %s3853_s12  ;;  %792 = vrot.lane.b32.xlu0 %v3663_v5, %s3853_s12 }
  0x2c   :  { %933 = vrot.lane.b32.xlu1 %v3662_v3, %s3854_s13  ;;  %931 = vrot.lane.b32.xlu0 %v3661_v6, %s3854_s13 }
  0x30   :  { %937 = vrot.lane.b32.xlu1 %v3660_v2, %s3854_s13  ;;  %935 = vrot.lane.b32.xlu0 %v3663_v5, %s3854_s13 }
  0x34   :  { %1076 = vrot.lane.b32.xlu1 %v3662_v3, %s3855_s14  ;;  %1074 = vrot.lane.b32.xlu0 %v3661_v6, %s3855_s14 }
  0x38   :  { %1080 = vrot.lane.b32.xlu1 %v3660_v2, %s3855_s14  ;;  %1078 = vrot.lane.b32.xlu0 %v3663_v5, %s3855_s14 }
  0x3c   :  { %1219 = vrot.lane.b32.xlu1 %v3662_v3, %s3856_s15  ;;  %1217 = vrot.lane.b32.xlu0 %v3661_v6, %s3856_s15 }
  0x40   :  { %1223 = vrot.lane.b32.xlu1 %v3660_v2, %s3856_s15  ;;  %1221 = vrot.lane.b32.xlu0 %v3663_v5, %s3856_s15 }
  0x44   :  { %1419 = vrot.lane.b32.xlu1 %v3967_v9, %s3849_s9  ;;  %1417 = vrot.lane.b32.xlu0 %v3971_v10, %s3849_s9 }
  0x48   :  { %1423 = vrot.lane.b32.xlu1 %v3979_v11, %s3849_s9  ;;  %1421 = vrot.lane.b32.xlu0 %v3983_v12, %s3849_s9 }
  0x4c   :  { %1396 = vrot.lane.b32.xlu1 %v3967_v9, %s3850_s0  ;;  %1387 = vrot.lane.b32.xlu0 %v3971_v10, %s3850_s0 }
  0x50   :  { %1400 = vrot.lane.b32.xlu1 %v3979_v11, %s3850_s0  ;;  %1398 = vrot.lane.b32.xlu0 %v3983_v12, %s3850_s0 }
  0x54   :  { %1637 = vrot.lane.b32.xlu1 %v3967_v9, %s3851_s10  ;;  %1635 = vrot.lane.b32.xlu0 %v3971_v10, %s3851_s10 }
  0x58   :  { %1641 = vrot.lane.b32.xlu1 %v3979_v11, %s3851_s10  ;;  %1639 = vrot.lane.b32.xlu0 %v3983_v12, %s3851_s10 }
  0x5c   :  { %1762 = vrot.lane.b32.xlu1 %v3967_v9, %s3852_s11  ;;  %1760 = vrot.lane.b32.xlu0 %v3971_v10, %s3852_s11 }
  0x60   :  { %1766 = vrot.lane.b32.xlu1 %v3979_v11, %s3852_s11  ;;  %1764 = vrot.lane.b32.xlu0 %v3983_v12, %s3852_s11 }
  0x64   :  { %2002 = vrot.lane.b32.xlu1 %v3983_v12, %s3853_s12  ;;  %2000 = vrot.lane.b32.xlu0 %v3967_v9, %s3853_s12 }
  0x68   :  { %2006 = vrot.lane.b32.xlu1 %v3971_v10, %s3853_s12  ;;  %2004 = vrot.lane.b32.xlu0 %v3979_v11, %s3853_s12 }
  0x6c   :  { %2127 = vrot.lane.b32.xlu1 %v3983_v12, %s3854_s13  ;;  %2125 = vrot.lane.b32.xlu0 %v3967_v9, %s3854_s13 }
  0x70   :  { %2131 = vrot.lane.b32.xlu1 %v3971_v10, %s3854_s13  ;;  %2129 = vrot.lane.b32.xlu0 %v3979_v11, %s3854_s13 }
  0x74   :  { %2252 = vrot.lane.b32.xlu1 %v3983_v12, %s3855_s14  ;;  %2250 = vrot.lane.b32.xlu0 %v3967_v9, %s3855_s14 }
  0x76   :  { %v110_v30 = vpop.permute.xlu0 %109  ;;  %v114_v31 = vpop.permute.xlu1 %113 }
  0x78   :  { %2256 = vrot.lane.b32.xlu1 %v3971_v10, %s3855_s14  ;;  %2254 = vrot.lane.b32.xlu0 %v3979_v11, %s3855_s14 }
  0x7a   :  { %v116_v36 = vpop.permute.xlu1 %115  ;;  %v112_v37 = vpop.permute.xlu0 %111 }
  0x7b   :  { %v119_v42 = vsel %vm117_vm0, %v114_v31, %v116_v36  ;;  %v120_v43 = vsel %vm117_vm0, %v116_v36, %v110_v30  ;;  %v118_v44 = vsel %vm117_vm0, %v112_v37, %v114_v31  ;;  %v127_v45 = vsel %vm117_vm0, %v110_v30, %v112_v37 }
  0x7c   :  { %v160_v46 = vmul.bf16 %v4054_v32, %v120_v43  ;;  %v158_v47 = vmul.bf16 %v4058_v33, %v118_v44  ;;  %v157_v48 = vmul.bf16 %v4062_v34, %v127_v45  ;;  %v159_v49 = vmul.bf16 %v4066_v35, %v119_v42  ;;  %2377 = vrot.lane.b32.xlu1 %v3983_v12, %s3856_s15 }
  0x7d   :  { %2375 = vrot.lane.b32.xlu0 %v3967_v9, %s3856_s15  ;;  %v4139_v12 = vrot.slane %v4072_v38, %v4119_v60  ;;  %v4171_v30 = vrot.slane %v4076_v40, %v4119_v60  ;;  %v4175_v31 = vrot.slane %v4078_v41, %v4119_v60  ;;  %v4179_v36 = vcombine.low %v4143_v13, %v4147_v14 }
  0x7e   :  { %3671 = vmatprep.subr.msk.bf16.mxu1 %vm167_vm1, %v160_v46  ;;  %v49_v50 = vpop.permute.xlu1 %48  ;;  %3669 = vmatprep.subr.msk.bf16.mxu0 %vm167_vm1, %v158_v47  ;;  %v40_v52 = vpop.permute.xlu0 %39  ;;  %v169_v53 = vsel %vm167_vm1, %v157_v48, 0  ;;  %v175_v54 = vsel %vm167_vm1, %v159_v49, 0  ;;  %v4186_v44 = vcombine.low %v4155_v19, %v4159_v21 }
  0x7f   :  { %v64_v55 = vsel %vm54_vm2, %v40_v52, %v49_v50  ;;  %195 = vmatpush1.bf16.msra.mxu0 %v169_v53  ;;  %236 = vmatpush1.bf16.msra.mxu1 %v175_v54  ;;  %v4202_v54 = vrot.slane %v4044_v28, %v4119_v60 }
  0x80   :  { %2381 = vrot.lane.b32.xlu1 %v3971_v10, %s3856_s15  ;;  %v104_v62 = vmul.bf16 %v4096_v51, %v64_v55 }
  0x81   :  { %2379 = vrot.lane.b32.xlu0 %v3979_v11, %s3856_s15  ;;  %4863 = vst [vmem:[#allocation6_spill] sm:$0xff] %v4202_v54 }
  0x82   :  { %3672 = vmatmul.mubr.msk.bf16.vlgmr.msra.gmra.mxu1 %vm163_vm3, %v3668_v56  ;;  %v53_v63 = vpop.permute.xlu1 %52  ;;  %3670 = vmatmul.mubr.msk.bf16.vlgmr.msra.gmra.mxu0 %vm163_vm3, %v3668_v56  ;;  %v51_v2 = vpop.permute.xlu0 %50  ;;  %v266_v17 = vsel %vm167_vm1, %v104_v62, 0 }
  0x83   :  { %v57_v3 = vsel %vm54_vm2, %v53_v63, %v40_v52  ;;  %v55_v5 = vsel %vm54_vm2, %v49_v50, %v51_v2  ;;  %v56_v6 = vsel %vm54_vm2, %v51_v2, %v53_v63  ;;  %309 = vmatprep.mubr.bf16.mxu0 %v4833_v4  ;;  %350 = vmatprep.mubr.bf16.mxu1 %v4833_v4 }
  0x84   :  { %v107_v9 = vmul.bf16 %v4106_v57, %v57_v3  ;;  %v105_v10 = vmul.bf16 %v4110_v58, %v55_v5  ;;  %v106_v11 = vmul.bf16 %v4114_v59, %v56_v6  ;;  %v673_v52 = vmul.bf16 %v4179_v36, %v3910_v1  ;;  %v3677_v1 = vld [vmem:[%s4827_s3 + $0x8] sm:$0xf] }
  0x85   :  { %v674_v63 = vmul.bf16 %v4186_v44, %v3905_v0  ;;  %v4214_v3 = vrot.slane %v4040_v26, %v4119_v60  ;;  %v4218_v5 = vrot.slane %v4042_v27, %v4119_v60  ;;  %v4222_v6 = vrot.slane %v4046_v29, %v4119_v60 }
  0x86   :  { %v362_v15 = vpop.permute.xlu1 %361  ;;  %3673 = vmatprep.subr.msk.bf16.mxu0 %vm167_vm1, %v105_v10  ;;  %3675 = vmatprep.subr.msk.bf16.mxu1 %vm167_vm1, %v107_v9  ;;  %v360_v16 = vpop.permute.xlu0 %359  ;;  %v272_v18 = vsel %vm167_vm1, %v106_v11, 0  ;;  %v3691_v0 = vcombine.high %v673_v52, %v673_v52 }
  0x87   :  { %v377_v22 = vsel %vm367_vm4, %v360_v16, %v362_v15  ;;  %292 = vmatpush1.bf16.msra.mxu0 %v266_v17  ;;  %333 = vmatpush1.bf16.msra.mxu1 %v272_v18  ;;  %4864 = vst [vmem:[#allocation7_spill] sm:$0xff] %v4214_v3  ;;  %4865 = vst [vmem:[#allocation8_spill] sm:$0xff] %v4218_v5 }
  0x88   :  { %v395_v37 = vmul.bf16 %v4139_v12, %v377_v22  ;;  %4866 = vst [vmem:[#allocation9_spill] sm:$0xff] %v4222_v6 }
  0x8a   :  { %v366_v42 = vpop.permute.xlu1 %365  ;;  %3674 = vmatmul.mubr.msk.bf16.vlgmr.msra.gmra.mxu0 %vm163_vm3, %v108_v23  ;;  %3676 = vmatmul.mubr.msk.bf16.vlgmr.msra.gmra.mxu1 %vm163_vm3, %v108_v23  ;;  %v364_v43 = vpop.permute.xlu0 %363  ;;  %v405_v56 = vsel %vm167_vm1, %v395_v37, 0 }
  0x8b   :  { %v370_v45 = vsel %vm367_vm4, %v366_v42, %v360_v16  ;;  %v368_v46 = vsel %vm367_vm4, %v362_v15, %v364_v43  ;;  %v369_v47 = vsel %vm367_vm4, %v364_v43, %v366_v42  ;;  %448 = vmatprep.mubr.bf16.mxu0 %v4833_v4  ;;  %489 = vmatprep.mubr.bf16.mxu1 %v4833_v4 }
  0x8c   :  { %v398_v48 = vmul.bf16 %v4167_v24, %v370_v45  ;;  %v396_v49 = vmul.bf16 %v4171_v30, %v368_v46  ;;  %v397_v50 = vmul.bf16 %v4175_v31, %v369_v47  ;;  %v3693_v15 = vcombine.high %v674_v63, %v674_v63 }
  0x8d   :  { %v3690_v16 = vcombine.low %v673_v52, %v673_v52  ;;  %v3692_v42 = vcombine.low %v674_v63, %v674_v63  ;;  %v4241_v47 = vrot.slane %v4044_v28, %v4124_v61  ;;  %v4249_v52 = vrot.slane %v4040_v26, %v4124_v61 }
  0x8e   :  { %v505_v53 = vpop.permute.xlu1 %504  ;;  %3678 = vmatprep.subr.msk.bf16.mxu0 %vm167_vm1, %v396_v49  ;;  %3680 = vmatprep.subr.msk.bf16.mxu1 %vm167_vm1, %v398_v48  ;;  %v503_v55 = vpop.permute.xlu0 %502  ;;  %v411_v62 = vsel %vm167_vm1, %v397_v50, 0  ;;  %v3682_v49 = vld [vmem:[%s4827_s3 + $0xc] sm:$0xf] }
  0x8f   :  { %v520_v2 = vsel %vm510_vm5, %v503_v55, %v505_v53  ;;  %431 = vmatpush1.bf16.msra.mxu0 %v405_v56  ;;  %472 = vmatpush1.bf16.msra.mxu1 %v411_v62  ;;  %4867 = vst [vmem:[#allocation10_spill] sm:$0xff] %v4241_v47  ;;  %4868 = vst [vmem:[#allocation11_spill] sm:$0xff] %v4249_v52  ;;  %v691_v56 = vsel %vm167_vm1, %v3690_v16, 0  ;;  %v697_v62 = vsel %vm167_vm1, %v3692_v42, 0 }
  0x90   :  { %v538_v9 = vmul.bf16 %v4202_v54, %v520_v2 }
  0x92   :  { %v509_v10 = vpop.permute.xlu1 %508  ;;  %3679 = vmatmul.mubr.msk.bf16.vlgmr.msra.gmra.mxu0 %vm163_vm3, %v3677_v1  ;;  %3681 = vmatmul.mubr.msk.bf16.vlgmr.msra.gmra.mxu1 %vm163_vm3, %v3677_v1  ;;  %v507_v11 = vpop.permute.xlu0 %506  ;;  %v548_v43 = vsel %vm167_vm1, %v538_v9, 0 }
  0x93   :  { %v513_v17 = vsel %vm510_vm5, %v509_v10, %v503_v55  ;;  %v511_v18 = vsel %vm510_vm5, %v505_v53, %v507_v11  ;;  %v512_v22 = vsel %vm510_vm5, %v507_v11, %v509_v10  ;;  %591 = vmatprep.mubr.bf16.mxu0 %v4833_v4  ;;  %632 = vmatprep.mubr.bf16.mxu1 %v4833_v4 }
  0x94   :  { %v541_v60 = vmul.bf16 %v4214_v3, %v513_v17  ;;  %v539_v23 = vmul.bf16 %v4218_v5, %v511_v18  ;;  %v540_v37 = vmul.bf16 %v4222_v6, %v512_v22  ;;  %v4255_v53 = vrot.slane %v4042_v27, %v4124_v61  ;;  %v3689_v22 = vld [vmem:[%s4827_s3 + $0x10] sm:$0xf] }
  0x95   :  { %v4259_v55 = vrot.slane %v4046_v29, %v4124_v61 }
  0x96   :  { %3683 = vmatprep.subr.msk.bf16.mxu0 %vm167_vm1, %v539_v23  ;;  %3685 = vmatprep.subr.msk.bf16.mxu1 %vm167_vm1, %v541_v60  ;;  %v554_v45 = vsel %vm167_vm1, %v540_v37, 0  ;;  %v791_v46 = vpop.permute.xlu1 %790  ;;  %v789_v48 = vpop.permute.xlu0 %788  ;;  %4869 = vst [vmem:[#allocation12_spill] sm:$0xff] %v4255_v53 }
  0x97   :  { %574 = vmatpush1.bf16.msra.mxu0 %v548_v43  ;;  %615 = vmatpush1.bf16.msra.mxu1 %v554_v45  ;;  %v797_v50 = vsel %vm796_vm6, %v789_v48, %v791_v46  ;;  %4870 = vst [vmem:[#allocation13_spill] sm:$0xff] %v4259_v55 }
  0x98   :  { %3694 = vmatprep.subr.msk.bf16.mxu0 %vm167_vm1, %v3691_v0  ;;  %3696 = vmatprep.subr.msk.bf16.mxu1 %vm167_vm1, %v3693_v15  ;;  %v824_v63 = vmul.bf16 %v4241_v47, %v797_v50  ;;  %v953_v0 = vsub.s32 3, %v4031_v20 }
  0x9a   :  { %3684 = vmatmul.mubr.msk.bf16.vlgmr.msra.gmra.mxu0 %vm163_vm3, %v3682_v49  ;;  %3686 = vmatmul.mubr.msk.bf16.vlgmr.msra.gmra.mxu1 %vm163_vm3, %v3682_v49  ;;  %v795_v2 = vpop.permute.xlu1 %794  ;;  %v793_v1 = vpop.permute.xlu0 %792  ;;  %v4278_v17 = vrot.slane %v4072_v38, %v953_v0  ;;  %v4285_v23 = vrot.slane %v4074_v39, %v953_v0  ;;  %v834_v37 = vsel %vm167_vm1, %v824_v63, 0  ;;  %v4289_v42 = vrot.slane %v4076_v40, %v953_v0  ;;  %v32_v39 = vld [vmem:[%s4826_s2 + $0x10] sm:$0x11]  ;;  %v33_v40 = vld [vmem:[%s4826_s2 + $0x18] sm:$0x11] }
  0x9b   :  { %v806_v9 = vsel %vm796_vm6, %v795_v2, %v789_v48  ;;  %v798_v10 = vsel %vm796_vm6, %v791_v46, %v793_v1  ;;  %v799_v61 = vsel %vm796_vm6, %v793_v1, %v795_v2  ;;  %717 = vmatpush1.bf16.msra.mxu0 %v691_v56  ;;  %758 = vmatpush1.bf16.msra.mxu1 %v697_v62 }
  0x9c   :  { %v827_v11 = vmul.bf16 %v4249_v52, %v806_v9  ;;  %v825_v15 = vmul.bf16 %v4255_v53, %v798_v10  ;;  %v826_v16 = vmul.bf16 %v4259_v55, %v799_v61  ;;  %734 = vmatprep.mubr.bf16.mxu0 %v4833_v4  ;;  %775 = vmatprep.mubr.bf16.mxu1 %v4833_v4 }
  0x9d   :  { %4871 = vst [vmem:[#allocation14_spill] sm:$0xff] %v4278_v17  ;;  %4872 = vst [vmem:[#allocation15_spill] sm:$0xff] %v4285_v23  ;;  %v4292_v43 = vrot.slane %v4078_v41, %v953_v0  ;;  %v3713_v2 = vcombine.low %v32_v39, %v32_v39  ;;  %v3716_v1 = vcombine.high %v33_v40, %v33_v40 }
  0x9e   :  { %v934_v20 = vpop.permute.xlu1 %933  ;;  %3699 = vmatprep.subr.msk.bf16.mxu0 %vm167_vm1, %v825_v15  ;;  %3701 = vmatprep.subr.msk.bf16.mxu1 %vm167_vm1, %v827_v11  ;;  %v932_v18 = vpop.permute.xlu0 %931  ;;  %4873 = vst [vmem:[#allocation16_spill] sm:$0xff] %v4289_v42  ;;  %v840_v38 = vsel %vm167_vm1, %v826_v16, 0  ;;  %v4315_v10 = vrot.slane %v4044_v28, %v953_v0  ;;  %v3714_v11 = vcombine.high %v32_v39, %v32_v39  ;;  %v3698_v16 = vld [vmem:[%s4827_s3 + $0x14] sm:$0xf] }
  0x9f   :  { %v940_v60 = vsel %vm939_vm7, %v932_v18, %v934_v20  ;;  %4874 = vst [vmem:[#allocation17_spill] sm:$0xff] %v4292_v43  ;;  %v3715_v15 = vcombine.low %v33_v40, %v33_v40  ;;  %v4329_v28 = vrot.slane %v4046_v29, %v953_v0 }
  0xa0   :  { %v967_v45 = vmul.bf16 %v4278_v17, %v940_v60  ;;  %4875 = vst [vmem:[#allocation18_spill] sm:$0xff] %v4315_v10  ;;  %v4326_v60 = vrot.slane %v4042_v27, %v953_v0  ;;  %v1255_v40 = vpack.i.b16 %v3714_v11, %v3714_v11 }
  0xa1   :  { %4878 = vst [vmem:[#allocation21_spill] sm:$0xff] %v4329_v28 }
  0xa2   :  { %3695 = vmatmul.mubr.msk.bf16.vlgmr.msra.gmra.mxu0 %vm163_vm3, %v3689_v22  ;;  %3697 = vmatmul.mubr.msk.bf16.vlgmr.msra.gmra.mxu1 %vm163_vm3, %v3689_v22  ;;  %v938_v46 = vpop.permute.xlu1 %937  ;;  %v936_v48 = vpop.permute.xlu0 %935  ;;  %v977_v22 = vsel %vm167_vm1, %v967_v45, 0  ;;  %4877 = vst [vmem:[#allocation20_spill] sm:$0xff] %v4326_v60  ;;  %v1262_v45 = vpack.i.b16 %v3715_v15, %v3715_v15  ;;  %v4357_v11 = vrot.slane %v1255_v40, %v4038_v25 }
  0xa3   :  { %860 = vmatpush1.bf16.msra.mxu0 %v834_v37  ;;  %v949_v41 = vsel %vm939_vm7, %v938_v46, %v932_v18  ;;  %v941_v49 = vsel %vm939_vm7, %v934_v20, %v936_v48  ;;  %v942_v50 = vsel %vm939_vm7, %v936_v48, %v938_v46  ;;  %901 = vmatpush1.bf16.msra.mxu1 %v840_v38 }
  0xa4   :  { %v970_v56 = vmul.bf16 %v4285_v23, %v949_v41  ;;  %v968_v62 = vmul.bf16 %v4289_v42, %v941_v49  ;;  %v969_v63 = vmul.bf16 %v4292_v43, %v942_v50  ;;  %877 = vmatprep.mubr.bf16.mxu0 %v4833_v4  ;;  %918 = vmatprep.mubr.bf16.mxu1 %v4833_v4 }
  0xa5   :  { %v4322_v18 = vrot.slane %v4040_v26, %v953_v0  ;;  %v1248_v38 = vpack.i.b16 %v3713_v2, %v3713_v2  ;;  %v1269_v46 = vpack.i.b16 %v3716_v1, %v3716_v1  ;;  %v3703_v2 = vld [vmem:[%s4827_s3 + $0x18] sm:$0xf]  ;;  %4881 = vst [vmem:[#allocation24_spill] sm:$0xff] %v4357_v11  ;;  %v4360_v15 = vrot.slane %v1262_v45, %v4038_v25 }
  0xa6   :  { %v1077_v9 = vpop.permute.xlu1 %1076  ;;  %3704 = vmatprep.subr.msk.bf16.mxu0 %vm167_vm1, %v968_v62  ;;  %3706 = vmatprep.subr.msk.bf16.mxu1 %vm167_vm1, %v970_v56  ;;  %v1075_v61 = vpop.permute.xlu0 %1074  ;;  %v983_v37 = vsel %vm167_vm1, %v969_v63, 0 }
  0xa7   :  { %v1083_v20 = vsel %vm1082_vm8, %v1075_v61, %v1077_v9  ;;  %4876 = vst [vmem:[#allocation19_spill] sm:$0xff] %v4322_v18  ;;  %v4346_v62 = vrot.slane %v1248_v38, %v4038_v25  ;;  %4882 = vst [vmem:[#allocation25_spill] sm:$0xff] %v4360_v15 }
  0xa8   :  { %v1110_v48 = vmul.bf16 %v4315_v10, %v1083_v20 }
  0xa9   :  { %4879 = vst [vmem:[#allocation22_spill] sm:$0xff] %v4346_v62 }
  0xaa   :  { %3700 = vmatmul.mubr.msk.bf16.vlgmr.msra.gmra.mxu0 %vm163_vm3, %v3698_v16  ;;  %3702 = vmatmul.mubr.msk.bf16.vlgmr.msra.gmra.mxu1 %vm163_vm3, %v3698_v16  ;;  %v1081_v26 = vpop.permute.xlu1 %1080  ;;  %v1079_v39 = vpop.permute.xlu0 %1078 }
  0xab   :  { %1003 = vmatpush1.bf16.msra.mxu0 %v977_v22  ;;  %v1092_v27 = vsel %vm1082_vm8, %v1081_v26, %v1075_v61  ;;  %v1084_v29 = vsel %vm1082_vm8, %v1077_v9, %v1079_v39  ;;  %v1085_v0 = vsel %vm1082_vm8, %v1079_v39, %v1081_v26  ;;  %1044 = vmatpush1.bf16.msra.mxu1 %v983_v37  ;;  %v1120_v61 = vsel %vm167_vm1, %v1110_v48, 0 }
  0xac   :  { %v1113_v41 = vmul.bf16 %v4322_v18, %v1092_v27  ;;  %v1111_v49 = vmul.bf16 %v4326_v60, %v1084_v29  ;;  %v1112_v50 = vmul.bf16 %v4329_v28, %v1085_v0  ;;  %1020 = vmatprep.mubr.bf16.mxu0 %v4833_v4  ;;  %1061 = vmatprep.mubr.bf16.mxu1 %v4833_v4  ;;  %v3708_v27 = vld [vmem:[%s4827_s3 + $0x1c] sm:$0xf] }
  0xad   :  { %v4353_v9 = vrot.slane %v1269_v46, %v4038_v25 }
  0xae   :  { %v1220_v56 = vpop.permute.xlu1 %1219  ;;  %3709 = vmatprep.subr.msk.bf16.mxu0 %vm167_vm1, %v1111_v49  ;;  %3711 = vmatprep.subr.msk.bf16.mxu1 %vm167_vm1, %v1113_v41  ;;  %v1218_v63 = vpop.permute.xlu0 %1217  ;;  %v1126_v16 = vsel %vm167_vm1, %v1112_v50, 0 }
  0xaf   :  { %v1226_v1 = vsel %vm1225_vm9, %v1218_v63, %v1220_v56  ;;  %4880 = vst [vmem:[#allocation23_spill] sm:$0xff] %v4353_v9 }
  0xb0   :  { %v1275_v20 = vmul.bf16 %v4346_v62, %v1226_v1 }
  0xb2   :  { %3705 = vmatmul.mubr.msk.bf16.vlgmr.msra.gmra.mxu0 %vm163_vm3, %v3703_v2  ;;  %3707 = vmatmul.mubr.msk.bf16.vlgmr.msra.gmra.mxu1 %vm163_vm3, %v3703_v2  ;;  %v1224_v22 = vpop.permute.xlu1 %1223  ;;  %v1222_v37 = vpop.permute.xlu0 %1221  ;;  %v1285_v0 = vsel %vm167_vm1, %v1275_v20, 0 }
  0xb3   :  { %1146 = vmatpush1.bf16.msra.mxu0 %v1120_v61  ;;  %v1235_v38 = vsel %vm1225_vm9, %v1224_v22, %v1218_v63  ;;  %v1227_v46 = vsel %vm1225_vm9, %v1220_v56, %v1222_v37  ;;  %v1228_v48 = vsel %vm1225_vm9, %v1222_v37, %v1224_v22  ;;  %1187 = vmatpush1.bf16.msra.mxu1 %v1126_v16 }
  0xb4   :  { %v1278_v25 = vmul.bf16 %v4353_v9, %v1235_v38  ;;  %v1276_v26 = vmul.bf16 %v4357_v11, %v1227_v46  ;;  %v1277_v39 = vmul.bf16 %v4360_v15, %v1228_v48  ;;  %1163 = vmatprep.mubr.bf16.mxu0 %v4833_v4  ;;  %1204 = vmatprep.mubr.bf16.mxu1 %v4833_v4  ;;  %v3717_v38 = vld [vmem:[%s4827_s3 + $0x20] sm:$0xf] }
  0xb6   :  { %v1420_v40 = vpop.permute.xlu1 %1419  ;;  %3718 = vmatprep.subr.msk.bf16.mxu0 %vm167_vm1, %v1276_v26  ;;  %3720 = vmatprep.subr.msk.bf16.mxu1 %vm167_vm1, %v1278_v25  ;;  %v1418_v45 = vpop.permute.xlu0 %1417  ;;  %v1291_v41 = vsel %vm167_vm1, %v1277_v39, 0 }
  0xb7   :  { %v1433_v29 = vsel %vm117_vm0, %v1418_v45, %v1420_v40 }
  0xb8   :  { %v1435_v49 = vmul.bf16 %v1433_v29, %v4062_v34 }
  0xba   :  { %3710 = vmatmul.mubr.msk.bf16.vlgmr.msra.gmra.mxu0 %vm163_vm3, %v3708_v27  ;;  %3712 = vmatmul.mubr.msk.bf16.vlgmr.msra.gmra.mxu1 %vm163_vm3, %v3708_v27  ;;  %v1424_v50 = vpop.permute.xlu1 %1423  ;;  %v1422_v56 = vpop.permute.xlu0 %1421  ;;  %v1445_v48 = vsel %vm167_vm1, %v1435_v49, 0 }
  0xbb   :  { %1311 = vmatpush1.bf16.msra.mxu0 %v1285_v0  ;;  %v1427_v63 = vsel %vm117_vm0, %v1424_v50, %v1418_v45  ;;  %v1425_v2 = vsel %vm117_vm0, %v1420_v40, %v1422_v56  ;;  %v1426_v1 = vsel %vm117_vm0, %v1422_v56, %v1424_v50  ;;  %1352 = vmatpush1.bf16.msra.mxu1 %v1291_v41 }
  0xbc   :  { %v1438_v61 = vmul.bf16 %v1427_v63, %v4054_v32  ;;  %v1436_v16 = vmul.bf16 %v1425_v2, %v4058_v33  ;;  %v1437_v20 = vmul.bf16 %v1426_v1, %v4066_v35  ;;  %1328 = vmatprep.mubr.bf16.mxu0 %v4833_v4  ;;  %1369 = vmatprep.mubr.bf16.mxu1 %v4833_v4  ;;  %v3726_v63 = vld [vmem:[%s4828_s4 + $0x4] sm:$0xf] }
  0xbe   :  { %v1397_v22 = vpop.permute.xlu1 %1396  ;;  %3727 = vmatprep.subr.msk.bf16.mxu0 %vm167_vm1, %v1436_v16  ;;  %3729 = vmatprep.subr.msk.bf16.mxu1 %vm167_vm1, %v1438_v61  ;;  %v1388_v37 = vpop.permute.xlu0 %1387  ;;  %v1451_v25 = vsel %vm167_vm1, %v1437_v20, 0 }
  0xbf   :  { %v1410_v46 = vsel %vm54_vm2, %v1388_v37, %v1397_v22 }
  0xc0   :  { %v1412_v26 = vmul.bf16 %v1410_v46, %v4096_v51 }
  0xc2   :  { %3719 = vmatmul.mubr.msk.bf16.vlgmr.msra.gmra.mxu0 %vm163_vm3, %v3717_v38  ;;  %3721 = vmatmul.mubr.msk.bf16.vlgmr.msra.gmra.mxu1 %vm163_vm3, %v3717_v38  ;;  %v1401_v39 = vpop.permute.xlu1 %1400  ;;  %v1399_v40 = vpop.permute.xlu0 %1398  ;;  %v1542_v1 = vsel %vm167_vm1, %v1412_v26, 0 }
  0xc3   :  { %1471 = vmatpush1.bf16.msra.mxu0 %v1445_v48  ;;  %v1404_v45 = vsel %vm54_vm2, %v1401_v39, %v1388_v37  ;;  %v1402_v27 = vsel %vm54_vm2, %v1397_v22, %v1399_v40  ;;  %v1403_v29 = vsel %vm54_vm2, %v1399_v40, %v1401_v39  ;;  %1512 = vmatpush1.bf16.msra.mxu1 %v1451_v25 }
  0xc4   :  { %v1415_v0 = vmul.bf16 %v1404_v45, %v4106_v57  ;;  %v1413_v41 = vmul.bf16 %v1402_v27, %v4110_v58  ;;  %v1414_v49 = vmul.bf16 %v1403_v29, %v4114_v59  ;;  %1488 = vmatprep.mubr.bf16.mxu0 %v4833_v4  ;;  %1529 = vmatprep.mubr.bf16.mxu1 %v4833_v4  ;;  %v1416_v45 = vld [vmem:[%s4828_s4] sm:$0xf] }
  0xc6   :  { %v1638_v50 = vpop.permute.xlu1 %1637  ;;  %3731 = vmatprep.subr.msk.bf16.mxu0 %vm167_vm1, %v1413_v41  ;;  %3733 = vmatprep.subr.msk.bf16.mxu1 %vm167_vm1, %v1415_v0  ;;  %v1636_v56 = vpop.permute.xlu0 %1635  ;;  %v1548_v61 = vsel %vm167_vm1, %v1414_v49, 0 }
  0xc7   :  { %v1651_v2 = vsel %vm367_vm4, %v1636_v56, %v1638_v50 }
  0xc8   :  { %v1653_v16 = vmul.bf16 %v1651_v2, %v4139_v12 }
  0xca   :  { %3728 = vmatmul.mubr.msk.bf16.vlgmr.msra.gmra.mxu0 %vm163_vm3, %v3726_v63  ;;  %3730 = vmatmul.mubr.msk.bf16.vlgmr.msra.gmra.mxu1 %vm163_vm3, %v3726_v63  ;;  %v1642_v20 = vpop.permute.xlu1 %1641  ;;  %v1640_v22 = vpop.permute.xlu0 %1639  ;;  %v1663_v29 = vsel %vm167_vm1, %v1653_v16, 0 }
  0xcb   :  { %1568 = vmatpush1.bf16.msra.mxu0 %v1542_v1  ;;  %v1645_v37 = vsel %vm367_vm4, %v1642_v20, %v1636_v56  ;;  %v1643_v38 = vsel %vm367_vm4, %v1638_v50, %v1640_v22  ;;  %v1644_v46 = vsel %vm367_vm4, %v1640_v22, %v1642_v20  ;;  %1609 = vmatpush1.bf16.msra.mxu1 %v1548_v61  ;;  %v2504_v56 = vld [vmem:[%s4829_s5] sm:$0xff] }
  0xcc   :  { %v1656_v48 = vmul.bf16 %v1645_v37, %v4167_v24  ;;  %v1654_v25 = vmul.bf16 %v1643_v38, %v4171_v30  ;;  %v1655_v26 = vmul.bf16 %v1644_v46, %v4175_v31  ;;  %1585 = vmatprep.mubr.bf16.mxu0 %v4833_v4  ;;  %1626 = vmatprep.mubr.bf16.mxu1 %v4833_v4 }
  0xcd   :  { %v1885_v22 = vmul.bf16 %v4179_v36, %v3956_v7  ;;  %v1886_v37 = vmul.bf16 %v4186_v44, %v3961_v8  ;;  %2507 = vperm.xlu0 %3831, %v2504_v56  }
  0xce   :  { %v1763_v39 = vpop.permute.xlu1 %1762  ;;  %3736 = vmatprep.subr.msk.bf16.mxu0 %vm167_vm1, %v1654_v25  ;;  %3738 = vmatprep.subr.msk.bf16.mxu1 %vm167_vm1, %v1656_v48  ;;  %v1761_v40 = vpop.permute.xlu0 %1760  ;;  %v1669_v0 = vsel %vm167_vm1, %v1655_v26, 0  ;;  %v3735_v48 = vld [vmem:[%s4828_s4 + $0x8] sm:$0xf] }
  0xcf   :  { %v1776_v27 = vsel %vm510_vm5, %v1761_v40, %v1763_v39  ;;  %v3749_v7 = vcombine.high %v1886_v37, %v1886_v37  ;;  %v3746_v44 = vcombine.low %v1885_v22, %v1885_v22 }
  0xd0   :  { %v1778_v41 = vmul.bf16 %v1776_v27, %v4202_v54 }
  0xd2   :  { %3732 = vmatmul.mubr.msk.bf16.vlgmr.msra.gmra.mxu0 %vm163_vm3, %v1416_v45  ;;  %3734 = vmatmul.mubr.msk.bf16.vlgmr.msra.gmra.mxu1 %vm163_vm3, %v1416_v45  ;;  %v1767_v49 = vpop.permute.xlu1 %1766  ;;  %v1765_v50 = vpop.permute.xlu0 %1764  ;;  %v1788_v25 = vsel %vm167_vm1, %v1778_v41, 0  ;;  %v3740_v41 = vld [vmem:[%s4828_s4 + $0xc] sm:$0xf] }
  0xd3   :  { %1689 = vmatpush1.bf16.msra.mxu0 %v1663_v29  ;;  %v1770_v63 = vsel %vm510_vm5, %v1767_v49, %v1761_v40  ;;  %v1768_v2 = vsel %vm510_vm5, %v1763_v39, %v1765_v50  ;;  %v1769_v1 = vsel %vm510_vm5, %v1765_v50, %v1767_v49  ;;  %1730 = vmatpush1.bf16.msra.mxu1 %v1669_v0  ;;  %v1903_v49 = vsel %vm167_vm1, %v3746_v44, 0 }
  0xd4   :  { %v1781_v61 = vmul.bf16 %v1770_v63, %v4214_v3  ;;  %v1779_v16 = vmul.bf16 %v1768_v2, %v4218_v5  ;;  %v1780_v20 = vmul.bf16 %v1769_v1, %v4222_v6  ;;  %1706 = vmatprep.mubr.bf16.mxu0 %v4833_v4  ;;  %1747 = vmatprep.mubr.bf16.mxu1 %v4833_v4 }
  0xd5   :  { %v3747_v39 = vcombine.high %v1885_v22, %v1885_v22  ;;  %v3748_v40 = vcombine.low %v1886_v37, %v1886_v37 }
  0xd6   :  { %3741 = vmatprep.subr.msk.bf16.mxu0 %vm167_vm1, %v1779_v16  ;;  %3743 = vmatprep.subr.msk.bf16.mxu1 %vm167_vm1, %v1781_v61  ;;  %v2003_v38 = vpop.permute.xlu1 %2002  ;;  %v2001_v46 = vpop.permute.xlu0 %2000  ;;  %v1794_v26 = vsel %vm167_vm1, %v1780_v20, 0 }
  0xd7   :  { %v1909_v50 = vsel %vm167_vm1, %v3748_v40, 0  ;;  %v2008_v56 = vsel %vm796_vm6, %v2001_v46, %v2003_v38 }
  0xd8   :  { %v2018_v20 = vmul.bf16 %v2008_v56, %v4241_v47 }
  0xda   :  { %3737 = vmatmul.mubr.msk.bf16.vlgmr.msra.gmra.mxu0 %vm163_vm3, %v3735_v48  ;;  %3739 = vmatmul.mubr.msk.bf16.vlgmr.msra.gmra.mxu1 %vm163_vm3, %v3735_v48  ;;  %v2007_v8 = vpop.permute.xlu1 %2006  ;;  %v2005_v36 = vpop.permute.xlu0 %2004 }
  0xdb   :  { %1814 = vmatpush1.bf16.msra.mxu0 %v1788_v25  ;;  %1855 = vmatpush1.bf16.msra.mxu1 %v1794_v26  ;;  %v2016_v45 = vsel %vm796_vm6, %v2007_v8, %v2001_v46  ;;  %v2009_v27 = vsel %vm796_vm6, %v2003_v38, %v2005_v36  ;;  %v2010_v2 = vsel %vm796_vm6, %v2005_v36, %v2007_v8  ;;  %v3745_v25 = vld [vmem:[%s4828_s4 + $0x10] sm:$0xf]  ;;  %v2028_v26 = vsel %vm167_vm1, %v2018_v20, 0 }
  0xdc   :  { %1831 = vmatprep.mubr.bf16.mxu0 %v4833_v4  ;;  %1872 = vmatprep.mubr.bf16.mxu1 %v4833_v4  ;;  %v2021_v63 = vmul.bf16 %v2016_v45, %v4249_v52  ;;  %v2019_v1 = vmul.bf16 %v2009_v27, %v4255_v53  ;;  %v2020_v22 = vmul.bf16 %v2010_v2, %v4259_v55 }
  0xdd   :  { %3750 = vmatprep.subr.msk.bf16.mxu0 %vm167_vm1, %v3747_v39  ;;  %3752 = vmatprep.subr.msk.bf16.mxu1 %vm167_vm1, %v3749_v7 }
  0xde   :  { %v2128_v29 = vpop.permute.xlu1 %2127  ;;  %v2126_v0 = vpop.permute.xlu0 %2125  ;;  %v2034_v39 = vsel %vm167_vm1, %v2020_v22, 0 }
  0xdf   :  { %v2133_v7 = vsel %vm939_vm7, %v2126_v0, %v2128_v29 }
  0xe0   :  { %v2143_v27 = vmul.bf16 %v2133_v7, %v4278_v17 }
  0xe2   :  { %3742 = vmatmul.mubr.msk.bf16.vlgmr.msra.gmra.mxu0 %vm163_vm3, %v3740_v41  ;;  %3744 = vmatmul.mubr.msk.bf16.vlgmr.msra.gmra.mxu1 %vm163_vm3, %v3740_v41  ;;  %v2132_v61 = vpop.permute.xlu1 %2131  ;;  %v2130_v16 = vpop.permute.xlu0 %2129 }
  0xe3   :  { %1929 = vmatpush1.bf16.msra.mxu0 %v1903_v49  ;;  %1970 = vmatpush1.bf16.msra.mxu1 %v1909_v50  ;;  %v2141_v37 = vsel %vm939_vm7, %v2132_v61, %v2126_v0  ;;  %v2134_v38 = vsel %vm939_vm7, %v2128_v29, %v2130_v16  ;;  %v2135_v36 = vsel %vm939_vm7, %v2130_v16, %v2132_v61  ;;  %v3754_v50 = vld [vmem:[%s4828_s4 + $0x14] sm:$0xf] }
  0xe4   :  { %1946 = vmatprep.mubr.bf16.mxu0 %v4833_v4  ;;  %1987 = vmatprep.mubr.bf16.mxu1 %v4833_v4  ;;  %v2146_v8 = vmul.bf16 %v2141_v37, %v4285_v23  ;;  %v2144_v44 = vmul.bf16 %v2134_v38, %v4289_v42  ;;  %v2145_v41 = vmul.bf16 %v2135_v36, %v4292_v43 }
  0xe5   :  { %3755 = vmatprep.subr.msk.bf16.mxu0 %vm167_vm1, %v2019_v1  ;;  %3757 = vmatprep.subr.msk.bf16.mxu1 %vm167_vm1, %v2021_v63  ;;  %v2153_v63 = vsel %vm167_vm1, %v2143_v27, 0 }
  0xe6   :  { %v2253_v46 = vpop.permute.xlu1 %2252  ;;  %v2251_v48 = vpop.permute.xlu0 %2250  ;;  %v2159_v2 = vsel %vm167_vm1, %v2145_v41, 0  ;;  %v3764_v41 = vld [vmem:[%s4828_s4 + $0x1c] sm:$0xf] }
  0xe7   :  { %v2258_v1 = vsel %vm1082_vm8, %v2251_v48, %v2253_v46 }
  0xe8   :  { %v2268_v38 = vmul.bf16 %v2258_v1, %v4315_v10 }
  0xea   :  { %3751 = vmatmul.mubr.msk.bf16.vlgmr.msra.gmra.mxu0 %vm163_vm3, %v3745_v25  ;;  %3753 = vmatmul.mubr.msk.bf16.vlgmr.msra.gmra.mxu1 %vm163_vm3, %v3745_v25  ;;  %v2257_v40 = vpop.permute.xlu1 %2256  ;;  %v2255_v45 = vpop.permute.xlu0 %2254 }
  0xeb   :  { %2054 = vmatpush1.bf16.msra.mxu0 %v2028_v26  ;;  %2095 = vmatpush1.bf16.msra.mxu1 %v2034_v39  ;;  %v2266_v29 = vsel %vm1082_vm8, %v2257_v40, %v2251_v48  ;;  %v2259_v0 = vsel %vm1082_vm8, %v2253_v46, %v2255_v45  ;;  %v2260_v16 = vsel %vm1082_vm8, %v2255_v45, %v2257_v40  ;;  %v3759_v26 = vld [vmem:[%s4828_s4 + $0x18] sm:$0xf]  ;;  %v2278_v39 = vsel %vm167_vm1, %v2268_v38, 0 }
  0xec   :  { %2071 = vmatprep.mubr.bf16.mxu0 %v4833_v4  ;;  %2112 = vmatprep.mubr.bf16.mxu1 %v4833_v4  ;;  %v2271_v61 = vmul.bf16 %v2266_v29, %v4322_v18  ;;  %v2269_v20 = vmul.bf16 %v2259_v0, %v4326_v60  ;;  %v2270_v25 = vmul.bf16 %v2260_v16, %v4329_v28 }
  0xed   :  { %3760 = vmatprep.subr.msk.bf16.mxu0 %vm167_vm1, %v2144_v44  ;;  %3762 = vmatprep.subr.msk.bf16.mxu1 %vm167_vm1, %v2146_v8 }
  0xee   :  { %v2378_v49 = vpop.permute.xlu1 %2377  ;;  %v2284_v7 = vsel %vm167_vm1, %v2270_v25, 0 }
  0xef   :  { %v2376_v56 = vpop.permute.xlu0 %2375 }
  0xf0   :  { %v2383_v8 = vsel %vm1225_vm9, %v2376_v56, %v2378_v49 }
  0xf1   :  { %v2393_v45 = vmul.bf16 %v2383_v8, %v4346_v62 }
  0xf2   :  { %3756 = vmatmul.mubr.msk.bf16.vlgmr.msra.gmra.mxu0 %vm163_vm3, %v3754_v50  ;;  %3758 = vmatmul.mubr.msk.bf16.vlgmr.msra.gmra.mxu1 %vm163_vm3, %v3754_v50  ;;  %v2382_v22 = vpop.permute.xlu1 %2381 }
  0xf3   :  { %2179 = vmatpush1.bf16.msra.mxu0 %v2153_v63  ;;  %2220 = vmatpush1.bf16.msra.mxu1 %v2159_v2  ;;  %v2380_v37 = vpop.permute.xlu0 %2379  ;;  %v2391_v46 = vsel %vm1225_vm9, %v2382_v22, %v2376_v56  ;;  %v2403_v29 = vsel %vm167_vm1, %v2393_v45, 0 }
  0xf4   :  { %2196 = vmatprep.mubr.bf16.mxu0 %v4833_v4  ;;  %2237 = vmatprep.mubr.bf16.mxu1 %v4833_v4  ;;  %v2384_v48 = vsel %vm1225_vm9, %v2378_v49, %v2380_v37  ;;  %v2396_v36 = vmul.bf16 %v2391_v46, %v4353_v9  ;;  %v2385_v44 = vsel %vm1225_vm9, %v2380_v37, %v2382_v22  ;;  %v3769_v49 = vld [vmem:[%s4828_s4 + $0x20] sm:$0xf] }
  0xf5   :  { %3765 = vmatprep.subr.msk.bf16.mxu0 %vm167_vm1, %v2269_v20  ;;  %3767 = vmatprep.subr.msk.bf16.mxu1 %vm167_vm1, %v2271_v61  ;;  %v2394_v40 = vmul.bf16 %v2384_v48, %v4357_v11  ;;  %v2395_v27 = vmul.bf16 %v2385_v44, %v4360_v15 }
  0xf7   :  { %v2409_v0 = vsel %vm167_vm1, %v2395_v27, 0 }
  0xfa   :  { %3761 = vmatmul.mubr.msk.bf16.vlgmr.msra.gmra.mxu0 %vm163_vm3, %v3759_v26  ;;  %3763 = vmatmul.mubr.msk.bf16.vlgmr.msra.gmra.mxu1 %vm163_vm3, %v3759_v26 }
  0xfb   :  { %2304 = vmatpush1.bf16.msra.mxu0 %v2278_v39  ;;  %2345 = vmatpush1.bf16.msra.mxu1 %v2284_v7 }
  0xfc   :  { %2321 = vmatprep.mubr.bf16.mxu0 %v4833_v4  ;;  %2362 = vmatprep.mubr.bf16.mxu1 %v4833_v4 }
  0xfd   :  { %3770 = vmatprep.subr.msk.bf16.mxu0 %vm167_vm1, %v2394_v40  ;;  %3772 = vmatprep.subr.msk.bf16.mxu1 %vm167_vm1, %v2396_v36 }
 0x102   :  { %3766 = vmatmul.mubr.msk.bf16.vlgmr.msra.gmra.mxu0 %vm163_vm3, %v3764_v41  ;;  %3768 = vmatmul.mubr.msk.bf16.vlgmr.msra.gmra.mxu1 %vm163_vm3, %v3764_v41 }
 0x103   :  { %2429 = vmatpush1.bf16.msra.mxu0 %v2403_v29  ;;  %2470 = vmatpush1.bf16.msra.mxu1 %v2409_v0 }
 0x104   :  { %2446 = vmatprep.mubr.bf16.mxu0 %v4833_v4  ;;  %2487 = vmatprep.mubr.bf16.mxu1 %v4833_v4 }
 0x10a   :  { %3771 = vmatmul.mubr.msk.bf16.vlgmr.msra.gmra.mxu0 %vm163_vm3, %v3769_v49  ;;  %3773 = vmatmul.mubr.msk.bf16.vlgmr.msra.gmra.mxu1 %vm163_vm3, %v3769_v49 }
 0x10b   :  { %2620 = vmatprep.mubr.bf16.mxu0 %v4833_v4  ;;  %2661 = vmatprep.mubr.bf16.mxu1 %v4833_v4 }
 0x142   :  { %v214_v50 = vpop.f32.mrf.mxu0  ;;  %v255_v56 = vpop.f32.mrf.mxu1 }
 0x144   :  { %v216_v63 = vpop.f32.mrf.mxu0  ;;  %v257_v2 = vpop.f32.mrf.mxu1 }
 0x146   :  { %v218_v1 = vpop.f32.mrf.mxu0  ;;  %v259_v61 = vpop.f32.mrf.mxu1 }
 0x148   :  { %v219_v16 = vpop.f32.mrf.mxu0  ;;  %v260_v20 = vpop.f32.mrf.mxu1 }
 0x14a   :  { %v311_v22 = vpop.f32.mrf.mxu0  ;;  %v352_v37 = vpop.f32.mrf.mxu1 }
 0x14b   :  { %v312_v38 = vadd.f32 %v311_v22, %v214_v50  ;;  %v353_v25 = vadd.f32 %v352_v37, %v255_v56 }
 0x14c   :  { %v313_v46 = vpop.f32.mrf.mxu0  ;;  %v354_v48 = vpop.f32.mrf.mxu1 }
 0x14d   :  { %v314_v26 = vadd.f32 %v313_v46, %v216_v63  ;;  %v355_v39 = vadd.f32 %v354_v48, %v257_v2 }
 0x14e   :  { %v315_v7 = vpop.f32.mrf.mxu0  ;;  %v356_v8 = vpop.f32.mrf.mxu1 }
 0x150   :  { %v316_v36 = vpop.f32.mrf.mxu0  ;;  %v357_v44 = vpop.f32.mrf.mxu1 }
 0x152   :  { %v450_v40 = vpop.f32.mrf.mxu0  ;;  %v491_v45 = vpop.f32.mrf.mxu1 }
 0x153   :  { %v498_v27 = vadd.f32 %v450_v40, %v312_v38  ;;  %v500_v41 = vadd.f32 %v491_v45, %v353_v25 }
 0x154   :  { %v452_v29 = vpop.f32.mrf.mxu0  ;;  %v493_v0 = vpop.f32.mrf.mxu1 }
 0x155   :  { %v499_v49 = vadd.f32 %v452_v29, %v314_v26  ;;  %v501_v1 = vadd.f32 %v493_v0, %v355_v39 }
 0x156   :  { %v454_v61 = vpop.f32.mrf.mxu0  ;;  %v495_v16 = vpop.f32.mrf.mxu1 }
 0x158   :  { %v455_v50 = vpop.f32.mrf.mxu0  ;;  %v496_v56 = vpop.f32.mrf.mxu1 }
 0x15a   :  { %v593_v20 = vpop.f32.mrf.mxu0  ;;  %v634_v22 = vpop.f32.mrf.mxu1 }
 0x15b   :  { %v641_v63 = vadd.f32 %v593_v20, %v498_v27  ;;  %v643_v2 = vadd.f32 %v634_v22, %v500_v41 }
 0x15c   :  { %v595_v37 = vpop.f32.mrf.mxu0  ;;  %v636_v46 = vpop.f32.mrf.mxu1 }
 0x15d   :  { %v642_v48 = vadd.f32 %v595_v37, %v499_v49  ;;  %v644_v7 = vadd.f32 %v636_v46, %v501_v1 }
 0x15e   :  { %v597_v8 = vpop.f32.mrf.mxu0  ;;  %v638_v36 = vpop.f32.mrf.mxu1 }
 0x160   :  { %v598_v38 = vpop.f32.mrf.mxu0  ;;  %v639_v25 = vpop.f32.mrf.mxu1 }
 0x162   :  { %v736_v44 = vpop.f32.mrf.mxu0  ;;  %v777_v40 = vpop.f32.mrf.mxu1 }
 0x163   :  { %v784_v26 = vadd.f32 %v736_v44, %v641_v63  ;;  %v786_v39 = vadd.f32 %v777_v40, %v643_v2 }
 0x164   :  { %v738_v45 = vpop.f32.mrf.mxu0  ;;  %v779_v29 = vpop.f32.mrf.mxu1 }
 0x165   :  { %v785_v0 = vadd.f32 %v738_v45, %v642_v48  ;;  %v787_v61 = vadd.f32 %v779_v29, %v644_v7 }
 0x166   :  { %v740_v16 = vpop.f32.mrf.mxu0  ;;  %v781_v50 = vpop.f32.mrf.mxu1 }
 0x168   :  { %v741_v27 = vpop.f32.mrf.mxu0  ;;  %v782_v41 = vpop.f32.mrf.mxu1 }
 0x16a   :  { %v879_v56 = vpop.f32.mrf.mxu0  ;;  %v920_v20 = vpop.f32.mrf.mxu1 }
 0x16b   :  { %v927_v49 = vadd.f32 %v879_v56, %v784_v26  ;;  %v929_v1 = vadd.f32 %v920_v20, %v786_v39 }
 0x16c   :  { %v881_v22 = vpop.f32.mrf.mxu0  ;;  %v922_v37 = vpop.f32.mrf.mxu1 }
 0x16d   :  { %v928_v46 = vadd.f32 %v881_v22, %v785_v0  ;;  %v930_v8 = vadd.f32 %v922_v37, %v787_v61 }
 0x16e   :  { %v883_v36 = vpop.f32.mrf.mxu0  ;;  %v924_v38 = vpop.f32.mrf.mxu1 }
 0x170   :  { %v884_v63 = vpop.f32.mrf.mxu0  ;;  %v925_v2 = vpop.f32.mrf.mxu1 }
 0x172   :  { %v1022_v25 = vpop.f32.mrf.mxu0  ;;  %v1063_v44 = vpop.f32.mrf.mxu1 }
 0x173   :  { %v1070_v48 = vadd.f32 %v1022_v25, %v927_v49  ;;  %v1072_v7 = vadd.f32 %v1063_v44, %v929_v1 }
 0x174   :  { %v1024_v40 = vpop.f32.mrf.mxu0  ;;  %v1065_v45 = vpop.f32.mrf.mxu1 }
 0x175   :  { %v1071_v29 = vadd.f32 %v1024_v40, %v928_v46  ;;  %v1073_v16 = vadd.f32 %v1065_v45, %v930_v8 }
 0x176   :  { %v1026_v50 = vpop.f32.mrf.mxu0  ;;  %v1067_v27 = vpop.f32.mrf.mxu1 }
 0x178   :  { %v1027_v26 = vpop.f32.mrf.mxu0  ;;  %v1068_v39 = vpop.f32.mrf.mxu1 }
 0x17a   :  { %v1165_v41 = vpop.f32.mrf.mxu0  ;;  %v1206_v56 = vpop.f32.mrf.mxu1 }
 0x17b   :  { %v1213_v0 = vadd.f32 %v1165_v41, %v1070_v48  ;;  %v1215_v61 = vadd.f32 %v1206_v56, %v1072_v7 }
 0x17c   :  { %v1167_v20 = vpop.f32.mrf.mxu0  ;;  %v1208_v22 = vpop.f32.mrf.mxu1 }
 0x17d   :  { %v1214_v37 = vadd.f32 %v1167_v20, %v1071_v29  ;;  %v1216_v36 = vadd.f32 %v1208_v22, %v1073_v16 }
 0x17e   :  { %v1169_v38 = vpop.f32.mrf.mxu0  ;;  %v1210_v63 = vpop.f32.mrf.mxu1 }
 0x180   :  { %v1170_v49 = vpop.f32.mrf.mxu0  ;;  %v1211_v1 = vpop.f32.mrf.mxu1 }
 0x182   :  { %v1330_v2 = vpop.f32.mrf.mxu0  ;;  %v1371_v25 = vpop.f32.mrf.mxu1 }
 0x183   :  { %v4562_v46 = vadd.f32 %v1330_v2, %v1213_v0  ;;  %v4564_v8 = vadd.f32 %v1371_v25, %v1215_v61 }
 0x184   :  { %v1332_v44 = vpop.f32.mrf.mxu0  ;;  %v1373_v40 = vpop.f32.mrf.mxu1 }
 0x185   :  { %v4566_v45 = vadd.f32 %v1332_v44, %v1214_v37  ;;  %v4568_v48 = vadd.f32 %v1373_v40, %v1216_v36 }
 0x186   :  { %v1334_v7 = vpop.f32.mrf.mxu0  ;;  %v1375_v50 = vpop.f32.mrf.mxu1 }
 0x188   :  { %v1335_v29 = vpop.f32.mrf.mxu0  ;;  %v1376_v16 = vpop.f32.mrf.mxu1 }
 0x18a   :  { %v1490_v27 = vpop.f32.mrf.mxu0  ;;  %v1531_v26 = vpop.f32.mrf.mxu1 }
 0x18c   :  { %v1492_v39 = vpop.f32.mrf.mxu0  ;;  %v1533_v41 = vpop.f32.mrf.mxu1 }
 0x18e   :  { %v1494_v56 = vpop.f32.mrf.mxu0  ;;  %v1535_v20 = vpop.f32.mrf.mxu1 }
 0x190   :  { %v1495_v0 = vpop.f32.mrf.mxu0  ;;  %v1536_v22 = vpop.f32.mrf.mxu1 }
 0x192   :  { %v1587_v61 = vpop.f32.mrf.mxu0  ;;  %v1628_v38 = vpop.f32.mrf.mxu1 }
 0x193   :  { %v1588_v55 = vadd.f32 %v1587_v61, %v1490_v27  ;;  %v1629_v47 = vadd.f32 %v1628_v38, %v1531_v26 }
 0x194   :  { %v1589_v63 = vpop.f32.mrf.mxu0  ;;  %v1630_v49 = vpop.f32.mrf.mxu1 }
 0x196   :  { %v1591_v37 = vpop.f32.mrf.mxu0  ;;  %v1632_v1 = vpop.f32.mrf.mxu1 }
 0x198   :  { %v1592_v36 = vpop.f32.mrf.mxu0  ;;  %v1633_v2 = vpop.f32.mrf.mxu1 }
 0x19a   :  { %v1708_v25 = vpop.f32.mrf.mxu0  ;;  %v1749_v44 = vpop.f32.mrf.mxu1 }
 0x19c   :  { %v1710_v40 = vpop.f32.mrf.mxu0  ;;  %v1751_v7 = vpop.f32.mrf.mxu1 }
 0x19e   :  { %v1712_v50 = vpop.f32.mrf.mxu0  ;;  %v1753_v29 = vpop.f32.mrf.mxu1 }
 0x1a0   :  { %v1713_v16 = vpop.f32.mrf.mxu0  ;;  %v1754_v4 = vpop.f32.mrf.mxu1 }
 0x1a2   :  { %v1833_v56 = vpop.f32.mrf.mxu0  ;;  %v1874_v20 = vpop.f32.mrf.mxu1 }
 0x1a4   :  { %v1835_v0 = vpop.f32.mrf.mxu0  ;;  %v1876_v22 = vpop.f32.mrf.mxu1 }
 0x1a6   :  { %v1837_v15 = vpop.f32.mrf.mxu0  ;;  %v1878_v62 = vpop.f32.mrf.mxu1 }
 0x1a8   :  { %v1838_v9 = vpop.f32.mrf.mxu0  ;;  %v1879_v11 = vpop.f32.mrf.mxu1 }
 0x1aa   :  { %v1948_v37 = vpop.f32.mrf.mxu0  ;;  %v1989_v1 = vpop.f32.mrf.mxu1 }
 0x1ac   :  { %v1950_v36 = vpop.f32.mrf.mxu0  ;;  %v1991_v2 = vpop.f32.mrf.mxu1 }
 0x1ae   :  { %v1952_v28 = vpop.f32.mrf.mxu0  ;;  %v1993_v10 = vpop.f32.mrf.mxu1 }
 0x1af   :  { %v1590_v28 = vadd.f32 %v1589_v63, %v1492_v39  ;;  %v1631_v10 = vadd.f32 %v1630_v49, %v1533_v41 }
 0x1b0   :  { %v1953_v18 = vpop.f32.mrf.mxu0  ;;  %v1994_v60 = vpop.f32.mrf.mxu1 }
 0x1b1   :  { %v1756_v18 = vadd.f32 %v1708_v25, %v1588_v55  ;;  %v1758_v60 = vadd.f32 %v1749_v44, %v1629_v47  ;;  %v1757_v21 = vadd.f32 %v1710_v40, %v1590_v28  ;;  %v1759_v3 = vadd.f32 %v1751_v7, %v1631_v10 }
 0x1b2   :  { %v2073_v50 = vpop.f32.mrf.mxu0  ;;  %v2114_v29 = vpop.f32.mrf.mxu1 }
 0x1b3   :  { %v1882_v6 = vadd.f32 %v1835_v0, %v1757_v21  ;;  %v1884_v14 = vadd.f32 %v1876_v22, %v1759_v3 }
 0x1b4   :  { %v2075_v16 = vpop.f32.mrf.mxu0  ;;  %v2116_v4 = vpop.f32.mrf.mxu1 }
 0x1b6   :  { %v2077_v43 = vpop.f32.mrf.mxu0  ;;  %v2118_v17 = vpop.f32.mrf.mxu1 }
 0x1b7   :  { %v1881_v43 = vadd.f32 %v1833_v56, %v1756_v18  ;;  %v1883_v17 = vadd.f32 %v1874_v20, %v1758_v60 }
 0x1b8   :  { %v2078_v23 = vpop.f32.mrf.mxu0  ;;  %v2119_v42 = vpop.f32.mrf.mxu1 }
 0x1b9   :  { %v1996_v5 = vadd.f32 %v1948_v37, %v1881_v43  ;;  %v1998_v54 = vadd.f32 %v1989_v1, %v1883_v17  ;;  %v3624_v17 = vld [vmem:[%s4830_s7] sm:$0xff] }
 0x1ba   :  { %v2198_v15 = vpop.f32.mrf.mxu0  ;;  %v2239_v62 = vpop.f32.mrf.mxu1 }
 0x1bb   :  { %v2121_v39 = vadd.f32 %v2073_v50, %v1996_v5  ;;  %v2123_v41 = vadd.f32 %v2114_v29, %v1998_v54  ;;  %v2508_v5 = vpop.permute.xlu0 %2507 }
 0x1bc   :  { %v2200_v9 = vpop.f32.mrf.mxu0  ;;  %v2241_v11 = vpop.f32.mrf.mxu1 }
 0x1bd   :  { %v2246_v61 = vadd.f32 %v2198_v15, %v2121_v39  ;;  %v2248_v38 = vadd.f32 %v2239_v62, %v2123_v41 }
 0x1be   :  { %v2202_v52 = vpop.f32.mrf.mxu0  ;;  %v2243_v53 = vpop.f32.mrf.mxu1 }
 0x1bf   :  { %v1997_v52 = vadd.f32 %v1950_v36, %v1882_v6  ;;  %v1999_v53 = vadd.f32 %v1991_v2, %v1884_v14 }
 0x1c0   :  { %v2203_v19 = vpop.f32.mrf.mxu0  ;;  %v2244_v13 = vpop.f32.mrf.mxu1 }
 0x1c1   :  { %v2122_v19 = vadd.f32 %v2075_v16, %v1997_v52  ;;  %v2124_v13 = vadd.f32 %v2116_v4, %v1999_v53 }
 0x1c2   :  { %v2323_v23 = vpop.f32.mrf.mxu0  ;;  %v2364_v42 = vpop.f32.mrf.mxu1 }
 0x1c3   :  { %v2247_v25 = vadd.f32 %v2200_v9, %v2122_v19  ;;  %v2249_v44 = vadd.f32 %v2241_v11, %v2124_v13  ;;  %v2371_v21 = vadd.f32 %v2323_v23, %v2246_v61  ;;  %v2373_v3 = vadd.f32 %v2364_v42, %v2248_v38 }
 0x1c4   :  { %v2325_v27 = vpop.f32.mrf.mxu0  ;;  %v2366_v26 = vpop.f32.mrf.mxu1 }
 0x1c5   :  { %v2372_v56 = vadd.f32 %v2325_v27, %v2247_v25  ;;  %v2374_v20 = vadd.f32 %v2366_v26, %v2249_v44 }
 0x1c6   :  { %v2327_v55 = vpop.f32.mrf.mxu0  ;;  %v2368_v47 = vpop.f32.mrf.mxu1 }
 0x1c8   :  { %v2328_v63 = vpop.f32.mrf.mxu0  ;;  %v2369_v49 = vpop.f32.mrf.mxu1 }
 0x1ca   :  { %v2448_v40 = vpop.f32.mrf.mxu0  ;;  %v2489_v7 = vpop.f32.mrf.mxu1 }
 0x1cb   :  { %v2496_v6 = vadd.f32 %v2448_v40, %v2371_v21  ;;  %v2498_v14 = vadd.f32 %v2489_v7, %v2373_v3 }
 0x1cc   :  { %v2450_v54 = vpop.f32.mrf.mxu0  ;;  %v2491_v0 = vpop.f32.mrf.mxu1 }
 0x1cd   :  { %v2500_v22 = vadd.f32 %v2496_v6, %v4562_v46  ;;  %v2502_v37 = vadd.f32 %v2498_v14, %v4564_v8  ;;  %v2497_v1 = vadd.f32 %v2450_v54, %v2372_v56  ;;  %v2499_v36 = vadd.f32 %v2491_v0, %v2374_v20 }
 0x1ce   :  { %v2452_v2 = vpop.f32.mrf.mxu0  ;;  %v2493_v50 = vpop.f32.mrf.mxu1  ;;  %v4883_v20 = vmov 0  }
 0x1cf   :  { %v2501_v29 = vadd.f32 %v2497_v1, %v4566_v45  ;;  %v2503_v16 = vadd.f32 %v2499_v36, %v4568_v48  ;;  %v2510_v4 = vadd.f32 %v2508_v5, %v2500_v22  ;;  %v2512_v15 = vadd.f32 %v2508_v5, %v2502_v37 }
 0x1d0   :  { %v2453_v62 = vpop.f32.mrf.mxu0  ;;  %v2494_v9 = vpop.f32.mrf.mxu1 }
 0x1d1   :  { %v2511_v11 = vadd.f32 %v2508_v5, %v2501_v29  ;;  %v2513_v28 = vadd.f32 %v2508_v5, %v2503_v16  ;;  %v2514_v10 = vmax.f32 %v2510_v4, 0.0  ;;  %v2516_v60 = vmax.f32 %v2512_v15, 0.0  ;;  %v4884_v9 = vld [vmem:[#allocation6_spill] sm:$0xff] }
 0x1d3   :  { %v2515_v18 = vmax.f32 %v2511_v11, 0.0  ;;  %v4574_v46 = vpack.c.bf16 %v2514_v10, %v2514_v10  ;;  %v2517_v8 = vmax.f32 %v2513_v28, 0.0  ;;  %v4580_v45 = vpack.c.bf16 %v2516_v60, %v2516_v60  ;;  %v4885_v11 = vld [vmem:[#allocation8_spill] sm:$0xff] }
 0x1d5   :  { %v4576_v43 = vpack.c.bf16 %v2515_v18, %v2515_v18  ;;  %2551 = vrot.lane.b32.xlu1 %v4574_v46, %s3849_s9  ;;  %v4584_v48 = vpack.c.bf16 %v2517_v8, %v2517_v8 }
 0x1d7   :  { %2553 = vrot.lane.b32.xlu0 %v4576_v43, %s3849_s9 }
 0x1d9   :  { %2555 = vrot.lane.b32.xlu1 %v4580_v45, %s3849_s9 }
 0x1db   :  { %2523 = vrot.lane.b32.xlu0 %v4584_v48, %s3850_s0 }
 0x1dd   :  { %2549 = vrot.lane.b32.xlu1 %v4584_v48, %s3849_s9 }
 0x1df   :  { %2530 = vrot.lane.b32.xlu0 %v4576_v43, %s3850_s0 }
 0x1e1   :  { %2528 = vrot.lane.b32.xlu1 %v4574_v46, %s3850_s0 }
 0x1e3   :  { %2767 = vrot.lane.b32.xlu0 %v4584_v48, %s3851_s10 }
 0x1e5   :  { %2532 = vrot.lane.b32.xlu1 %v4580_v45, %s3850_s0 }
 0x1e7   :  { %2771 = vrot.lane.b32.xlu0 %v4576_v43, %s3851_s10 }
 0x1e9   :  { %2769 = vrot.lane.b32.xlu1 %v4574_v46, %s3851_s10 }
 0x1eb   :  { %2892 = vrot.lane.b32.xlu0 %v4584_v48, %s3852_s11 }
 0x1ed   :  { %2773 = vrot.lane.b32.xlu1 %v4580_v45, %s3851_s10 }
 0x1ef   :  { %2896 = vrot.lane.b32.xlu0 %v4576_v43, %s3852_s11 }
 0x1f1   :  { %2894 = vrot.lane.b32.xlu1 %v4574_v46, %s3852_s11 }
 0x1f3   :  { %3124 = vrot.lane.b32.xlu0 %v4574_v46, %s3853_s12 }
 0x1f5   :  { %2898 = vrot.lane.b32.xlu1 %v4580_v45, %s3852_s11 }
 0x1f7   :  { %3128 = vrot.lane.b32.xlu0 %v4580_v45, %s3853_s12 }
 0x1f9   :  { %3126 = vrot.lane.b32.xlu1 %v4576_v43, %s3853_s12 }
 0x1fb   :  { %3249 = vrot.lane.b32.xlu0 %v4574_v46, %s3854_s13 }
 0x1fd   :  { %3130 = vrot.lane.b32.xlu1 %v4584_v48, %s3853_s12 }
 0x1ff   :  { %3253 = vrot.lane.b32.xlu0 %v4580_v45, %s3854_s13 }
 0x201   :  { %3251 = vrot.lane.b32.xlu1 %v4576_v43, %s3854_s13 }
 0x203   :  { %3374 = vrot.lane.b32.xlu0 %v4574_v46, %s3855_s14 }
 0x205   :  { %3255 = vrot.lane.b32.xlu1 %v4584_v48, %s3854_s13 }
 0x207   :  { %3378 = vrot.lane.b32.xlu0 %v4580_v45, %s3855_s14 }
 0x209   :  { %3376 = vrot.lane.b32.xlu1 %v4576_v43, %s3855_s14 }
 0x20b   :  { %3499 = vrot.lane.b32.xlu0 %v4574_v46, %s3856_s15 }
 0x20d   :  { %3380 = vrot.lane.b32.xlu1 %v4584_v48, %s3855_s14 }
 0x20f   :  { %3503 = vrot.lane.b32.xlu0 %v4580_v45, %s3856_s15 }
 0x211   :  { %3501 = vrot.lane.b32.xlu1 %v4576_v43, %s3856_s15 }
 0x213   :  { %3627 = vperm.xlu0 %3831, %v3624_v17  }
 0x215   :  { %3505 = vrot.lane.b32.xlu1 %v4584_v48, %s3856_s15 }
 0x247   :  { %v2552_v23 = vpop.permute.xlu1 %2551 }
 0x249   :  { %v2554_v42 = vpop.permute.xlu0 %2553 }
 0x24a   :  { %v2557_v27 = vsel %vm117_vm0, %v2552_v23, %v2554_v42 }
 0x24b   :  { %v2568_v26 = vmul.bf16 %v2557_v27, %v4058_v33  ;;  %v2556_v52 = vpop.permute.xlu1 %2555  ;;  %v4887_v27 = vld [vmem:[#allocation9_spill] sm:$0xff] }
 0x24c   :  { %v2558_v53 = vsel %vm117_vm0, %v2554_v42, %v2556_v52 }
 0x24d   :  { %v2524_v39 = vpop.permute.xlu0 %2523  ;;  %3775 = vmatprep.subr.msk.bf16.mxu0 %vm167_vm1, %v2568_v26  ;;  %v2569_v41 = vmul.bf16 %v2558_v53, %v4066_v35 }
 0x24f   :  { %v2550_v55 = vpop.permute.xlu1 %2549  ;;  %v2583_v49 = vsel %vm167_vm1, %v2569_v41, 0 }
 0x250   :  { %v2559_v47 = vsel %vm117_vm0, %v2556_v52, %v2550_v55  ;;  %v2565_v19 = vsel %vm117_vm0, %v2550_v55, %v2552_v23  ;;  %v4886_v23 = vld [vmem:[#allocation3_spill] sm:$0xff] }
 0x251   :  { %v2567_v13 = vmul.bf16 %v2565_v19, %v4062_v34  ;;  %v2570_v61 = vmul.bf16 %v2559_v47, %v4054_v32  ;;  %v2531_v38 = vpop.permute.xlu0 %2530  ;;  %v3774_v34 = vld [vmem:[%s4831_s6 + $0x4] sm:$0xf]  ;;  %v3018_v42 = vmul.bf16 %v4576_v43, %v4886_v23  ;;  %v4888_v52 = vld [vmem:[#allocation7_spill] sm:$0xff]  ;;  %v4889_v47 = vld [vmem:[#allocation5_spill] sm:$0xff] }
 0x252   :  { %v3020_v43 = vmul.bf16 %v4584_v48, %v4889_v47  ;;  %v4890_v19 = vld [vmem:[#allocation2_spill] sm:$0xff] }
 0x253   :  { %3777 = vmatprep.subr.msk.bf16.mxu1 %vm167_vm1, %v2570_v61  ;;  %v2529_v33 = vpop.permute.xlu1 %2528  ;;  %v2577_v63 = vsel %vm167_vm1, %v2567_v13, 0  ;;  %v3017_v13 = vmul.bf16 %v4574_v46, %v4890_v19  ;;  %v4891_v61 = vld [vmem:[#allocation4_spill] sm:$0xff] }
 0x254   :  { %v2534_v25 = vsel %vm54_vm2, %v2529_v33, %v2531_v38  ;;  %v2542_v35 = vsel %vm54_vm2, %v2524_v39, %v2529_v33  ;;  %2603 = vmatpush1.bf16.msra.mxu0 %v2577_v63  ;;  %2644 = vmatpush1.bf16.msra.mxu1 %v2583_v49  ;;  %v3788_v63 = vld [vmem:[%s4831_s6 + $0xc] sm:$0xf]  ;;  %v4892_v49 = vld [vmem:[#allocation12_spill] sm:$0xff] }
 0x255   :  { %v2544_v32 = vmul.bf16 %v2542_v35, %v4096_v51  ;;  %v2545_v44 = vmul.bf16 %v2534_v25, %v4110_v58  ;;  %v2768_v21 = vpop.permute.xlu0 %2767  ;;  %v3027_v48 = vsel %vm167_vm1, %v3017_v13, 0  ;;  %v4904_v19 = vld [vmem:[#allocation24_spill] sm:$0xff] }
 0x257   :  { %3776 = vmatmul.mubr.msk.bf16.vlgmr.msra.gmra.mxu0 %vm163_vm3, %v3774_v34  ;;  %3778 = vmatmul.mubr.msk.bf16.vlgmr.msra.gmra.mxu1 %vm163_vm3, %v3774_v34  ;;  %v2533_v3 = vpop.permute.xlu1 %2532  ;;  %v2674_v40 = vsel %vm167_vm1, %v2544_v32, 0 }
 0x258   :  { %3779 = vmatprep.subr.msk.bf16.mxu0 %vm167_vm1, %v2545_v44  ;;  %v2535_v7 = vsel %vm54_vm2, %v2531_v38, %v2533_v3  ;;  %v2536_v56 = vsel %vm54_vm2, %v2533_v3, %v2524_v39  ;;  %2717 = vmatprep.mubr.bf16.mxu0 %v4883_v20  ;;  %v3019_v38 = vmul.bf16 %v4580_v45, %v4891_v61 }
 0x259   :  { %v2546_v51 = vmul.bf16 %v2535_v7, %v4114_v59  ;;  %v2547_v58 = vmul.bf16 %v2536_v56, %v4106_v57  ;;  %2700 = vmatpush1.bf16.msra.mxu0 %v2674_v40  ;;  %v2772_v6 = vpop.permute.xlu0 %2771  ;;  %2758 = vmatprep.mubr.bf16.mxu1 %v4883_v20  ;;  %v2548_v59 = vld [vmem:[%s4831_s6] sm:$0xf] }
 0x25a   :  { %v3033_v45 = vsel %vm167_vm1, %v3019_v38, 0  ;;  %v4894_v7 = vld [vmem:[#allocation10_spill] sm:$0xff] }
 0x25b   :  { %3781 = vmatprep.subr.msk.bf16.mxu1 %vm167_vm1, %v2547_v58  ;;  %v2770_v14 = vpop.permute.xlu1 %2769  ;;  %v2680_v5 = vsel %vm167_vm1, %v2546_v51, 0  ;;  %v4895_v51 = vld [vmem:[#allocation13_spill] sm:$0xff] }
 0x25c   :  { %v2775_v54 = vsel %vm367_vm4, %v2770_v14, %v2772_v6  ;;  %v2783_v0 = vsel %vm367_vm4, %v2768_v21, %v2770_v14  ;;  %2741 = vmatpush1.bf16.msra.mxu1 %v2680_v5  ;;  %v3793_v5 = vld [vmem:[%s4831_s6 + $0x10] sm:$0xf] }
 0x25d   :  { %v2785_v57 = vmul.bf16 %v2783_v0, %v4139_v12  ;;  %v2786_v22 = vmul.bf16 %v2775_v54, %v4171_v30  ;;  %v2893_v37 = vpop.permute.xlu0 %2892  ;;  %v4896_v54 = vld [vmem:[#allocation16_spill] sm:$0xff] }
 0x25f   :  { %3780 = vmatmul.mubr.msk.bf16.vlgmr.msra.gmra.mxu0 %vm163_vm3, %v2548_v59  ;;  %3782 = vmatmul.mubr.msk.bf16.vlgmr.msra.gmra.mxu1 %vm163_vm3, %v2548_v59  ;;  %v2774_v1 = vpop.permute.xlu1 %2773  ;;  %v2795_v36 = vsel %vm167_vm1, %v2785_v57, 0 }
 0x260   :  { %3784 = vmatprep.subr.msk.bf16.mxu0 %vm167_vm1, %v2786_v22  ;;  %v2776_v2 = vsel %vm367_vm4, %v2772_v6, %v2774_v1  ;;  %v2777_v50 = vsel %vm367_vm4, %v2774_v1, %v2768_v21  ;;  %2838 = vmatprep.mubr.bf16.mxu0 %v4883_v20  ;;  %v4893_v21 = vld [vmem:[#allocation11_spill] sm:$0xff] }
 0x261   :  { %v2787_v12 = vmul.bf16 %v2776_v2, %v4175_v31  ;;  %v2788_v30 = vmul.bf16 %v2777_v50, %v4167_v24  ;;  %2821 = vmatpush1.bf16.msra.mxu0 %v2795_v36  ;;  %v2897_v29 = vpop.permute.xlu0 %2896  ;;  %2879 = vmatprep.mubr.bf16.mxu1 %v4883_v20  ;;  %v3783_v31 = vld [vmem:[%s4831_s6 + $0x8] sm:$0xf] }
 0x262   :  { %v4897_v50 = vld [vmem:[#allocation15_spill] sm:$0xff] }
 0x263   :  { %3786 = vmatprep.subr.msk.bf16.mxu1 %vm167_vm1, %v2788_v30  ;;  %v2895_v16 = vpop.permute.xlu1 %2894  ;;  %v2801_v4 = vsel %vm167_vm1, %v2787_v12, 0 }
 0x264   :  { %v2900_v15 = vsel %vm510_vm5, %v2895_v16, %v2897_v29  ;;  %v2908_v62 = vsel %vm510_vm5, %v2893_v37, %v2895_v16  ;;  %2862 = vmatpush1.bf16.msra.mxu1 %v2801_v4  ;;  %v4899_v4 = vld [vmem:[#allocation17_spill] sm:$0xff] }
 0x265   :  { %v2910_v24 = vmul.bf16 %v2908_v62, %v4884_v9  ;;  %v2911_v28 = vmul.bf16 %v2900_v15, %v4885_v11  ;;  %v3125_v10 = vpop.permute.xlu0 %3124  ;;  %v3798_v9 = vld [vmem:[%s4831_s6 + $0x14] sm:$0xf] }
 0x267   :  { %3785 = vmatmul.mubr.msk.bf16.vlgmr.msra.gmra.mxu0 %vm163_vm3, %v3783_v31  ;;  %3787 = vmatmul.mubr.msk.bf16.vlgmr.msra.gmra.mxu1 %vm163_vm3, %v3783_v31  ;;  %v2899_v18 = vpop.permute.xlu1 %2898  ;;  %v2920_v60 = vsel %vm167_vm1, %v2910_v24, 0  ;;  %v4900_v24 = vld [vmem:[#allocation20_spill] sm:$0xff] }
 0x268   :  { %3789 = vmatprep.subr.msk.bf16.mxu0 %vm167_vm1, %v2911_v28  ;;  %v2901_v8 = vsel %vm510_vm5, %v2897_v29, %v2899_v18  ;;  %v2902_v17 = vsel %vm510_vm5, %v2899_v18, %v2893_v37  ;;  %2963 = vmatprep.mubr.bf16.mxu0 %v4883_v20  ;;  %v4898_v29 = vld [vmem:[#allocation14_spill] sm:$0xff] }
 0x269   :  { %v2912_v26 = vmul.bf16 %v2901_v8, %v4887_v27  ;;  %v2913_v53 = vmul.bf16 %v2902_v17, %v4888_v52  ;;  %2946 = vmatpush1.bf16.msra.mxu0 %v2920_v60  ;;  %v3129_v39 = vpop.permute.xlu0 %3128  ;;  %3004 = vmatprep.mubr.bf16.mxu1 %v4883_v20 }
 0x26a   :  { %3794 = vmatprep.subr.msk.bf16.mxu0 %vm167_vm1, %v3018_v42  ;;  %v4901_v42 = vld [vmem:[#allocation19_spill] sm:$0xff] }
 0x26b   :  { %3791 = vmatprep.subr.msk.bf16.mxu1 %vm167_vm1, %v2913_v53  ;;  %v3127_v41 = vpop.permute.xlu1 %3126  ;;  %v2926_v55 = vsel %vm167_vm1, %v2912_v26, 0  ;;  %v4902_v26 = vld [vmem:[#allocation18_spill] sm:$0xff]  ;;  %v4903_v53 = vld [vmem:[#allocation21_spill] sm:$0xff] }
 0x26c   :  { %v3133_v33 = vsel %vm796_vm6, %v3127_v41, %v3129_v39  ;;  %2987 = vmatpush1.bf16.msra.mxu1 %v2926_v55  ;;  %v3132_v34 = vsel %vm796_vm6, %v3125_v10, %v3127_v41 }
 0x26d   :  { %v3143_v25 = vmul.bf16 %v3133_v33, %v4892_v49  ;;  %v3250_v35 = vpop.permute.xlu0 %3249  ;;  %3796 = vmatprep.subr.msk.bf16.mxu1 %vm167_vm1, %v3020_v43  ;;  %v3142_v56 = vmul.bf16 %v3132_v34, %v4894_v7  ;;  %v3803_v43 = vld [vmem:[%s4831_s6 + $0x18] sm:$0xf] }
 0x26e   :  { %v4907_v34 = vld [vmem:[#allocation25_spill] sm:$0xff] }
 0x26f   :  { %3790 = vmatmul.mubr.msk.bf16.vlgmr.msra.gmra.mxu0 %vm163_vm3, %v3788_v63  ;;  %3792 = vmatmul.mubr.msk.bf16.vlgmr.msra.gmra.mxu1 %vm163_vm3, %v3788_v63  ;;  %v3131_v46 = vpop.permute.xlu1 %3130  ;;  %v3152_v37 = vsel %vm167_vm1, %v3142_v56, 0 }
 0x270   :  { %v3134_v32 = vsel %vm796_vm6, %v3129_v39, %v3131_v46  ;;  %v3140_v44 = vsel %vm796_vm6, %v3131_v46, %v3125_v10  ;;  %3053 = vmatpush1.bf16.msra.mxu0 %v3027_v48  ;;  %3094 = vmatpush1.bf16.msra.mxu1 %v3033_v45  ;;  %v4906_v48 = vld [vmem:[#allocation22_spill] sm:$0xff] }
 0x271   :  { %v3145_v3 = vmul.bf16 %v3140_v44, %v4893_v21  ;;  %3799 = vmatprep.subr.msk.bf16.mxu0 %vm167_vm1, %v3143_v25  ;;  %v3254_v40 = vpop.permute.xlu0 %3253  ;;  %3070 = vmatprep.mubr.bf16.mxu0 %v4883_v20  ;;  %v3144_v58 = vmul.bf16 %v3134_v32, %v4895_v51  ;;  %v3808_v44 = vld [vmem:[%s4831_s6 + $0x1c] sm:$0xf] }
 0x272   :  { %3111 = vmatprep.mubr.bf16.mxu1 %v4883_v20 }
 0x273   :  { %3801 = vmatprep.subr.msk.bf16.mxu1 %vm167_vm1, %v3145_v3  ;;  %v3252_v6 = vpop.permute.xlu1 %3251  ;;  %v3158_v57 = vsel %vm167_vm1, %v3144_v58, 0 }
 0x274   :  { %v3258_v14 = vsel %vm939_vm7, %v3252_v6, %v3254_v40  ;;  %v3257_v1 = vsel %vm939_vm7, %v3250_v35, %v3252_v6 }
 0x275   :  { %v3268_v0 = vmul.bf16 %v3258_v14, %v4896_v54  ;;  %v3375_v59 = vpop.permute.xlu0 %3374  ;;  %v3267_v16 = vmul.bf16 %v3257_v1, %v4898_v29 }
 0x277   :  { %3797 = vmatmul.mubr.msk.bf16.vlgmr.msra.gmra.mxu1 %vm163_vm3, %v3793_v5  ;;  %v3256_v22 = vpop.permute.xlu1 %3255  ;;  %3795 = vmatmul.mubr.msk.bf16.vlgmr.msra.gmra.mxu0 %vm163_vm3, %v3793_v5  ;;  %v3277_v60 = vsel %vm167_vm1, %v3267_v16, 0 }
 0x278   :  { %3219 = vmatpush1.bf16.msra.mxu1 %v3158_v57  ;;  %v3259_v36 = vsel %vm939_vm7, %v3254_v40, %v3256_v22  ;;  %v3265_v2 = vsel %vm939_vm7, %v3256_v22, %v3250_v35  ;;  %3178 = vmatpush1.bf16.msra.mxu0 %v3152_v37  ;;  %v4905_v35 = vld [vmem:[#allocation23_spill] sm:$0xff]  ;;  %v3813_v40 = vld [vmem:[%s4831_s6 + $0x20] sm:$0xf] }
 0x279   :  { %v3270_v12 = vmul.bf16 %v3265_v2, %v4897_v50  ;;  %3804 = vmatprep.subr.msk.bf16.mxu0 %vm167_vm1, %v3268_v0  ;;  %v3379_v30 = vpop.permute.xlu0 %3378  ;;  %3195 = vmatprep.mubr.bf16.mxu0 %v4883_v20  ;;  %v3269_v15 = vmul.bf16 %v3259_v36, %v4899_v4 }
 0x27a   :  { %3236 = vmatprep.mubr.bf16.mxu1 %v4883_v20 }
 0x27b   :  { %3806 = vmatprep.subr.msk.bf16.mxu1 %vm167_vm1, %v3270_v12  ;;  %v3377_v62 = vpop.permute.xlu1 %3376  ;;  %v3283_v10 = vsel %vm167_vm1, %v3269_v15, 0 }
 0x27c   :  { %v3383_v31 = vsel %vm1082_vm8, %v3377_v62, %v3379_v30  ;;  %v3382_v8 = vsel %vm1082_vm8, %v3375_v59, %v3377_v62 }
 0x27d   :  { %v3393_v11 = vmul.bf16 %v3383_v31, %v4900_v24  ;;  %v3500_v28 = vpop.permute.xlu0 %3499  ;;  %v3392_v52 = vmul.bf16 %v3382_v8, %v4902_v26 }
 0x27f   :  { %3802 = vmatmul.mubr.msk.bf16.vlgmr.msra.gmra.mxu1 %vm163_vm3, %v3798_v9  ;;  %v3381_v18 = vpop.permute.xlu1 %3380  ;;  %3800 = vmatmul.mubr.msk.bf16.vlgmr.msra.gmra.mxu0 %vm163_vm3, %v3798_v9  ;;  %v3402_v33 = vsel %vm167_vm1, %v3392_v52, 0 }
 0x280   :  { %3344 = vmatpush1.bf16.msra.mxu1 %v3283_v10  ;;  %v3384_v17 = vsel %vm1082_vm8, %v3379_v30, %v3381_v18  ;;  %v3390_v23 = vsel %vm1082_vm8, %v3381_v18, %v3375_v59  ;;  %3303 = vmatpush1.bf16.msra.mxu0 %v3277_v60 }
 0x281   :  { %v3395_v27 = vmul.bf16 %v3390_v23, %v4901_v42  ;;  %3809 = vmatprep.subr.msk.bf16.mxu0 %vm167_vm1, %v3393_v11  ;;  %3320 = vmatprep.mubr.bf16.mxu0 %v4883_v20  ;;  %v3394_v39 = vmul.bf16 %v3384_v17, %v4903_v53  ;;  %v3504_v41 = vpop.permute.xlu0 %3503 }
 0x282   :  { %3361 = vmatprep.mubr.bf16.mxu1 %v4883_v20 }
 0x283   :  { %3811 = vmatprep.subr.msk.bf16.mxu1 %vm167_vm1, %v3395_v27  ;;  %v3502_v55 = vpop.permute.xlu1 %3501  ;;  %v3408_v61 = vsel %vm167_vm1, %v3394_v39, 0 }
 0x284   :  { %v3508_v47 = vsel %vm1225_vm9, %v3502_v55, %v3504_v41  ;;  %v3507_v63 = vsel %vm1225_vm9, %v3500_v28, %v3502_v55 }
 0x285   :  { %v3518_v13 = vmul.bf16 %v3508_v47, %v4904_v19  ;;  %v3517_v45 = vmul.bf16 %v3507_v63, %v4906_v48 }
 0x287   :  { %3807 = vmatmul.mubr.msk.bf16.vlgmr.msra.gmra.mxu1 %vm163_vm3, %v3803_v43  ;;  %v3506_v38 = vpop.permute.xlu1 %3505  ;;  %3805 = vmatmul.mubr.msk.bf16.vlgmr.msra.gmra.mxu0 %vm163_vm3, %v3803_v43  ;;  %v3527_v21 = vsel %vm167_vm1, %v3517_v45, 0 }
 0x288   :  { %3469 = vmatpush1.bf16.msra.mxu1 %v3408_v61  ;;  %v3509_v49 = vsel %vm1225_vm9, %v3504_v41, %v3506_v38  ;;  %v3515_v25 = vsel %vm1225_vm9, %v3506_v38, %v3500_v28  ;;  %3428 = vmatpush1.bf16.msra.mxu0 %v3402_v33 }
 0x289   :  { %v3520_v46 = vmul.bf16 %v3515_v25, %v4905_v35  ;;  %3814 = vmatprep.subr.msk.bf16.mxu0 %vm167_vm1, %v3518_v13  ;;  %3445 = vmatprep.mubr.bf16.mxu0 %v4883_v20  ;;  %v3519_v32 = vmul.bf16 %v3509_v49, %v4907_v34 }
 0x28a   :  { %3486 = vmatprep.mubr.bf16.mxu1 %v4883_v20 }
 0x28b   :  { %3816 = vmatprep.subr.msk.bf16.mxu1 %vm167_vm1, %v3520_v46  ;;  %v3533_v3 = vsel %vm167_vm1, %v3519_v32, 0 }
 0x28f   :  { %3810 = vmatmul.mubr.msk.bf16.vlgmr.msra.gmra.mxu0 %vm163_vm3, %v3808_v44  ;;  %3812 = vmatmul.mubr.msk.bf16.vlgmr.msra.gmra.mxu1 %vm163_vm3, %v3808_v44 }
 0x290   :  { %3553 = vmatpush1.bf16.msra.mxu0 %v3527_v21  ;;  %3594 = vmatpush1.bf16.msra.mxu1 %v3533_v3 }
 0x291   :  { %3570 = vmatprep.mubr.bf16.mxu0 %v4883_v20  ;;  %3611 = vmatprep.mubr.bf16.mxu1 %v4883_v20 }
 0x297   :  { %3815 = vmatmul.mubr.msk.bf16.vlgmr.msra.gmra.mxu0 %vm163_vm3, %v3813_v40  ;;  %3817 = vmatmul.mubr.msk.bf16.vlgmr.msra.gmra.mxu1 %vm163_vm3, %v3813_v40 }
 0x317   :  { %v2622_v7 = vpop.f32.mrf.mxu0  ;;  %v2663_v56 = vpop.f32.mrf.mxu1 }
 0x319   :  { %v2624_v51 = vpop.f32.mrf.mxu0  ;;  %v2665_v58 = vpop.f32.mrf.mxu1 }
 0x31b   :  { %v2626_v6 = vpop.f32.mrf.mxu0  ;;  %v2667_v14 = vpop.f32.mrf.mxu1 }
 0x31d   :  { %v2627_v5 = vpop.f32.mrf.mxu0  ;;  %v2668_v54 = vpop.f32.mrf.mxu1 }
 0x31f   :  { %v2719_v0 = vpop.f32.mrf.mxu0  ;;  %v2760_v59 = vpop.f32.mrf.mxu1 }
 0x320   :  { %v2720_v49 = vadd.f32 %v2719_v0, %v2622_v7  ;;  %v2761_v25 = vadd.f32 %v2760_v59, %v2663_v56 }
 0x321   :  { %v2721_v57 = vpop.f32.mrf.mxu0  ;;  %v2762_v20 = vpop.f32.mrf.mxu1 }
 0x322   :  { %v2722_v48 = vadd.f32 %v2721_v57, %v2624_v51  ;;  %v2763_v45 = vadd.f32 %v2762_v20, %v2665_v58 }
 0x323   :  { %v2723_v22 = vpop.f32.mrf.mxu0  ;;  %v2764_v37 = vpop.f32.mrf.mxu1 }
 0x325   :  { %v2724_v1 = vpop.f32.mrf.mxu0  ;;  %v2765_v36 = vpop.f32.mrf.mxu1 }
 0x327   :  { %v2840_v2 = vpop.f32.mrf.mxu0  ;;  %v2881_v50 = vpop.f32.mrf.mxu1 }
 0x328   :  { %v2888_v34 = vadd.f32 %v2840_v2, %v2720_v49  ;;  %v2890_v32 = vadd.f32 %v2881_v50, %v2761_v25 }
 0x329   :  { %v2842_v12 = vpop.f32.mrf.mxu0  ;;  %v2883_v30 = vpop.f32.mrf.mxu1 }
 0x32a   :  { %v2889_v3 = vadd.f32 %v2842_v12, %v2722_v48  ;;  %v2891_v40 = vadd.f32 %v2883_v30, %v2763_v45 }
 0x32b   :  { %v2844_v29 = vpop.f32.mrf.mxu0  ;;  %v2885_v16 = vpop.f32.mrf.mxu1 }
 0x32d   :  { %v2845_v4 = vpop.f32.mrf.mxu0  ;;  %v2886_v15 = vpop.f32.mrf.mxu1 }
 0x32f   :  { %v2965_v62 = vpop.f32.mrf.mxu0  ;;  %v3006_v31 = vpop.f32.mrf.mxu1 }
 0x330   :  { %v3013_v6 = vadd.f32 %v2965_v62, %v2888_v34  ;;  %v3015_v14 = vadd.f32 %v3006_v31, %v2890_v32 }
 0x331   :  { %v2967_v9 = vpop.f32.mrf.mxu0  ;;  %v3008_v24 = vpop.f32.mrf.mxu1 }
 0x332   :  { %v3014_v22 = vadd.f32 %v2967_v9, %v2889_v3  ;;  %v3016_v37 = vadd.f32 %v3008_v24, %v2891_v40 }
 0x333   :  { %v2969_v11 = vpop.f32.mrf.mxu0  ;;  %v3010_v28 = vpop.f32.mrf.mxu1 }
 0x334   :  { %v3628_v11 = vpop.permute.xlu0 %3627 }
 0x335   :  { %v2970_v10 = vpop.f32.mrf.mxu0  ;;  %v3011_v18 = vpop.f32.mrf.mxu1 }
 0x337   :  { %v3072_v60 = vpop.f32.mrf.mxu0  ;;  %v3113_v8 = vpop.f32.mrf.mxu1 }
 0x338   :  { %v3120_v1 = vadd.f32 %v3072_v60, %v3013_v6  ;;  %v3122_v36 = vadd.f32 %v3113_v8, %v3015_v14 }
 0x339   :  { %v3074_v17 = vpop.f32.mrf.mxu0  ;;  %v3115_v23 = vpop.f32.mrf.mxu1 }
 0x33a   :  { %v3121_v0 = vadd.f32 %v3074_v17, %v3014_v22  ;;  %v3123_v59 = vadd.f32 %v3115_v23, %v3016_v37 }
 0x33b   :  { %v3076_v42 = vpop.f32.mrf.mxu0  ;;  %v3117_v27 = vpop.f32.mrf.mxu1 }
 0x33d   :  { %v3077_v26 = vpop.f32.mrf.mxu0  ;;  %v3118_v52 = vpop.f32.mrf.mxu1 }
 0x33f   :  { %v3197_v53 = vpop.f32.mrf.mxu0  ;;  %v3238_v39 = vpop.f32.mrf.mxu1 }
 0x340   :  { %v3245_v51 = vadd.f32 %v3197_v53, %v3120_v1  ;;  %v3247_v58 = vadd.f32 %v3238_v39, %v3122_v36 }
 0x341   :  { %v3199_v41 = vpop.f32.mrf.mxu0  ;;  %v3240_v55 = vpop.f32.mrf.mxu1 }
 0x342   :  { %v3246_v2 = vadd.f32 %v3199_v41, %v3121_v0  ;;  %v3248_v50 = vadd.f32 %v3240_v55, %v3123_v59 }
 0x343   :  { %v3201_v47 = vpop.f32.mrf.mxu0  ;;  %v3242_v43 = vpop.f32.mrf.mxu1 }
 0x345   :  { %v3202_v19 = vpop.f32.mrf.mxu0  ;;  %v3243_v13 = vpop.f32.mrf.mxu1 }
 0x347   :  { %v3322_v61 = vpop.f32.mrf.mxu0  ;;  %v3363_v38 = vpop.f32.mrf.mxu1 }
 0x348   :  { %v3370_v12 = vadd.f32 %v3322_v61, %v3245_v51  ;;  %v3372_v30 = vadd.f32 %v3363_v38, %v3247_v58 }
 0x349   :  { %v3324_v33 = vpop.f32.mrf.mxu0  ;;  %v3365_v63 = vpop.f32.mrf.mxu1 }
 0x34a   :  { %v3371_v4 = vadd.f32 %v3324_v33, %v3246_v2  ;;  %v3373_v15 = vadd.f32 %v3365_v63, %v3248_v50 }
 0x34b   :  { %v3326_v35 = vpop.f32.mrf.mxu0  ;;  %v3367_v46 = vpop.f32.mrf.mxu1 }
 0x34d   :  { %v3327_v44 = vpop.f32.mrf.mxu0  ;;  %v3368_v21 = vpop.f32.mrf.mxu1 }
 0x34f   :  { %v3447_v5 = vpop.f32.mrf.mxu0  ;;  %v3488_v54 = vpop.f32.mrf.mxu1 }
 0x350   :  { %v3495_v62 = vadd.f32 %v3447_v5, %v3370_v12  ;;  %v3497_v31 = vadd.f32 %v3488_v54, %v3372_v30 }
 0x351   :  { %v3449_v7 = vpop.f32.mrf.mxu0  ;;  %v3490_v56 = vpop.f32.mrf.mxu1 }
 0x352   :  { %v3496_v28 = vadd.f32 %v3449_v7, %v3371_v4  ;;  %v3498_v10 = vadd.f32 %v3490_v56, %v3373_v15 }
 0x353   :  { %v3451_v57 = vpop.f32.mrf.mxu0  ;;  %v3492_v20 = vpop.f32.mrf.mxu1 }
 0x355   :  { %v3452_v29 = vpop.f32.mrf.mxu0  ;;  %v3493_v16 = vpop.f32.mrf.mxu1 }
 0x357   :  { %v3572_v9 = vpop.f32.mrf.mxu0  ;;  %v3613_v24 = vpop.f32.mrf.mxu1 }
 0x358   :  { %v3620_v18 = vadd.f32 %v3572_v9, %v3495_v62  ;;  %v3622_v60 = vadd.f32 %v3613_v24, %v3497_v31 }
 0x359   :  { %v3574_v8 = vpop.f32.mrf.mxu0  ;;  %v3615_v17 = vpop.f32.mrf.mxu1 }
 0x35a   :  { %v3630_v23 = vadd.f32 %v3628_v11, %v3620_v18  ;;  %v3632_v42 = vadd.f32 %v3628_v11, %v3622_v60  ;;  %v3621_v27 = vadd.f32 %v3574_v8, %v3496_v28  ;;  %v3623_v26 = vadd.f32 %v3615_v17, %v3498_v10 }
 0x35b   :  { %v3576_v52 = vpop.f32.mrf.mxu0  ;;  %v3617_v53 = vpop.f32.mrf.mxu1 }
 0x35c   :  { %v3631_v39 = vadd.f32 %v3628_v11, %v3621_v27  ;;  %v3633_v41 = vadd.f32 %v3628_v11, %v3623_v26  ;;  %v3634_v43 = vmax.f32 %v3630_v23, 0.0  ;;  %v3636_v19 = vmax.f32 %v3632_v42, 0.0 }
 0x35d   :  { %v3577_v55 = vpop.f32.mrf.mxu0  ;;  %v3618_v47 = vpop.f32.mrf.mxu1 }
 0x35e   :  { %v3635_v13 = vmax.f32 %v3631_v39, 0.0  ;;  %v3637_v61 = vmax.f32 %v3633_v41, 0.0 }
 0x360   :  { %v3820_v38 = vpack.c.bf16 %v3635_v13, %v3634_v43  ;;  %v3821_v33 = vpack.c.bf16 %v3637_v61, %v3636_v19 }
 0x362   :  { %3654 = vst [vmem:[%s4832_s8] sm:$0xff] %v3820_v38  ;;  %3655 = vst [vmem:[%s4832_s8 + $0x8] sm:$0xff] %v3821_v33 }

</bundles_post_ra>
